<compile_context>
chip_gen: v5e
topology: v5e:2x2
jax: 0.10.0
libtpu: 0.0.40
codegen_flags: <defaults>
</compile_context>

<pallas_src>
import math

import jax
import jax.numpy as jnp
from jax.experimental import pallas as pl
from jax.experimental.pallas import tpu as pltpu


LANE = 128


def _round_up(x, m):
    return ((x + m - 1) // m) * m


def _pick_tile(n, max_tile=512):
    """Largest lane-dense tile in {512,256,128} with <=25% padding waste."""
    budget = _round_up(max(int(n), 1), LANE)
    budget += budget // 4
    for t in (512, 256, 128):
        if t <= max_tile and _round_up(n, t) <= budget:
            return t
    return LANE


def _vmem_limit_bytes():
    """Generation-aware VMEM budget: ~70% of capacity, capped at 100 MiB."""
    cap = 128 * 1024 * 1024
    try:
        cap = int(pltpu.get_tpu_info().vmem_capacity_bytes)
    except Exception:
        pass
    return min(int(cap * 0.7), 100 * 1024 * 1024)


# --------------------------------------------------------------------------
# Kernel bodies (K-blocked; epilogue under pl.when on the last K step)
# --------------------------------------------------------------------------
def _plk_shared_kernel(coef_ref, an_ref, bn_ref, xt_ref, b_ref, out_ref, acc_ref):
    """Single-matmul path: linear term == distance matmul (X.T@Y or X.T@X).

    coef_ref : (1, 2) SMEM  [pi/p1, -2/p0^2]
    an_ref   : (TM, 1) column norms of X for this row-tile
    bn_ref   : (1, TN) column norms of B for this col-tile
    xt_ref   : (TM, TK) rows i-block, feature k-block of X.T
    b_ref    : (TK, TN) feature k-block, cols j-block of B (= X or Y)
    out_ref  : (TM, TN)
    acc_ref  : (TM, TN) f32 VMEM accumulator
    """
    k = pl.program_id(2)

    @pl.when(k == 0)
    def _():
        acc_ref[...] = jnp.zeros_like(acc_ref)

    # One MXU matmul per K step: serves as both the -2ab distance term and the
    # linear term.
    acc_ref[...] += jnp.dot(xt_ref[...], b_ref[...],
                            preferred_element_type=jnp.float32)

    @pl.when(k == pl.num_programs(2) - 1)
    def _():
        c_sin = coef_ref[0, 0]
        c_exp = coef_ref[0, 1]
        ab = acc_ref[...]
        d2 = jnp.maximum(an_ref[...] + bn_ref[...] - 2.0 * ab, 0.0)
        s = jnp.sin(c_sin * d2)
        out_ref[...] = jnp.exp(c_exp * (s * s)) * ab


def _plk_grad_xx_kernel(coef_ref, an_ref, bn_ref, xt_i_ref, x_j_ref, xt_j_ref,
                        out_ref, ab_ref, lin_ref):
    """Two-matmul path (Y=None, grad=True): linear term is X.T @ X.T.

    coef_ref : (1, 2) SMEM  [pi/p1, -2/p0^2]
    an_ref   : (TM, 1), bn_ref : (1, TN) column norms of X
    xt_i_ref : (TM, TK) rows i-block, cols k-block of X.T
    x_j_ref  : (TK, TN) rows k-block, cols j-block of X     (distance matmul rhs)
    xt_j_ref : (TK, TN) rows k-block, cols j-block of X.T   (linear-term rhs)
    out_ref  : (TM, TN)
    ab_ref   : (TM, TN) f32 VMEM accumulator for X.T @ X
    lin_ref  : (TM, TN) f32 VMEM accumulator for X.T @ X.T
    """
    k = pl.program_id(2)

    @pl.when(k == 0)
    def _():
        ab_ref[...] = jnp.zeros_like(ab_ref)
        lin_ref[...] = jnp.zeros_like(lin_ref)

    xt_i = xt_i_ref[...]
    ab_ref[...] += jnp.dot(xt_i, x_j_ref[...], preferred_element_type=jnp.float32)
    lin_ref[...] += jnp.dot(xt_i, xt_j_ref[...], preferred_element_type=jnp.float32)

    @pl.when(k == pl.num_programs(2) - 1)
    def _():
        c_sin = coef_ref[0, 0]
        c_exp = coef_ref[0, 1]
        # -2 applied once on the (TM, TN) accumulator (no operand pre-scale).
        d2 = jnp.maximum(an_ref[...] + bn_ref[...] - 2.0 * ab_ref[...], 0.0)
        s = jnp.sin(c_sin * d2)
        out_ref[...] = jnp.exp(c_exp * (s * s)) * lin_ref[...]


# --------------------------------------------------------------------------
# Wrapper
# --------------------------------------------------------------------------
def periodic_linear_forward(X, params, Y=None, grad=True):
    """JAX/Pallas equivalent of PeriodicLinearKernel.forward. Returns (n, n_B) f32."""
    X = jnp.asarray(X, jnp.float32)
    d, n = X.shape
    p = jnp.asarray(params, jnp.float32).reshape(2)

    # Hoisted scalar prep: sin coefficient and exponent coefficient.
    c_sin = jnp.float32(math.pi) / p[1]
    c_exp = jnp.float32(-2.0) / (p[0] * p[0])
    coefs = jnp.stack([c_sin, c_exp]).reshape(1, 2).astype(jnp.float32)

    cparams = pltpu.CompilerParams(
        dimension_semantics=("parallel", "parallel", "arbitrary"),
        vmem_limit_bytes=_vmem_limit_bytes(),
    )

    if Y is None and grad:
        # Linear term X.T @ X.T requires a square X (n == d).
        if d != n:
            raise ValueError("grad=True with Y=None requires square X (X.T @ X.T).")
        T = _pick_tile(n)            # TM == TN == TK: N is padded to a multiple of T
        TK = T
        N = _round_up(n, T)

        Xp = jnp.pad(X, ((0, N - d), (0, N - n)))          # (N, N)
        XT = Xp.T                                          # single transpose, aliased
        col_norm = jnp.sum(Xp * Xp, axis=0)                # (N,)
        an = col_norm.reshape(N, 1)
        bn = col_norm.reshape(1, N)

        grid = (N // T, N // T, N // TK)

        out = pl.pallas_call(
            _plk_grad_xx_kernel,
            out_shape=jax.ShapeDtypeStruct((N, N), jnp.float32),
            grid=grid,
            in_specs=[
                pl.BlockSpec((1, 2), lambda i, j, k: (0, 0),
                             memory_space=pltpu.MemorySpace.SMEM),     # coefs
                pl.BlockSpec((T, 1), lambda i, j, k: (i, 0)),          # an
                pl.BlockSpec((1, T), lambda i, j, k: (0, j)),          # bn
                pl.BlockSpec((T, TK), lambda i, j, k: (i, k)),         # X.T (i,k)
                pl.BlockSpec((TK, T), lambda i, j, k: (k, j)),         # X   (k,j)
                pl.BlockSpec((TK, T), lambda i, j, k: (k, j)),         # X.T (k,j)
            ],
            out_specs=pl.BlockSpec((T, T), lambda i, j, k: (i, j)),
            scratch_shapes=[pltpu.VMEM((T, T), jnp.float32),
                            pltpu.VMEM((T, T), jnp.float32)],
            compiler_params=cparams,
        )(coefs, an, bn, XT, Xp, XT)
        return out[:n, :n]

    # Shared-operand paths: linear term == X.T @ B where B is the distance operand.
    if Y is None:
        B = X                                   # grad=False, Y=None: lin = X.T @ X
    else:
        B = jnp.asarray(Y, jnp.float32)
        if B.shape[0] != d:
            raise ValueError("X and Y must have the same leading (feature) dimension.")
    nB = B.shape[1]

    TM = _pick_tile(n)
    TN = _pick_tile(nB)
    TK = _pick_tile(d)
    NX = _round_up(n, TM)
    NB = _round_up(nB, TN)
    Dp = _round_up(d, TK)

    XTp = jnp.pad(X.T, ((0, NX - n), (0, Dp - d)))         # (NX, Dp)
    Bp = jnp.pad(B, ((0, Dp - d), (0, NB - nB)))           # (Dp, NB)
    an = jnp.sum(XTp * XTp, axis=1).reshape(NX, 1)
    bn = jnp.sum(Bp * Bp, axis=0).reshape(1, NB)

    grid = (NX // TM, NB // TN, Dp // TK)

    out = pl.pallas_call(
        _plk_shared_kernel,
        out_shape=jax.ShapeDtypeStruct((NX, NB), jnp.float32),
        grid=grid,
        in_specs=[
            pl.BlockSpec((1, 2), lambda i, j, k: (0, 0),
                         memory_space=pltpu.MemorySpace.SMEM),         # coefs
            pl.BlockSpec((TM, 1), lambda i, j, k: (i, 0)),             # an
            pl.BlockSpec((1, TN), lambda i, j, k: (0, j)),             # bn
            pl.BlockSpec((TM, TK), lambda i, j, k: (i, k)),            # X.T (i,k)
            pl.BlockSpec((TK, TN), lambda i, j, k: (k, j)),            # B   (k,j)
        ],
        out_specs=pl.BlockSpec((TM, TN), lambda i, j, k: (i, j)),
        scratch_shapes=[pltpu.VMEM((TM, TN), jnp.float32)],
        compiler_params=cparams,
    )(coefs, an, bn, XTp, Bp)
    return out[:n, :nB]


# --------------------------------------------------------------------------
# Pure-JAX reference (matches the PyTorch semantics)
# --------------------------------------------------------------------------
def _reference(X, params, Y=None, grad=True):
    X = jnp.asarray(X, jnp.float32)
    p0, p1 = params[0], params[1]
    if Y is None:
        pts = X.T
        d2 = jnp.sum((pts[:, None, :] - pts[None, :, :]) ** 2, axis=-1)
        lin = X.T @ X.T if grad else X.T @ X
    else:
        Y = jnp.asarray(Y, jnp.float32)
        d2 = jnp.sum((X.T[:, None, :] - Y.T[None, :, :]) ** 2, axis=-1)
        lin = X.T @ Y
    return jnp.exp(-2.0 / (p0 ** 2) * jnp.sin(math.pi * d2 / p1) ** 2) * lin


if __name__ == "__main__":
    key = jax.random.PRNGKey(0)
    kx, ky = jax.random.split(key)

    n = 16  # X is (n, n) as in the module's docstring; columns are the points
    X = jax.random.normal(kx, (n, n), dtype=jnp.float32)
    Y = jax.random.normal(ky, (n, n), dtype=jnp.float32)
    params = jnp.array([1.5, 2.0], dtype=jnp.float32)   # [lengthscale, period]

    # Y=None, grad=True  (two-matmul path: X.T @ X.T)
    out_xx = jax.block_until_ready(periodic_linear_forward(X, params, Y=None, grad=True))
    ref_xx = _reference(X, params, Y=None, grad=True)

    # Y=None, grad=False (single-matmul path: X.T @ X)
    out_ng = jax.block_until_ready(periodic_linear_forward(X, params, Y=None, grad=False))
    ref_ng = _reference(X, params, Y=None, grad=False)

    # X, Y path          (single-matmul path: X.T @ Y)
    out_xy = jax.block_until_ready(periodic_linear_forward(X, params, Y=Y, grad=True))
    ref_xy = _reference(X, params, Y=Y, grad=True)

    assert out_xx.shape == (n, n) and out_ng.shape == (n, n) and out_xy.shape == (n, n)
    assert jnp.allclose(out_xx, ref_xx, atol=1e-3, rtol=1e-3)
    assert jnp.allclose(out_ng, ref_ng, atol=1e-3, rtol=1e-3)
    assert jnp.allclose(out_xy, ref_xy, atol=1e-3, rtol=1e-3)

    print("KERNEL_OK")
</pallas_src>

<mosaic_0001>
module attributes {stable_mosaic.version = 11 : i64} {
  func.func @_plk_grad_xx_kernel(%arg0: i32, %arg1: i32, %arg2: i32, %arg3: memref<1x2xf32, #tpu.memory_space<smem>>, %arg4: memref<128x1xf32, #tpu.memory_space<vmem>>, %arg5: memref<1x128xf32, #tpu.memory_space<vmem>>, %arg6: memref<128x128xf32, #tpu.memory_space<vmem>>, %arg7: memref<128x128xf32, #tpu.memory_space<vmem>>, %arg8: memref<128x128xf32, #tpu.memory_space<vmem>>, %arg9: memref<128x128xf32, #tpu.memory_space<vmem>>, %arg10: memref<128x128xf32, #tpu.memory_space<vmem>>, %arg11: memref<128x128xf32, #tpu.memory_space<vmem>>) attributes {dimension_semantics = [#tpu.dimension_semantics<parallel>, #tpu.dimension_semantics<parallel>, #tpu.dimension_semantics<arbitrary>], iteration_bounds = array<i64: 1, 1, 1>, scalar_prefetch = 0 : i64, scratch_operands = 2 : i64, tpu.core_type = #tpu.core_type<tc>, window_params = [{transform_indices = @transform_0, window_bounds = array<i64: 1, 2>}, {transform_indices = @transform_1, window_bounds = array<i64: 128, 1>}, {transform_indices = @transform_2, window_bounds = array<i64: 1, 128>}, {transform_indices = @transform_3, window_bounds = array<i64: 128, 128>}, {transform_indices = @transform_4, window_bounds = array<i64: 128, 128>}, {transform_indices = @transform_5, window_bounds = array<i64: 128, 128>}, {transform_indices = @transform_6, window_bounds = array<i64: 128, 128>}]} {
    %c0_i32 = arith.constant 0 : i32
    %0 = arith.cmpi eq, %arg2, %c0_i32 : i32
    %1 = arith.extui %0 : i1 to i32
    %c0_i32_0 = arith.constant 0 : i32
    %2 = arith.cmpi ne, %1, %c0_i32_0 : i32
    scf.if %2 {
      %cst_17 = arith.constant 0.000000e+00 : f32
      %17 = vector.broadcast %cst_17 : f32 to vector<128x128xf32>
      %c0_18 = arith.constant 0 : index
      %c0_19 = arith.constant 0 : index
      %18 = vector.load %arg10[%c0_18, %c0_19] : memref<128x128xf32, #tpu.memory_space<vmem>>, vector<128x128xf32>
      tpu.vector_store %arg10[%c0_18, %c0_19], %17 {strides = array<i32>} : memref<128x128xf32, #tpu.memory_space<vmem>>, vector<128x128xf32>,
      %cst_20 = arith.constant 0.000000e+00 : f32
      %19 = vector.broadcast %cst_20 : f32 to vector<128x128xf32>
      %c0_21 = arith.constant 0 : index
      %c0_22 = arith.constant 0 : index
      %20 = vector.load %arg11[%c0_21, %c0_22] : memref<128x128xf32, #tpu.memory_space<vmem>>, vector<128x128xf32>
      tpu.vector_store %arg11[%c0_21, %c0_22], %19 {strides = array<i32>} : memref<128x128xf32, #tpu.memory_space<vmem>>, vector<128x128xf32>,
    } else {
    }
    %c0 = arith.constant 0 : index
    %c0_1 = arith.constant 0 : index
    %3 = vector.load %arg6[%c0, %c0_1] : memref<128x128xf32, #tpu.memory_space<vmem>>, vector<128x128xf32>
    %c0_2 = arith.constant 0 : index
    %c0_3 = arith.constant 0 : index
    %4 = vector.load %arg10[%c0_2, %c0_3] : memref<128x128xf32, #tpu.memory_space<vmem>>, vector<128x128xf32>
    %c0_4 = arith.constant 0 : index
    %c0_5 = arith.constant 0 : index
    %5 = vector.load %arg7[%c0_4, %c0_5] : memref<128x128xf32, #tpu.memory_space<vmem>>, vector<128x128xf32>
    %cst = arith.constant dense<0.000000e+00> : vector<128x128xf32>
    %6 = tpu.matmul %3, %5, %cst {dimension_numbers = #tpu.dot_dimension_numbers<[1], [0], [0], [1], [0, 0, 1, 1], [], []>} : vector<128x128xf32>, vector<128x128xf32>, vector<128x128xf32> -> vector<128x128xf32>
    %7 = arith.addf %4, %6 : vector<128x128xf32>
    %c0_6 = arith.constant 0 : index
    %c0_7 = arith.constant 0 : index
    %8 = vector.load %arg10[%c0_6, %c0_7] : memref<128x128xf32, #tpu.memory_space<vmem>>, vector<128x128xf32>
    tpu.vector_store %arg10[%c0_6, %c0_7], %7 {strides = array<i32>} : memref<128x128xf32, #tpu.memory_space<vmem>>, vector<128x128xf32>,
    %c0_8 = arith.constant 0 : index
    %c0_9 = arith.constant 0 : index
    %9 = vector.load %arg11[%c0_8, %c0_9] : memref<128x128xf32, #tpu.memory_space<vmem>>, vector<128x128xf32>
    %c0_10 = arith.constant 0 : index
    %c0_11 = arith.constant 0 : index
    %10 = vector.load %arg8[%c0_10, %c0_11] : memref<128x128xf32, #tpu.memory_space<vmem>>, vector<128x128xf32>
    %cst_12 = arith.constant dense<0.000000e+00> : vector<128x128xf32>
    %11 = tpu.matmul %3, %10, %cst_12 {dimension_numbers = #tpu.dot_dimension_numbers<[1], [0], [0], [1], [0, 0, 1, 1], [], []>} : vector<128x128xf32>, vector<128x128xf32>, vector<128x128xf32> -> vector<128x128xf32>
    %12 = arith.addf %9, %11 : vector<128x128xf32>
    %c0_13 = arith.constant 0 : index
    %c0_14 = arith.constant 0 : index
    %13 = vector.load %arg11[%c0_13, %c0_14] : memref<128x128xf32, #tpu.memory_space<vmem>>, vector<128x128xf32>
    tpu.vector_store %arg11[%c0_13, %c0_14], %12 {strides = array<i32>} : memref<128x128xf32, #tpu.memory_space<vmem>>, vector<128x128xf32>,
    %c0_i32_15 = arith.constant 0 : i32
    %14 = arith.cmpi eq, %arg2, %c0_i32_15 : i32
    %15 = arith.extui %14 : i1 to i32
    %c0_i32_16 = arith.constant 0 : i32
    %16 = arith.cmpi ne, %15, %c0_i32_16 : i32
    scf.if %16 {
      %c0_17 = arith.constant 0 : index
      %c0_18 = arith.constant 0 : index
      %17 = memref.load %arg3[%c0_17, %c0_18] : memref<1x2xf32, #tpu.memory_space<smem>>
      %c0_19 = arith.constant 0 : index
      %c1 = arith.constant 1 : index
      %18 = memref.load %arg3[%c0_19, %c1] : memref<1x2xf32, #tpu.memory_space<smem>>
      %c0_20 = arith.constant 0 : index
      %c0_21 = arith.constant 0 : index
      %19 = vector.load %arg4[%c0_20, %c0_21] : memref<128x1xf32, #tpu.memory_space<vmem>>, vector<128x1xf32>
      %c0_22 = arith.constant 0 : index
      %c0_23 = arith.constant 0 : index
      %20 = vector.load %arg5[%c0_22, %c0_23] : memref<1x128xf32, #tpu.memory_space<vmem>>, vector<1x128xf32>
      %21 = vector.broadcast %19 : vector<128x1xf32> to vector<128x128xf32>
      %22 = vector.broadcast %20 : vector<1x128xf32> to vector<128x128xf32>
      %23 = arith.addf %21, %22 : vector<128x128xf32>
      %c0_24 = arith.constant 0 : index
      %c0_25 = arith.constant 0 : index
      %24 = vector.load %arg10[%c0_24, %c0_25] : memref<128x128xf32, #tpu.memory_space<vmem>>, vector<128x128xf32>
      %cst_26 = arith.constant 2.000000e+00 : f32
      %25 = vector.broadcast %cst_26 : f32 to vector<128x128xf32>
      %26 = arith.mulf %25, %24 : vector<128x128xf32>
      %27 = arith.subf %23, %26 : vector<128x128xf32>
      %cst_27 = arith.constant 0.000000e+00 : f32
      %28 = vector.broadcast %cst_27 : f32 to vector<128x128xf32>
      %29 = arith.maximumf %27, %28 : vector<128x128xf32>
      %30 = vector.broadcast %17 : f32 to vector<128x128xf32>
      %31 = arith.mulf %30, %29 : vector<128x128xf32>
      %32 = math.sin %31 : vector<128x128xf32>
      %33 = arith.mulf %32, %32 : vector<128x128xf32>
      %34 = vector.broadcast %18 : f32 to vector<128x128xf32>
      %35 = arith.mulf %34, %33 : vector<128x128xf32>
      %36 = math.exp %35 : vector<128x128xf32>
      %c0_28 = arith.constant 0 : index
      %c0_29 = arith.constant 0 : index
      %37 = vector.load %arg11[%c0_28, %c0_29] : memref<128x128xf32, #tpu.memory_space<vmem>>, vector<128x128xf32>
      %38 = arith.mulf %36, %37 : vector<128x128xf32>
      %c0_30 = arith.constant 0 : index
      %c0_31 = arith.constant 0 : index
      %39 = vector.load %arg9[%c0_30, %c0_31] : memref<128x128xf32, #tpu.memory_space<vmem>>, vector<128x128xf32>
      tpu.vector_store %arg9[%c0_30, %c0_31], %38 {strides = array<i32>} : memref<128x128xf32, #tpu.memory_space<vmem>>, vector<128x128xf32>,
    } else {
    }
    return
  }
  func.func @transform_0(%arg0: i32, %arg1: i32, %arg2: i32) -> (i32, i32) {
    %c0_i32 = arith.constant 0 : i32
    %c0_i32_0 = arith.constant 0 : i32
    %c0_i32_1 = arith.constant 0 : i32
    return %c0_i32, %c0_i32_0 : i32, i32
  }
  func.func @transform_1(%arg0: i32, %arg1: i32, %arg2: i32) -> (i32, i32) {
    %c0_i32 = arith.constant 0 : i32
    %c0_i32_0 = arith.constant 0 : i32
    return %arg0, %c0_i32 : i32, i32
  }
  func.func @transform_2(%arg0: i32, %arg1: i32, %arg2: i32) -> (i32, i32) {
    %c0_i32 = arith.constant 0 : i32
    %c0_i32_0 = arith.constant 0 : i32
    return %c0_i32, %arg1 : i32, i32
  }
  func.func @transform_3(%arg0: i32, %arg1: i32, %arg2: i32) -> (i32, i32) {
    %c0_i32 = arith.constant 0 : i32
    return %arg0, %arg2 : i32, i32
  }
  func.func @transform_4(%arg0: i32, %arg1: i32, %arg2: i32) -> (i32, i32) {
    %c0_i32 = arith.constant 0 : i32
    return %arg2, %arg1 : i32, i32
  }
  func.func @transform_5(%arg0: i32, %arg1: i32, %arg2: i32) -> (i32, i32) {
    %c0_i32 = arith.constant 0 : i32
    return %arg2, %arg1 : i32, i32
  }
  func.func @transform_6(%arg0: i32, %arg1: i32, %arg2: i32) -> (i32, i32) {
    %c0_i32 = arith.constant 0 : i32
    return %arg0, %arg1 : i32, i32
  }
}

</mosaic_0001>

<bundles_post_ra>
// kernel: tpu_custom_call.1
= control target key start
LH: loop header
LB: loop body
LE: loop exit
PB: predicated region body
PF: predicated region fallthrough
CT: control target
= control target key end

     0   :  { %11 = vsyncpa [#allocation7], 0  ;;  %s6040_s0 = inlined_call_operand.vmem [shape: f32[1,2], index: 0, kind: input, shape index: {}]   ;;  %s6041_s1 = inlined_call_operand.vmem [shape: f32[128,1], index: 1, kind: input, shape index: {}]   ;;  %s6042_s2 = inlined_call_operand.vmem [shape: f32[1,128], index: 2, kind: input, shape index: {}]   ;;  %s6043_s3 = inlined_call_operand.vmem [shape: f32[128,128], index: 3, kind: input, shape index: {}]   ;;  %s6044_s4 = inlined_call_operand.hbm [shape: f32[128,128], index: 4, kind: input, shape index: {}]   ;;  %s6045_s5 = inlined_call_operand.hbm [shape: f32[128,128], index: 5, kind: input, shape index: {}]   ;;  %s6046_s6 = inlined_call_operand.hbm [shape: f32[128,128], index: 6, kind: output, shape index: {}]  }
   0x1   :  { %12 = vsyncpa [#allocation5], 0 }
   0x2   :  { %13 = vsyncpa [#allocation10], 0 }
   0x3   :  { %14 = vsyncpa [#allocation6], 0  ;;  %s20_s23 = sshll.u32 %s6040_s0, 4  ;;  %s34_s26 = sshll.u32 %s6044_s4, 4  ;;  %s21_s23 = int_to_ptr.vmem [resolvable:$true] %s20_s23  ;;  %s35_s26 = int_to_ptr.hbm [resolvable:$true] %s34_s26 }
   0x4   :  { %s3419_s27 = smov [#allocation4]   ;;  %s3420_s28 = smov [#allocation8]  }
   0x5   :  { %23 = dma.vmem_to_smem %s21_s23, 16, %s3419_s27, [#allocation7]  }
   0x6   :  { %s36_s29 = sshll.u32 %s3420_s28, 4  ;;  %s3421_s30 = smov 128   ;;  %s37_s29 = int_to_ptr.vmem [resolvable:$true] %s36_s29 }
   0x7   :  { %s3422_s7 = smov 8   ;;  %s47_s0 = sshll.u32 %s6045_s5, 4  ;;  %s48_s0 = int_to_ptr.hbm [resolvable:$true] %s47_s0 }
   0x8   :  { %42 = dma.hbm_to_vmem [thread:$0]  %s35_s26, 2048, %s37_s29, [#allocation5], %s3421_s30, %s3421_s30, %s3422_s7  }
   0x9   :  { %s3423_s10 = smov [#allocation9]  }
   0xa   :  { %s49_s11 = sshll.u32 %s3423_s10, 4  ;;  %s50_s11 = int_to_ptr.vmem [resolvable:$true] %s49_s11 }
   0xb   :  { %55 = dma.hbm_to_vmem [thread:$0]  %s48_s0, 2048, %s50_s11, [#allocation10], %s3421_s30, %s3421_s30, %s3422_s7  }
   0xc   :  { %3411 = dma.done.wait [#allocation7], 16  }
   0xd   :  { %3412 = vsyncadd [#allocation7], 4294967280 }
   0xe   :  { %3413 = dma.done.wait [#allocation5], 2048  }
   0xf   :  { %3414 = vsyncadd [#allocation5], 4294965248 }
  0x10   :  { %3415 = dma.done.wait [#allocation10], 2048  }
  0x11   :  { %3416 = vsyncadd [#allocation10], 4294965248 }
  0x12   :  { %68 = sfence }
  0x13   :  { %v152_v0 = vld [vmem:[#allocation8 + $0x78] sm:$0xff]  ;;  %v151_v1 = vld [vmem:[#allocation8 + $0x70] sm:$0xff]  ;;  %v150_v2 = vld [vmem:[#allocation8 + $0x68] sm:$0xff]  ;;  %v6065_v3 = vmov 0   ;;  %s382_s24 = sld [smem:[#allocation4]]  ;;  %s3431_s29 = smov [#allocation11]  }
  0x14   :  { %153 = vmatpush.msra.mxu0 %v152_v0  ;;  %3244 = vmatpush.msra.mxu2 %v152_v0  ;;  %v149_v4 = vld [vmem:[#allocation8 + $0x60] sm:$0xff]  ;;  %v148_v6 = vld [vmem:[#allocation8 + $0x58] sm:$0xff]  ;;  %v147_v7 = vld [vmem:[#allocation8 + $0x50] sm:$0xff]  ;;  %s3178_s8 = sshll.u32 %s3431_s29, 4  ;;  %s3180_s10 = sshll.u32 %s6046_s6, 4  ;;  %s3179_s8 = int_to_ptr.vmem [resolvable:$true] %s3178_s8  ;;  %s3181_s10 = int_to_ptr.hbm [resolvable:$true] %s3180_s10 }
  0x15   :  { %3289 = vset.pattern.permute.xlu0 %v6065_v3  ;;  %3290 = vset.pattern.permute.xlu1 %v6065_v3  ;;  %v384_v5 = vld [vmem:[%s6041_s1] sm:$0xff]  ;;  %v386_v8 = vld [vmem:[%s6041_s1 + $0x10] sm:$0xff]  ;;  %v146_v9 = vld [vmem:[#allocation8 + $0x48] sm:$0xff] }
  0x16   :  { %154 = vmatpush.msra.mxu0 %v151_v1  ;;  %3245 = vmatpush.msra.mxu2 %v151_v1  ;;  %v385_v10 = vld [vmem:[%s6041_s1 + $0x8] sm:$0xff]  ;;  %v145_v11 = vld [vmem:[#allocation8 + $0x40] sm:$0xff]  ;;  %v144_v12 = vld [vmem:[#allocation8 + $0x38] sm:$0xff] }
  0x17   :  { %3291 = vset.pattern.permute.xlu2 %v6065_v3  ;;  %403 = vperm.xlu0 %3289, %v384_v5   ;;  %v143_v13 = vld [vmem:[#allocation8 + $0x30] sm:$0xff]  ;;  %v387_v14 = vld [vmem:[%s6041_s1 + $0x18] sm:$0xff]  ;;  %v142_v15 = vld [vmem:[#allocation8 + $0x28] sm:$0xff] }
  0x18   :  { %155 = vmatpush.msra.mxu0 %v150_v2  ;;  %3246 = vmatpush.msra.mxu2 %v150_v2  ;;  %v390_v16 = vld [vmem:[%s6041_s1 + $0x30] sm:$0xff]  ;;  %v141_v17 = vld [vmem:[#allocation8 + $0x20] sm:$0xff]  ;;  %v140_v18 = vld [vmem:[#allocation8 + $0x18] sm:$0xff] }
  0x19   :  { %413 = vperm.xlu1 %3290, %v386_v8   ;;  %v139_v19 = vld [vmem:[#allocation8 + $0x10] sm:$0xff]  ;;  %v388_v20 = vld [vmem:[%s6041_s1 + $0x20] sm:$0xff]  ;;  %v391_v21 = vld [vmem:[%s6041_s1 + $0x38] sm:$0xff] }
  0x1a   :  { %156 = vmatpush.msra.mxu0 %v149_v4  ;;  %3247 = vmatpush.msra.mxu2 %v149_v4  ;;  %v138_v22 = vld [vmem:[#allocation8 + $0x8] sm:$0xff]  ;;  %v137_v24 = vld [vmem:[#allocation8] sm:$0xff]  ;;  %v394_v28 = vld [vmem:[%s6041_s1 + $0x50] sm:$0xff] }
  0x1b   :  { %423 = vperm.xlu2 %3291, %v388_v20   ;;  %v393_v23 = vld [vmem:[%s6041_s1 + $0x48] sm:$0xff]  ;;  %v3512_v25 = vld [vmem:[%s6043_s3] sm:$0xff]  ;;  %v399_v34 = vld [vmem:[%s6041_s1 + $0x78] sm:$0xff] }
  0x1c   :  { %157 = vmatpush.msra.mxu0 %v148_v6  ;;  %3248 = vmatpush.msra.mxu2 %v148_v6  ;;  %v3517_v26 = vld [vmem:[%s6043_s3 + $0x40] sm:$0xff]  ;;  %v389_v27 = vld [vmem:[%s6041_s1 + $0x28] sm:$0xff]  ;;  %v3554_v35 = vld [vmem:[%s6043_s3 + $0x10] sm:$0xff] }
  0x1d   :  { %v396_v29 = vld [vmem:[%s6041_s1 + $0x60] sm:$0xff]  ;;  %v3533_v30 = vld [vmem:[%s6043_s3 + $0x8] sm:$0xff]  ;;  %v3559_v36 = vld [vmem:[%s6043_s3 + $0x50] sm:$0xff] }
  0x1e   :  { %158 = vmatpush.msra.mxu0 %v147_v7  ;;  %3249 = vmatpush.msra.mxu2 %v147_v7  ;;  %v3538_v31 = vld [vmem:[%s6043_s3 + $0x48] sm:$0xff]  ;;  %v392_v32 = vld [vmem:[%s6041_s1 + $0x40] sm:$0xff]  ;;  %v3566_v37 = vld [vmem:[%s6043_s3 + $0x18] sm:$0xff] }
  0x1f   :  { %408 = vperm.xlu0 %3289, %v385_v10   ;;  %v397_v33 = vld [vmem:[%s6041_s1 + $0x68] sm:$0xff]  ;;  %v3571_v38 = vld [vmem:[%s6043_s3 + $0x58] sm:$0xff]  ;;  %v280_v41 = vld [vmem:[#allocation9 + $0x70] sm:$0xff] }
  0x20   :  { %159 = vmatpush.msra.mxu0 %v146_v9  ;;  %3250 = vmatpush.msra.mxu2 %v146_v9  ;;  %v395_v39 = vld [vmem:[%s6041_s1 + $0x58] sm:$0xff]  ;;  %v279_v42 = vld [vmem:[#allocation9 + $0x68] sm:$0xff]  ;;  %v278_v43 = vld [vmem:[#allocation9 + $0x60] sm:$0xff] }
  0x21   :  { %418 = vperm.xlu1 %3290, %v387_v14   ;;  %v281_v40 = vld [vmem:[#allocation9 + $0x78] sm:$0xff]  ;;  %v3581_v44 = vld [vmem:[%s6043_s3 + $0x20] sm:$0xff]  ;;  %v398_v46 = vld [vmem:[%s6041_s1 + $0x70] sm:$0xff] }
  0x22   :  { %160 = vmatpush.msra.mxu0 %v145_v11  ;;  %3251 = vmatpush.msra.mxu2 %v145_v11  ;;  %v3586_v45 = vld [vmem:[%s6043_s3 + $0x60] sm:$0xff]  ;;  %v277_v47 = vld [vmem:[#allocation9 + $0x58] sm:$0xff]  ;;  %v276_v48 = vld [vmem:[#allocation9 + $0x50] sm:$0xff]  ;;  %v3631_v11 = vstv %s382_s24 }
  0x23   :  { %428 = vperm.xlu2 %3291, %v389_v27   ;;  %282 = vmatpush.msra.mxu1 %v281_v40  ;;  %v275_v49 = vld [vmem:[#allocation9 + $0x48] sm:$0xff]  ;;  %v274_v52 = vld [vmem:[#allocation9 + $0x40] sm:$0xff]  ;;  %v273_v53 = vld [vmem:[#allocation9 + $0x38] sm:$0xff] }
  0x24   :  { %161 = vmatpush.msra.mxu0 %v144_v12  ;;  %3252 = vmatpush.msra.mxu2 %v144_v12  ;;  %v110_v50 = vld [vmem:[%s6043_s3 + $0x28] sm:$0xff]  ;;  %v272_v54 = vld [vmem:[#allocation9 + $0x30] sm:$0xff]  ;;  %v112_v58 = vld [vmem:[%s6043_s3 + $0x38] sm:$0xff] }
  0x25   :  { %3260 = vmatpush.msra.mxu3 %v281_v40  ;;  %283 = vmatpush.msra.mxu1 %v280_v41  ;;  %v118_v51 = vld [vmem:[%s6043_s3 + $0x68] sm:$0xff]  ;;  %v111_v56 = vld [vmem:[%s6043_s3 + $0x30] sm:$0xff]  ;;  %v120_v59 = vld [vmem:[%s6043_s3 + $0x78] sm:$0xff]  ;;  %v6061_v40 = vmov 2475754826  }
  0x26   :  { %162 = vmatpush.msra.mxu0 %v143_v13  ;;  %3253 = vmatpush.msra.mxu2 %v143_v13  ;;  %v271_v55 = vld [vmem:[#allocation9 + $0x28] sm:$0xff]  ;;  %v119_v57 = vld [vmem:[%s6043_s3 + $0x70] sm:$0xff]  ;;  %v270_v60 = vld [vmem:[#allocation9 + $0x20] sm:$0xff] }
  0x27   :  { %433 = vperm.xlu0 %3289, %v390_v16   ;;  %3261 = vmatpush.msra.mxu3 %v280_v41  ;;  %v269_v61 = vld [vmem:[#allocation9 + $0x18] sm:$0xff]  ;;  %v268_v62 = vld [vmem:[#allocation9 + $0x10] sm:$0xff]  ;;  %v267_v63 = vld [vmem:[#allocation9 + $0x8] sm:$0xff] }
  0x28   :  { %163 = vmatpush.msra.mxu0 %v142_v15  ;;  %3254 = vmatpush.msra.mxu2 %v142_v15  ;;  %v266_v0 = vld [vmem:[#allocation9] sm:$0xff] }
  0x29   :  { %438 = vperm.xlu1 %3290, %v391_v21   ;;  %284 = vmatpush.msra.mxu1 %v279_v42  ;;  %v3628_v4 = vld [vmem:[%s6042_s2] ss:$0 sm:$0xff] }
  0x2a   :  { %164 = vmatpush.msra.mxu0 %v141_v17  ;;  %3255 = vmatpush.msra.mxu2 %v141_v17 }
  0x2b   :  { %443 = vperm.xlu2 %3291, %v392_v32   ;;  %3262 = vmatpush.msra.mxu3 %v279_v42  ;;  %v6058_v42 = vmov 2131351028  }
  0x2c   :  { %165 = vmatpush.msra.mxu0 %v140_v18  ;;  %3256 = vmatpush.msra.mxu2 %v140_v18 }
  0x2d   :  { %285 = vmatpush.msra.mxu1 %v278_v43  ;;  %3263 = vmatpush.msra.mxu3 %v278_v43 }
  0x2e   :  { %166 = vmatpush.msra.mxu0 %v139_v19  ;;  %3257 = vmatpush.msra.mxu2 %v139_v19 }
  0x2f   :  { %448 = vperm.xlu0 %3289, %v393_v23   ;;  %286 = vmatpush.msra.mxu1 %v277_v47 }
  0x30   :  { %167 = vmatpush.msra.mxu0 %v138_v22  ;;  %3258 = vmatpush.msra.mxu2 %v138_v22 }
  0x31   :  { %453 = vperm.xlu1 %3290, %v394_v28   ;;  %3264 = vmatpush.msra.mxu3 %v277_v47 }
  0x32   :  { %168 = vmatpush.msra.mxu0 %v137_v24  ;;  %3259 = vmatpush.msra.mxu2 %v137_v24 }
  0x33   :  { %169 = vmatmul.f32.vlgmr.msra.gmra.mxu0 %v3512_v25  ;;  %193 = vmatmul.f32.vlgmr.msra.gmra.mxu2 %v3517_v26 }
  0x34   :  { %458 = vperm.xlu2 %3291, %v395_v39   ;;  %287 = vmatpush.msra.mxu1 %v276_v48 }
  0x35   :  { %3265 = vmatpush.msra.mxu3 %v276_v48 }
  0x36   :  { %288 = vmatpush.msra.mxu1 %v275_v49 }
  0x37   :  { %463 = vperm.xlu0 %3289, %v396_v29   ;;  %3266 = vmatpush.msra.mxu3 %v275_v49 }
  0x38   :  { %289 = vmatpush.msra.mxu1 %v274_v52 }
  0x39   :  { %468 = vperm.xlu1 %3290, %v397_v33   ;;  %3267 = vmatpush.msra.mxu3 %v274_v52 }
  0x3a   :  { %290 = vmatpush.msra.mxu1 %v273_v53 }
  0x3b   :  { %172 = vmatmul.f32.gmra.mxu0 %v3533_v30  ;;  %196 = vmatmul.f32.gmra.mxu2 %v3538_v31 }
  0x3c   :  { %473 = vperm.xlu2 %3291, %v398_v46   ;;  %3268 = vmatpush.msra.mxu3 %v273_v53  ;;  %v6053_v46 = vmov 920167782  }
  0x3d   :  { %291 = vmatpush.msra.mxu1 %v272_v54 }
  0x3e   :  { %3269 = vmatpush.msra.mxu3 %v272_v54  ;;  %v6051_v54 = vmov 1326507024  }
  0x3f   :  { %478 = vperm.xlu0 %3289, %v399_v34   ;;  %292 = vmatpush.msra.mxu1 %v271_v55 }
  0x40   :  { %3270 = vmatpush.msra.mxu3 %v271_v55 }
  0x41   :  { %293 = vmatpush.msra.mxu1 %v270_v60 }
  0x42   :  { %3271 = vmatpush.msra.mxu3 %v270_v60 }
  0x43   :  { %175 = vmatmul.f32.gmra.mxu0 %v3554_v35  ;;  %199 = vmatmul.f32.gmra.mxu2 %v3559_v36 }
  0x44   :  { %294 = vmatpush.msra.mxu1 %v269_v61  ;;  %3272 = vmatpush.msra.mxu3 %v269_v61 }
  0x46   :  { %295 = vmatpush.msra.mxu1 %v268_v62  ;;  %3273 = vmatpush.msra.mxu3 %v268_v62 }
  0x48   :  { %296 = vmatpush.msra.mxu1 %v267_v63  ;;  %3274 = vmatpush.msra.mxu3 %v267_v63 }
  0x4a   :  { %297 = vmatpush.msra.mxu1 %v266_v0  ;;  %3275 = vmatpush.msra.mxu3 %v266_v0 }
  0x4b   :  { %178 = vmatmul.f32.gmra.mxu0 %v3566_v37  ;;  %202 = vmatmul.f32.gmra.mxu2 %v3571_v38 }
  0x4c   :  { %298 = vmatmul.f32.vlgmr.msra.gmra.mxu1 %v3512_v25  ;;  %322 = vmatmul.f32.vlgmr.msra.gmra.mxu3 %v3517_v26 }
  0x53   :  { %181 = vmatmul.f32.gmra.mxu0 %v3581_v44  ;;  %205 = vmatmul.f32.gmra.mxu2 %v3586_v45 }
  0x54   :  { %301 = vmatmul.f32.gmra.mxu1 %v3533_v30  ;;  %325 = vmatmul.f32.gmra.mxu3 %v3538_v31 }
  0x5b   :  { %184 = vmatmul.f32.gmra.mxu0 %v110_v50  ;;  %208 = vmatmul.f32.gmra.mxu2 %v118_v51 }
  0x5c   :  { %304 = vmatmul.f32.gmra.mxu1 %v3554_v35  ;;  %328 = vmatmul.f32.gmra.mxu3 %v3559_v36 }
  0x63   :  { %187 = vmatmul.f32.gmra.mxu0 %v111_v56  ;;  %211 = vmatmul.f32.gmra.mxu2 %v119_v57 }
  0x64   :  { %307 = vmatmul.f32.gmra.mxu1 %v3566_v37  ;;  %331 = vmatmul.f32.gmra.mxu3 %v3571_v38  ;;  %v6063_v38 = vmov 683565275  }
  0x6b   :  { %190 = vmatmul.f32.gmra.mxu0 %v112_v58  ;;  %214 = vmatmul.f32.gmra.mxu2 %v120_v59 }
  0x6c   :  { %310 = vmatmul.f32.gmra.mxu1 %v3581_v44  ;;  %334 = vmatmul.f32.gmra.mxu3 %v3586_v45  ;;  %v6056_v44 = vmov 2102212464  }
  0x74   :  { %313 = vmatmul.f32.gmra.mxu1 %v110_v50  ;;  %337 = vmatmul.f32.gmra.mxu3 %v118_v51 }
  0x75   :  { %v3621_v1 = vpop.permute.xlu2 %423 }
  0x7c   :  { %316 = vmatmul.f32.gmra.mxu1 %v111_v56  ;;  %340 = vmatmul.f32.gmra.mxu3 %v119_v57 }
  0x7d   :  { %v3623_v2 = vpop.permute.xlu2 %428 }
  0x84   :  { %319 = vmatmul.f32.gmra.mxu1 %v112_v58  ;;  %343 = vmatmul.f32.gmra.mxu3 %v120_v59 }
  0x85   :  { %v444_v9 = vpop.permute.xlu2 %443 }
  0x86   :  { %v492_v13 = vadd.f32 %v3628_v4, %v444_v9 }
  0x89   :  { %v404_v5 = vpop.permute.xlu0 %403 }
  0x8a   :  { %v484_v6 = vadd.f32 %v3628_v4, %v404_v5 }
  0x91   :  { %v409_v27 = vpop.permute.xlu0 %408 }
  0x92   :  { %v485_v29 = vadd.f32 %v3628_v4, %v409_v27 }
  0xb0   :  { %v170_v7 = vpop.f32.mrf.mxu0 }
  0xb1   :  { %v516_v8 = vmul.f32 2.0, %v170_v7 }
  0xb3   :  { %v532_v10 = vsub.f32 %v484_v6, %v516_v8 }
  0xb5   :  { %v548_v12 = vmax.f32 %v532_v10, 0.0 }
  0xb6   :  { %v194_v14 = vpop.f32.mrf.mxu2 }
  0xb7   :  { %v3635_v15 = vmul.f32 %v3631_v11, %v548_v12  ;;  %v524_v16 = vmul.f32 2.0, %v194_v14 }
  0xb8   :  { %v173_v26 = vpop.f32.mrf.mxu0 }
  0xb9   :  { %6134 = vst [vmem:[#allocation16_spill] sm:$0xff] %v3635_v15  ;;  %v584_v17 = vand.u32 2139095040, %v3635_v15  ;;  %v540_v18 = vsub.f32 %v492_v13, %v524_v16  ;;  %v6050_v19 = vand.u32 2147483647, %v3635_v15  ;;  %v517_v32 = vmul.f32 2.0, %v173_v26 }
  0xbb   :  { %v585_v20 = vshrl.u32 %v584_v17, 23  ;;  %v556_v21 = vmax.f32 %v540_v18, 0.0  ;;  %v588_v24 = vand.u32 8388607, %v6050_v19  ;;  %v533_v48 = vsub.f32 %v485_v29, %v517_v32 }
  0xbd   :  { %v3196_v22 = vadd.s32 4294967169, %v585_v20  ;;  %v3640_v23 = vmul.f32 %v3631_v11, %v556_v21  ;;  %v589_v33 = vor.u32 8388608, %v588_v24  ;;  %v549_v5 = vmax.f32 %v533_v48, 0.0 }
  0xbf   :  { %6135 = vst [vmem:[#allocation17_spill] sm:$0xff] %v3640_v23  ;;  %v591_v25 = vadd.s32 1, %v3196_v22  ;;  %v1824_v28 = vand.u32 2139095040, %v3640_v23  ;;  %v3661_v52 = vshll.u32 %v589_v33, 8  ;;  %v6049_v62 = vand.u32 2147483647, %v3640_v23 }
  0xc0   :  { %v3708_v32 = vmul.f32 %v3631_v11, %v549_v5 }
  0xc1   :  { %vm592_vm0 = vcmp.gt.s32.totalorder %v591_v25, 0  ;;  %v1825_v31 = vshrl.u32 %v1824_v28, 23  ;;  %v630_v8 = vand.u32 65535, %v3661_v52  ;;  %v631_v12 = vshrl.u32 %v3661_v52, 16 }
  0xc2   :  { %v593_v30 = vsel %vm592_vm0, %v591_v25, 0  ;;  %v1828_v16 = vand.u32 8388607, %v6049_v62  ;;  %6136 = vst [vmem:[#allocation18_spill] sm:$0xff] %v3708_v32 }
  0xc3   :  { %v595_v34 = vand.u32 31, %v593_v30  ;;  %v3646_v35 = vshrl.u32 %v593_v30, 5  ;;  %v3220_v36 = vadd.s32 4294967169, %v1825_v31 }
  0xc4   :  { %v1829_v31 = vor.u32 8388608, %v1828_v16 }
  0xc5   :  { %v3648_v37 = vsub.s32 32, %v595_v34  ;;  %v598_v39 = vshll.u32 %v6063_v38, %v595_v34  ;;  %v601_v41 = vshll.u32 %v6061_v40, %v595_v34  ;;  %v604_v43 = vshll.u32 %v6058_v42, %v595_v34 }
  0xc6   :  { %v607_v45 = vshll.u32 %v6056_v44, %v595_v34  ;;  %v610_v47 = vshll.u32 %v6053_v46, %v595_v34  ;;  %vm613_vm1 = vcmp.lt.s32.totalorder %v3646_v35, 1  ;;  %vm616_vm2 = vcmp.lt.s32.totalorder %v3646_v35, 4 }
  0xc7   :  { %v599_v49 = vshrl.u32 %v6061_v40, %v3648_v37  ;;  %v602_v50 = vshrl.u32 %v6058_v42, %v3648_v37  ;;  %v605_v51 = vshrl.u32 %v6056_v44, %v3648_v37  ;;  %v608_v53 = vshrl.u32 %v6053_v46, %v3648_v37 }
  0xc8   :  { %v611_v55 = vshrl.u32 %v6051_v54, %v3648_v37  ;;  %v1831_v59 = vadd.s32 1, %v3220_v36  ;;  %vm615_vm3 = vcmp.lt.s32.totalorder %v3646_v35, 3  ;;  %vm614_vm5 = vcmp.lt.s32.totalorder %v3646_v35, 2 }
  0xc9   :  { %v3669_v56 = vor.u32 %v599_v49, %v598_v39  ;;  %v3671_v57 = vor.u32 %v602_v50, %v601_v41  ;;  %v3673_v58 = vor.u32 %v605_v51, %v604_v43  ;;  %v609_v60 = vor.u32 %v608_v53, %v607_v45 }
  0xca   :  { %v612_v61 = vor.u32 %v611_v55, %v610_v47  ;;  %vm1832_vm4 = vcmp.gt.s32.totalorder %v1831_v59, 0 }
  0xcb   :  { %v621_v63 = vsel %vm613_vm1, %v3669_v56, %v3671_v57  ;;  %v625_v0 = vsel %vm613_vm1, %v3671_v57, %v3673_v58  ;;  %v622_v6 = vsel %vm616_vm2, %v609_v60, 920167782  ;;  %v1833_v17 = vsel %vm1832_vm4, %v1831_v59, 0 }
  0xcc   :  { %v626_v7 = vsel %vm616_vm2, %v612_v61, 1326507024  ;;  %v623_v9 = vsel %vm615_vm3, %v3673_v58, %v622_v6  ;;  %v1835_v26 = vand.u32 31, %v1833_v17  ;;  %v3716_v53 = vshrl.u32 %v1833_v17, 5 }
  0xcd   :  { %v627_v10 = vsel %vm615_vm3, %v609_v60, %v626_v7  ;;  %v624_v13 = vsel %vm614_vm5, %v621_v63, %v623_v9  ;;  %v739_v9 = vand.u32 2139095040, %v3708_v32 }
  0xce   :  { %v628_v14 = vsel %vm614_vm5, %v625_v0, %v627_v10  ;;  %v654_v21 = vand.u32 65535, %v624_v13  ;;  %v655_v22 = vshrl.u32 %v624_v13, 16  ;;  %v3711_v45 = vsub.s32 32, %v1835_v26 }
  0xcf   :  { %v632_v18 = vand.u32 65535, %v628_v14  ;;  %v633_v20 = vshrl.u32 %v628_v14, 16  ;;  %v1838_v60 = vshll.u32 %v6063_v38, %v1835_v26  ;;  %v1841_v0 = vshll.u32 %v6061_v40, %v1835_v26 }
  0xd0   :  { %v657_v27 = vmul.u32 %v655_v22, %v630_v8  ;;  %v3705_v28 = vmul.u32 %v654_v21, %v631_v12  ;;  %v656_v34 = vmul.u32 %v654_v21, %v630_v8  ;;  %v659_v36 = vmul.u32 %v655_v22, %v631_v12 }
  0xd1   :  { %v635_v24 = vmul.u32 %v633_v20, %v630_v8  ;;  %v3703_v25 = vmul.u32 %v632_v18, %v631_v12  ;;  %v634_v29 = vmul.u32 %v632_v18, %v630_v8  ;;  %v637_v33 = vmul.u32 %v633_v20, %v631_v12 }
  0xd2   :  { %v660_v39 = vshll.u32 %v657_v27, 16  ;;  %v662_v48 = vshll.u32 %v3705_v28, 16  ;;  %v1839_v63 = vshrl.u32 %v6061_v40, %v3711_v45  ;;  %v1842_v5 = vshrl.u32 %v6058_v42, %v3711_v45 }
  0xd3   :  { %v638_v30 = vshll.u32 %v635_v24, 16  ;;  %v640_v41 = vshll.u32 %v3703_v25, 16  ;;  %v1844_v7 = vshll.u32 %v6058_v42, %v1835_v26  ;;  %v1845_v8 = vshrl.u32 %v6056_v44, %v3711_v45 }
  0xd4   :  { %vm664_vm7 = vc.u32 %v656_v34, %v660_v39  ;;  %v666_v49 = vadd.s32 %v660_v39, %v656_v34  ;;  %v3730_v10 = vor.u32 %v1839_v63, %v1838_v60  ;;  %v3732_v12 = vor.u32 %v1842_v5, %v1841_v0 }
  0xd5   :  { %vm642_vm6 = vc.u32 %v634_v29, %v638_v30  ;;  %v644_v43 = vadd.s32 %v638_v30, %v634_v29  ;;  %v665_v51 = vsel %vm664_vm7, 1, %v6065_v3  ;;  %v1847_v13 = vshll.u32 %v6056_v44, %v1835_v26 }
  0xd6   :  { %v643_v47 = vsel %vm642_vm6, 1, %v6065_v3  ;;  %v667_v59 = vadd.s32 %v665_v51, %v659_v36  ;;  %vm668_vm9 = vc.u32 %v666_v49, %v662_v48  ;;  %v1848_v14 = vshrl.u32 %v6053_v46, %v3711_v45 }
  0xd7   :  { %v645_v50 = vadd.s32 %v643_v47, %v637_v33  ;;  %vm646_vm8 = vc.u32 %v644_v43, %v640_v41  ;;  %v669_v61 = vsel %vm668_vm9, 1, %v6065_v3  ;;  %v3737_v17 = vor.u32 %v1845_v8, %v1844_v7 }
  0xd8   :  { %v647_v55 = vsel %vm646_vm8, 1, %v6065_v3  ;;  %v671_v16 = vadd.s32 %v669_v61, %v667_v59  ;;  %v1850_v18 = vshll.u32 %v6053_v46, %v1835_v26  ;;  %v1851_v20 = vshrl.u32 %v6051_v54, %v3711_v45 }
  0xd9   :  { %v649_v6 = vadd.s32 %v647_v55, %v645_v50  ;;  %v639_v21 = vshrl.u32 %v635_v24, 16  ;;  %v1849_v22 = vor.u32 %v1848_v14, %v1847_v13  ;;  %vm1853_vm10 = vcmp.lt.s32.totalorder %v3716_v53, 1 }
  0xda   :  { %v3743_v29 = vshll.u32 %v1829_v31, 8  ;;  %v661_v30 = vshrl.u32 %v657_v27, 16  ;;  %v1852_v33 = vor.u32 %v1851_v20, %v1850_v18  ;;  %vm1856_vm11 = vcmp.lt.s32.totalorder %v3716_v53, 4 }
  0xdb   :  { %v1861_v34 = vsel %vm1853_vm10, %v3730_v10, %v3732_v12  ;;  %v597_v26 = vshrl.u32 %v6063_v38, %v3648_v37  ;;  %v650_v36 = vadd.s32 %v649_v6, %v639_v21  ;;  %vm1855_vm12 = vcmp.lt.s32.totalorder %v3716_v53, 3 }
  0xdc   :  { %v1862_v24 = vsel %vm1856_vm11, %v1849_v22, 920167782  ;;  %v672_v31 = vadd.s32 %v671_v16, %v661_v30  ;;  %vm1854_vm13 = vcmp.lt.s32.totalorder %v3716_v53, 2  ;;  %v1865_v39 = vsel %vm1853_vm10, %v3732_v12, %v3737_v17 }
  0xdd   :  { %v1863_v27 = vsel %vm1855_vm12, %v3737_v17, %v1862_v24  ;;  %v641_v37 = vshrl.u32 %v3703_v25, 16  ;;  %v663_v41 = vshrl.u32 %v3705_v28, 16  ;;  %v1866_v47 = vsel %vm1856_vm11, %v1852_v33, 1326507024 }
  0xde   :  { %v1864_v43 = vsel %vm1854_vm13, %v1861_v34, %v1863_v27  ;;  %v1867_v50 = vsel %vm1855_vm12, %v1849_v22, %v1866_v47  ;;  %v1870_v51 = vand.u32 65535, %v3743_v29  ;;  %v618_v60 = vsel %vm616_vm2, %v3673_v58, 2102212464 }
  0xdf   :  { %v1894_v55 = vand.u32 65535, %v1864_v43  ;;  %v1895_v59 = vshrl.u32 %v1864_v43, 16  ;;  %v3775_v25 = vadd.s32 %v650_v36, %v641_v37  ;;  %v1868_v28 = vsel %vm1854_vm13, %v1865_v39, %v1867_v50 }
  0xe0   :  { %v1871_v61 = vshrl.u32 %v3743_v29, 16  ;;  %v673_v63 = vadd.s32 %v672_v31, %v663_v41  ;;  %v1872_v0 = vand.u32 65535, %v1868_v28  ;;  %v1873_v5 = vshrl.u32 %v1868_v28, 16 }
  0xe1   :  { %v1897_v6 = vmul.u32 %v1895_v59, %v1870_v51  ;;  %v740_v8 = vshrl.u32 %v739_v9, 23  ;;  %v3782_v13 = vadd.s32 %v666_v49, %v662_v48  ;;  %v617_v58 = vsel %vm613_vm1, %v597_v26, %v3669_v56 }
  0xe2   :  { %v3780_v7 = vmul.u32 %v1894_v55, %v1871_v61  ;;  %v1875_v14 = vmul.u32 %v1873_v5, %v1870_v51  ;;  %v1876_v16 = vmul.u32 %v1872_v0, %v1871_v61  ;;  %v619_v18 = vsel %vm615_vm3, %v3671_v57, %v618_v60 }
  0xe3   :  { %v1896_v20 = vmul.u32 %v1894_v55, %v1870_v51  ;;  %v1900_v21 = vshll.u32 %v1897_v6, 16  ;;  %vm676_vm14 = vc.u32 %v3775_v25, %v3782_v13  ;;  %v677_v22 = vadd.s32 1, %v673_v63 }
  0xe4   :  { %v1874_v30 = vmul.u32 %v1872_v0, %v1870_v51  ;;  %v1878_v9 = vshll.u32 %v1875_v14, 16  ;;  %v1880_v48 = vshll.u32 %v1876_v16, 16  ;;  %v1902_v49 = vshll.u32 %v3780_v7, 16 }
  0xe5   :  { %vm1904_vm15 = vc.u32 %v1896_v20, %v1900_v21  ;;  %v3199_v33 = vadd.s32 4294967169, %v740_v8  ;;  %v1906_v26 = vadd.s32 %v1900_v21, %v1896_v20  ;;  %v620_v57 = vsel %vm614_vm5, %v617_v58, %v619_v18 }
  0xe6   :  { %vm1882_vm0 = vc.u32 %v1874_v30, %v1878_v9  ;;  %v1884_v34 = vadd.s32 %v1878_v9, %v1874_v30  ;;  %v1905_v56 = vsel %vm1904_vm15, 1, %v6065_v3  ;;  %v1899_v24 = vmul.u32 %v1895_v59, %v1871_v61 }
  0xe7   :  { %v1883_v36 = vsel %vm1882_vm0, 1, %v6065_v3  ;;  %v1877_v31 = vmul.u32 %v1873_v5, %v1871_v61  ;;  %vm1908_vm2 = vc.u32 %v1906_v26, %v1902_v49  ;;  %v678_v27 = vsel %vm676_vm14, %v677_v22, %v673_v63  ;;  %v3804_v5 = vpop.permute.xlu0 %433 }
  0xe8   :  { %vm1886_vm1 = vc.u32 %v1884_v34, %v1880_v48  ;;  %v1907_v39 = vadd.s32 %v1905_v56, %v1899_v24  ;;  %v674_v37 = vmul.u32 %v3661_v52, %v620_v57  ;;  %v1909_v43 = vsel %vm1908_vm2, 1, %v6065_v3 }
  0xe9   :  { %v1885_v41 = vadd.s32 %v1883_v36, %v1877_v31  ;;  %v746_v47 = vadd.s32 1, %v3199_v33  ;;  %v1887_v35 = vsel %vm1886_vm1, 1, %v6065_v3  ;;  %v6048_v60 = vand.u32 2147483647, %v3708_v32 }
  0xea   :  { %v679_v50 = vadd.s32 %v678_v27, %v674_v37  ;;  %v1911_v51 = vadd.s32 %v1909_v43, %v1907_v39  ;;  %v1901_v28 = vshrl.u32 %v1897_v6, 16  ;;  %v1879_v63 = vshrl.u32 %v1875_v14, 16 }
  0xeb   :  { %vm747_vm3 = vcmp.gt.s32.totalorder %v746_v47, 0  ;;  %v1889_v59 = vadd.s32 %v1887_v35, %v1885_v41  ;;  %v1837_v52 = vshrl.u32 %v6063_v38, %v3711_v45  ;;  %v1858_v8 = vsel %vm1856_vm11, %v3737_v17, 2102212464 }
  0xec   :  { %v748_v55 = vsel %vm747_vm3, %v746_v47, 0  ;;  %v680_v0 = vadd.s32 536870912, %v679_v50  ;;  %v1912_v58 = vadd.s32 %v1911_v51, %v1901_v28  ;;  %v743_v21 = vand.u32 8388607, %v6048_v60 }
  0xed   :  { %v750_v61 = vand.u32 31, %v748_v55  ;;  %v1890_v20 = vadd.s32 %v1889_v59, %v1879_v63  ;;  %v1903_v22 = vshrl.u32 %v3780_v7, 16  ;;  %v3818_v30 = vshrl.u32 %v748_v55, 5  ;;  %v197_v59 = vpop.f32.mrf.mxu2 }
  0xee   :  { %v3824_v9 = vshrl.u32 %v680_v0, 30  ;;  %v1881_v48 = vshrl.u32 %v1876_v16, 16  ;;  %v1857_v7 = vsel %vm1853_vm10, %v1837_v52, %v3730_v10  ;;  %v1859_v56 = vsel %vm1855_vm12, %v3732_v12, %v1858_v8 }
  0xef   :  { %v3811_v18 = vsub.s32 32, %v750_v61  ;;  %v753_v6 = vshll.u32 %v6063_v38, %v750_v61  ;;  %v756_v14 = vshll.u32 %v6061_v40, %v750_v61  ;;  %v759_v33 = vshll.u32 %v6058_v42, %v750_v61 }
  0xf0   :  { %v1913_v57 = vadd.s32 %v1912_v58, %v1903_v22  ;;  %v762_v36 = vshll.u32 %v6056_v44, %v750_v61  ;;  %v3836_v24 = vadd.s32 %v1890_v20, %v1881_v48  ;;  %v744_v39 = vor.u32 8388608, %v743_v21 }
  0xf1   :  { %v754_v45 = vshrl.u32 %v6061_v40, %v3811_v18  ;;  %v757_v17 = vshrl.u32 %v6058_v42, %v3811_v18  ;;  %v760_v34 = vshrl.u32 %v6056_v44, %v3811_v18  ;;  %v763_v27 = vshrl.u32 %v6053_v46, %v3811_v18 }
  0xf2   :  { %v765_v37 = vshll.u32 %v6053_v46, %v750_v61  ;;  %v766_v10 = vshrl.u32 %v6051_v54, %v3811_v18  ;;  %vm768_vm4 = vcmp.lt.s32.totalorder %v3818_v30, 1  ;;  %v682_v12 = vshll.u32 %v3824_v9, 30 }
  0xf3   :  { %v3838_v31 = vor.u32 %v754_v45, %v753_v6  ;;  %v3840_v16 = vor.u32 %v757_v17, %v756_v14  ;;  %v3849_v41 = vadd.s32 %v1906_v26, %v1902_v49  ;;  %v3851_v43 = vor.u32 %v760_v34, %v759_v33  ;;  %v449_v49 = vpop.permute.xlu0 %448 }
  0xf4   :  { %v764_v47 = vor.u32 %v763_v27, %v762_v36  ;;  %v1917_v35 = vadd.s32 1, %v1913_v57  ;;  %vm770_vm5 = vcmp.lt.s32.totalorder %v3818_v30, 3  ;;  %v767_v51 = vor.u32 %v766_v10, %v765_v37 }
  0xf5   :  { %vm1916_vm6 = vc.u32 %v3836_v24, %v3849_v41  ;;  %vm771_vm7 = vcmp.lt.s32.totalorder %v3818_v30, 4  ;;  %v776_v55 = vsel %vm768_vm4, %v3838_v31, %v3840_v16  ;;  %v1860_v26 = vsel %vm1854_vm13, %v1857_v7, %v1859_v56  ;;  %v200_v19 = vpop.f32.mrf.mxu2 }
  0xf6   :  { %v777_v28 = vsel %vm771_vm7, %v764_v47, 920167782  ;;  %v3865_v61 = vshll.u32 %v744_v39, 8  ;;  %v3867_v0 = vsub.s32 %v679_v50, %v682_v12  ;;  %v493_v63 = vadd.f32 %v3628_v4, %v449_v49 }
  0xf7   :  { %vm769_vm8 = vcmp.lt.s32.totalorder %v3818_v30, 2  ;;  %v778_v52 = vsel %vm770_vm5, %v3851_v43, %v777_v28  ;;  %v1918_v8 = vsel %vm1916_vm6, %v1917_v35, %v1913_v57  ;;  %v780_v58 = vsel %vm768_vm4, %v3840_v16, %v3851_v43 }
  0xf8   :  { %v779_v53 = vsel %vm769_vm8, %v776_v55, %v778_v52  ;;  %v525_v20 = vmul.f32 2.0, %v197_v59  ;;  %v1914_v50 = vmul.u32 %v3743_v29, %v1860_v26  ;;  %v781_v21 = vsel %vm771_vm7, %v767_v51, 1326507024 }
  0xf9   :  { %v810_v6 = vshrl.u32 %v779_v53, 16  ;;  %v782_v14 = vsel %vm770_vm5, %v764_v47, %v781_v21  ;;  %v785_v22 = vand.u32 65535, %v3865_v61  ;;  %vm684_vm9 = vcmp.lt.s32.totalorder %v3867_v0, 0 }
  0xfa   :  { %v685_v45 = vsub.s32 0, %v3867_v0  ;;  %v1919_v17 = vadd.s32 %v1918_v8, %v1914_v50  ;;  %v783_v48 = vsel %vm769_vm8, %v780_v58, %v782_v14  ;;  %v541_v7 = vsub.f32 %v493_v63, %v525_v20  ;;  %v414_v50 = vpop.permute.xlu1 %413 }
  0xfb   :  { %v787_v33 = vand.u32 65535, %v783_v48  ;;  %v788_v34 = vshrl.u32 %v783_v48, 16  ;;  %v3890_v29 = vmul.u32 %v810_v6, %v785_v22  ;;  %v809_v56 = vand.u32 65535, %v779_v53 }
  0xfc   :  { %v786_v57 = vshrl.u32 %v3865_v61, 16  ;;  %v686_v27 = vsel %vm684_vm9, %v685_v45, %v3867_v0  ;;  %v1920_v39 = vadd.s32 536870912, %v1919_v17  ;;  %v557_v35 = vmax.f32 %v541_v7, 0.0 }
  0xfd   :  { %v790_v36 = vmul.u32 %v788_v34, %v785_v22  ;;  %v815_v37 = vshll.u32 %v3890_v29, 16  ;;  %v789_v10 = vmul.u32 %v787_v33, %v785_v22  ;;  %v811_v51 = vmul.u32 %v809_v56, %v785_v22 }
  0xfe   :  { %v3895_v12 = vmul.u32 %v787_v33, %v786_v57  ;;  %v3897_v55 = vmul.u32 %v809_v56, %v786_v57  ;;  %v687_v49 = vclz %v686_v27  ;;  %v3899_v26 = vshrl.u32 %v1920_v39, 30  ;;  %v176_v33 = vpop.f32.mrf.mxu0 }
  0xff   :  { %v793_v47 = vshll.u32 %v790_v36, 16  ;;  %vm819_vm11 = vc.u32 %v811_v51, %v815_v37  ;;  %v3902_v63 = vadd.s32 %v815_v37, %v811_v51  ;;  %v3905_v52 = vmul.f32 %v3631_v11, %v557_v35 }
 0x100   :  { %v795_v28 = vshll.u32 %v3895_v12, 16  ;;  %v817_v53 = vshll.u32 %v3897_v55, 16  ;;  %v792_v58 = vmul.u32 %v788_v34, %v786_v57  ;;  %v820_v20 = vsel %vm819_vm11, 1, %v6065_v3 }
 0x101   :  { %vm797_vm10 = vc.u32 %v789_v10, %v793_v47  ;;  %v799_v59 = vadd.s32 %v793_v47, %v789_v10  ;;  %6137 = vst [vmem:[#allocation19_spill] sm:$0xff] %v3905_v52  ;;  %v3197_v21 = vadd.s32 4294967294, %v687_v49  ;;  %v1922_v14 = vshll.u32 %v3899_v26, 30 }
 0x102   :  { %v798_v8 = vsel %vm797_vm10, 1, %v6065_v3  ;;  %v814_v22 = vmul.u32 %v810_v6, %v786_v57  ;;  %vm823_vm13 = vc.u32 %v3902_v63, %v817_v53  ;;  %v1979_v48 = vand.u32 2139095040, %v3905_v52 }
 0x103   :  { %vm801_vm12 = vc.u32 %v799_v59, %v795_v28  ;;  %v800_v45 = vadd.s32 %v798_v8, %v792_v58  ;;  %v752_v34 = vshrl.u32 %v6063_v38, %v3811_v18  ;;  %v824_v27 = vsel %vm823_vm13, 1, %v6065_v3 }
 0x104   :  { %v802_v7 = vsel %vm801_vm12, 1, %v6065_v3  ;;  %v822_v56 = vadd.s32 %v820_v20, %v814_v22  ;;  %v1980_v39 = vshrl.u32 %v1979_v48, 23  ;;  %v486_v37 = vadd.f32 %v3628_v4, %v414_v50 }
 0x105   :  { %vm3198_vm14 = vcmp.lt.s32.totalorder %v3197_v21, 0  ;;  %v3920_v6 = vsub.s32 %v1919_v17, %v1922_v14  ;;  %v518_v57 = vmul.f32 2.0, %v176_v33  ;;  %v773_v10 = vsel %vm771_vm7, %v3851_v43, 2102212464 }
 0x106   :  { %v804_v47 = vadd.s32 %v802_v7, %v800_v45  ;;  %v6047_v35 = vand.u32 2147483647, %v3905_v52  ;;  %v3223_v51 = vadd.s32 4294967169, %v1980_v39  ;;  %v826_v59 = vadd.s32 %v824_v27, %v822_v56 }
 0x107   :  { %v3926_v49 = vsel %vm3198_vm14, 0, %v3197_v21  ;;  %v772_v18 = vsel %vm768_vm4, %v752_v34, %v3838_v31  ;;  %v794_v28 = vshrl.u32 %v790_v36, 16  ;;  %vm1924_vm15 = vcmp.lt.s32.totalorder %v3920_v6, 0  ;;  %v3943_v36 = vpop.permute.xlu1 %418 }
 0x108   :  { %v1986_v8 = vadd.s32 1, %v3223_v51  ;;  %v1925_v17 = vsub.s32 0, %v3920_v6  ;;  %v774_v43 = vsel %vm770_vm5, %v3840_v16, %v773_v10  ;;  %v816_v58 = vshrl.u32 %v3890_v29, 16 }
 0x109   :  { %v805_v20 = vadd.s32 %v804_v47, %v794_v28  ;;  %v1983_v50 = vand.u32 8388607, %v6047_v35  ;;  %v534_v21 = vsub.f32 %v486_v37, %v518_v57  ;;  %v3941_v31 = vadd.f32 %v3628_v4, %v3621_v1 }
 0x10a   :  { %vm1987_vm0 = vcmp.gt.s32.totalorder %v1986_v8, 0  ;;  %v827_v14 = vadd.s32 %v826_v59, %v816_v58  ;;  %v3947_v45 = vadd.f32 %v3628_v4, %v3623_v2  ;;  %v3951_v16 = vadd.f32 %v3628_v4, %v3804_v5 }
 0x10b   :  { %v1988_v22 = vsel %vm1987_vm0, %v1986_v8, 0  ;;  %v796_v29 = vshrl.u32 %v3895_v12, 16  ;;  %v695_v33 = vsub.s32 4294967266, %v3926_v49  ;;  %v1926_v1 = vsel %vm1924_vm15, %v1925_v17, %v3920_v6 }
 0x10c   :  { %6138 = vst [vmem:[#allocation20_spill] sm:$0xff] %v3951_v16  ;;  %v1990_v48 = vand.u32 31, %v1988_v22  ;;  %v775_v7 = vsel %vm769_vm8, %v772_v18, %v774_v43  ;;  %v818_v56 = vshrl.u32 %v3897_v55, 16  ;;  %v1984_v34 = vor.u32 8388608, %v1983_v50 }
 0x10d   :  { %v3961_v2 = vadd.s32 %v805_v20, %v796_v29  ;;  %v550_v5 = vmax.f32 %v534_v21, 0.0  ;;  %v3965_v12 = vshrl.u32 %v1988_v22, 5  ;;  %v3985_v17 = vadd.s32 %v3902_v63, %v817_v53 }
 0x10e   :  { %v3963_v27 = vsub.s32 32, %v1990_v48  ;;  %v828_v39 = vadd.s32 %v827_v14, %v818_v56  ;;  %v1993_v37 = vshll.u32 %v6063_v38, %v1990_v48  ;;  %v1996_v57 = vshll.u32 %v6061_v40, %v1990_v48 }
 0x10f   :  { %v1999_v47 = vshll.u32 %v6058_v42, %v1990_v48  ;;  %v2002_v59 = vshll.u32 %v6056_v44, %v1990_v48  ;;  %v2005_v28 = vshll.u32 %v6053_v46, %v1990_v48  ;;  %vm2008_vm1 = vcmp.lt.s32.totalorder %v3965_v12, 1  ;;  %v4003_v22 = vpop.permute.xlu1 %438 }
 0x110   :  { %v1994_v10 = vshrl.u32 %v6061_v40, %v3963_v27  ;;  %v1997_v30 = vshrl.u32 %v6058_v42, %v3963_v27  ;;  %v2000_v51 = vshrl.u32 %v6056_v44, %v3963_v27  ;;  %v2003_v18 = vshrl.u32 %v6053_v46, %v3963_v27 }
 0x111   :  { %v2006_v8 = vshrl.u32 %v6051_v54, %v3963_v27  ;;  %v832_v50 = vadd.s32 1, %v828_v39  ;;  %vm831_vm2 = vc.u32 %v3961_v2, %v3985_v17  ;;  %vm2011_vm3 = vcmp.lt.s32.totalorder %v3965_v12, 4 }
 0x112   :  { %v3987_v43 = vor.u32 %v1994_v10, %v1993_v37  ;;  %v3989_v58 = vor.u32 %v1997_v30, %v1996_v57  ;;  %v3991_v20 = vor.u32 %v2000_v51, %v1999_v47  ;;  %v2004_v21 = vor.u32 %v2003_v18, %v2002_v59 }
 0x113   :  { %v2007_v14 = vor.u32 %v2006_v8, %v2005_v28  ;;  %v4001_v63 = vshll.u32 %v1984_v34, 8  ;;  %v1927_v53 = vclz %v1926_v1  ;;  %vm2010_vm4 = vcmp.lt.s32.totalorder %v3965_v12, 3 }
 0x114   :  { %v2016_v55 = vsel %vm2008_vm1, %v3987_v43, %v3989_v58  ;;  %v2017_v29 = vsel %vm2011_vm3, %v2004_v21, 920167782  ;;  %v4009_v48 = vmul.f32 %v3631_v11, %v550_v5  ;;  %vm2009_vm5 = vcmp.lt.s32.totalorder %v3965_v12, 2 }
 0x115   :  { %v2018_v56 = vsel %vm2010_vm4, %v3991_v20, %v2017_v29  ;;  %v2020_v1 = vsel %vm2008_vm1, %v3989_v58, %v3991_v20  ;;  %v2021_v34 = vsel %vm2011_vm3, %v2007_v14, 1326507024  ;;  %v829_v37 = vmul.u32 %v3865_v61, %v775_v7 }
 0x116   :  { %6139 = vst [vmem:[#allocation21_spill] sm:$0xff] %v4009_v48  ;;  %v833_v57 = vsel %vm831_vm2, %v832_v50, %v828_v39  ;;  %v2019_v5 = vsel %vm2009_vm5, %v2016_v55, %v2018_v56  ;;  %v2022_v10 = vsel %vm2010_vm4, %v2004_v21, %v2021_v34  ;;  %v2025_v47 = vand.u32 65535, %v4001_v63 }
 0x117   :  { %v2023_v30 = vsel %vm2009_vm5, %v2020_v1, %v2022_v10  ;;  %v2049_v51 = vand.u32 65535, %v2019_v5  ;;  %v2050_v59 = vshrl.u32 %v2019_v5, 16  ;;  %v696_v18 = vadd.s32 127, %v695_v33  ;;  %v454_v62 = vpop.permute.xlu1 %453 }
 0x118   :  { %v2026_v28 = vshrl.u32 %v4001_v63, 16  ;;  %v2027_v8 = vand.u32 65535, %v2023_v30  ;;  %v2028_v14 = vshrl.u32 %v2023_v30, 16  ;;  %v3221_v61 = vadd.s32 4294967294, %v1927_v53 }
 0x119   :  { %v4030_v7 = vadd.s32 %v833_v57, %v829_v37  ;;  %v2052_v39 = vmul.u32 %v2050_v59, %v2025_v47  ;;  %v894_v50 = vand.u32 2139095040, %v4009_v48  ;;  %v675_v21 = vadd.s32 %v3782_v13, %v3775_v25 }
 0x11a   :  { %v4037_v55 = vadd.f32 %v3628_v4, %v3943_v36  ;;  %v2030_v29 = vmul.u32 %v2028_v14, %v2025_v47  ;;  %v2031_v56 = vmul.u32 %v2027_v8, %v2026_v28  ;;  %v1915_v1 = vadd.s32 %v3849_v41, %v3836_v24 }
 0x11b   :  { %v4042_v53 = vmul.u32 %v2049_v51, %v2026_v28  ;;  %v2055_v34 = vshll.u32 %v2052_v39, 16  ;;  %v691_v37 = vsub.s32 32, %v3926_v49  ;;  %v697_v57 = vshll.u32 %v696_v18, 23 }
 0x11c   :  { %v2029_v5 = vmul.u32 %v2027_v8, %v2025_v47  ;;  %v2033_v10 = vshll.u32 %v2030_v29, 16  ;;  %vm3222_vm6 = vcmp.lt.s32.totalorder %v3221_v61, 0  ;;  %v835_v25 = vadd.s32 536870912, %v4030_v7 }
 0x11d   :  { %v2051_v13 = vmul.u32 %v2049_v51, %v2025_v47  ;;  %v895_v36 = vshrl.u32 %v894_v50, 23  ;;  %v2032_v30 = vmul.u32 %v2028_v14, %v2026_v28  ;;  %v2035_v35 = vshll.u32 %v2031_v56, 16 }
 0x11e   :  { %vm2037_vm7 = vc.u32 %v2029_v5, %v2033_v10  ;;  %v2039_v60 = vadd.s32 %v2033_v10, %v2029_v5  ;;  %v2054_v41 = vmul.u32 %v2050_v59, %v2026_v28  ;;  %v2057_v33 = vshll.u32 %v4042_v53, 16 }
 0x11f   :  { %v2038_v24 = vsel %vm2037_vm7, 1, %v6065_v3  ;;  %vm2059_vm8 = vc.u32 %v2051_v13, %v2055_v34  ;;  %v2061_v54 = vadd.s32 %v2055_v34, %v2051_v13  ;;  %v494_v14 = vadd.f32 %v3628_v4, %v454_v62 }
 0x120   :  { %v2040_v18 = vadd.s32 %v2038_v24, %v2032_v30  ;;  %vm2041_vm9 = vc.u32 %v2039_v60, %v2035_v35  ;;  %v2060_v8 = vsel %vm2059_vm8, 1, %v6065_v3  ;;  %v526_v50 = vmul.f32 2.0, %v200_v19 }
 0x121   :  { %v2042_v47 = vsel %vm2041_vm9, 1, %v6065_v3  ;;  %v2062_v51 = vadd.s32 %v2060_v8, %v2054_v41  ;;  %v4051_v5 = vshrl.u32 %v835_v25, 30  ;;  %vm2063_vm10 = vc.u32 %v2061_v54, %v2057_v33 }
 0x122   :  { %v2044_v10 = vadd.s32 %v2042_v47, %v2040_v18  ;;  %v3202_v46 = vadd.s32 4294967169, %v895_v36  ;;  %v692_v59 = vshll.u32 %v3867_v0, %v3926_v49  ;;  %v4056_v28 = vsel %vm3222_vm6, 0, %v3221_v61 }
 0x123   :  { %v2034_v60 = vshrl.u32 %v2030_v29, 16  ;;  %v2064_v35 = vsel %vm2063_vm10, 1, %v6065_v3  ;;  %v2056_v34 = vshrl.u32 %v2052_v39, 16  ;;  %v6055_v30 = vand.u32 2147483647, %v4009_v48 }
 0x124   :  { %v2066_v13 = vadd.s32 %v2064_v35, %v2062_v51  ;;  %v901_v4 = vadd.s32 1, %v3202_v46  ;;  %v4060_v19 = vshrl.u32 %v675_v21, %v691_v37  ;;  %v4062_v62 = vor.u32 4788187, %v697_v57 }
 0x125   :  { %v2045_v25 = vadd.s32 %v2044_v10, %v2034_v60  ;;  %v542_v36 = vsub.f32 %v494_v14, %v526_v50  ;;  %v1931_v24 = vsub.s32 32, %v4056_v28  ;;  %v837_v41 = vshll.u32 %v4051_v5, 30 }
 0x126   :  { %v2067_v61 = vadd.s32 %v2066_v13, %v2056_v34  ;;  %vm902_vm11 = vcmp.gt.s32.totalorder %v901_v4, 0  ;;  %v2013_v39 = vsel %vm2011_vm3, %v3991_v20, 2102212464  ;;  %v2036_v29 = vshrl.u32 %v2031_v56, 16 }
 0x127   :  { %v2058_v18 = vshrl.u32 %v4042_v53, 16  ;;  %v903_v46 = vsel %vm902_vm11, %v901_v4, 0  ;;  %v1932_v21 = vshll.u32 %v3920_v6, %v4056_v28  ;;  %v1935_v37 = vsub.s32 4294967266, %v4056_v28 }
 0x128   :  { %v1992_v57 = vshrl.u32 %v6063_v38, %v3963_v27  ;;  %v898_v8 = vand.u32 8388607, %v6055_v30  ;;  %v4077_v47 = vadd.s32 %v2045_v25, %v2036_v29  ;;  %v905_v14 = vand.u32 31, %v903_v46 }
 0x129   :  { %v2068_v51 = vadd.s32 %v2067_v61, %v2058_v18  ;;  %v558_v20 = vmax.f32 %v542_v36, 0.0  ;;  %v1933_v56 = vshrl.u32 %v1915_v1, %v1931_v24  ;;  %v4080_v53 = vsub.s32 %v4030_v7, %v837_v41 }
 0x12a   :  { %v2012_v50 = vsel %vm2008_vm1, %v1992_v57, %v3987_v43  ;;  %v2014_v27 = vsel %vm2010_vm4, %v3989_v58, %v2013_v39  ;;  %v4088_v10 = vadd.s32 %v2061_v54, %v2057_v33  ;;  %v4090_v60 = vshrl.u32 %v903_v46, 5 }
 0x12b   :  { %v4092_v35 = vsub.s32 32, %v905_v14  ;;  %v908_v34 = vshll.u32 %v6063_v38, %v905_v14  ;;  %v899_v1 = vor.u32 8388608, %v898_v8  ;;  %v911_v7 = vshll.u32 %v6061_v40, %v905_v14 }
 0x12c   :  { %v914_v13 = vshll.u32 %v6058_v42, %v905_v14  ;;  %v917_v4 = vshll.u32 %v6056_v44, %v905_v14  ;;  %vm2071_vm12 = vc.u32 %v4077_v47, %v4088_v10  ;;  %v2072_v43 = vadd.s32 1, %v2068_v51 }
 0x12d   :  { %v909_v54 = vshrl.u32 %v6061_v40, %v4092_v35  ;;  %v4103_v58 = vmul.f32 %v3631_v11, %v558_v20  ;;  %v912_v33 = vshrl.u32 %v6058_v42, %v4092_v35  ;;  %v915_v25 = vshrl.u32 %v6056_v44, %v4092_v35 }
 0x12e   :  { %v6141_v36 = vmov 920167782   ;;  %v6142_v39 = vmov 1326507024   ;;  %vm923_vm13 = vcmp.lt.s32.totalorder %v4090_v60, 1  ;;  %vm926_vm14 = vcmp.lt.s32.totalorder %v4090_v60, 4 }
 0x12f   :  { %6140 = vst [vmem:[#allocation22_spill] sm:$0xff] %v4103_v58  ;;  %v918_v24 = vshrl.u32 %v6141_v36, %v4092_v35  ;;  %v920_v41 = vshll.u32 %v6141_v36, %v905_v14  ;;  %v4112_v61 = vor.u32 %v909_v54, %v908_v34  ;;  %v921_v29 = vshrl.u32 %v6142_v39, %v4092_v35 }
 0x130   :  { %v4118_v18 = vor.u32 %v912_v33, %v911_v7  ;;  %v4120_v46 = vor.u32 %v915_v25, %v914_v13  ;;  %vm925_vm15 = vcmp.lt.s32.totalorder %v4090_v60, 3  ;;  %v1936_v8 = vadd.s32 127, %v1935_v37 }
 0x131   :  { %v919_v57 = vor.u32 %v918_v24, %v917_v4  ;;  %v2015_v14 = vsel %vm2009_vm5, %v2012_v50, %v2014_v27  ;;  %v922_v20 = vor.u32 %v921_v29, %v920_v41  ;;  %v4125_v34 = vshll.u32 %v899_v1, 8 }
 0x132   :  { %v840_v54 = vsub.s32 0, %v4080_v53  ;;  %vm924_vm0 = vcmp.lt.s32.totalorder %v4090_v60, 2  ;;  %v931_v7 = vsel %vm923_vm13, %v4112_v61, %v4118_v18  ;;  %v2073_v12 = vsel %vm2071_vm12, %v2072_v43, %v2068_v51 }
 0x133   :  { %v932_v13 = vsel %vm926_vm14, %v919_v57, 920167782  ;;  %v935_v50 = vsel %vm923_vm13, %v4118_v18, %v4120_v46  ;;  %v2134_v27 = vand.u32 2139095040, %v4103_v58  ;;  %vm839_vm1 = vcmp.lt.s32.totalorder %v4080_v53, 0 }
 0x134   :  { %v933_v37 = vsel %vm925_vm15, %v4120_v46, %v932_v13  ;;  %v2069_v1 = vmul.u32 %v4001_v63, %v2015_v14  ;;  %v936_v51 = vsel %vm926_vm14, %v922_v20, 1326507024  ;;  %v1937_v43 = vshll.u32 %v1936_v8, 23 }
 0x135   :  { %v934_v4 = vsel %vm924_vm0, %v931_v7, %v933_v37  ;;  %v937_v33 = vsel %vm925_vm15, %v919_v57, %v936_v51  ;;  %v940_v25 = vand.u32 65535, %v4125_v34  ;;  %v941_v63 = vshrl.u32 %v4125_v34, 16 }
 0x136   :  { %v964_v24 = vand.u32 65535, %v934_v4  ;;  %v4155_v41 = vadd.s32 %v2073_v12, %v2069_v1  ;;  %v938_v29 = vsel %vm924_vm0, %v935_v50, %v937_v33  ;;  %v965_v14 = vshrl.u32 %v934_v4, 16 }
 0x137   :  { %v841_v7 = vsel %vm839_vm1, %v840_v54, %v4080_v53  ;;  %v942_v13 = vand.u32 65535, %v938_v29  ;;  %v943_v37 = vshrl.u32 %v938_v29, 16  ;;  %v2135_v20 = vshrl.u32 %v2134_v27, 23 }
 0x138   :  { %v694_v57 = vor.u32 %v4060_v19, %v692_v59  ;;  %v699_v8 = vand.u32 2147483647, %v4062_v62  ;;  %v967_v12 = vmul.u32 %v965_v14, %v940_v25  ;;  %v4166_v1 = vmul.u32 %v964_v24, %v941_v63 }
 0x139   :  { %v1934_v50 = vor.u32 %v1933_v56, %v1932_v21  ;;  %v1938_v4 = vor.u32 4788187, %v1937_v43  ;;  %v945_v51 = vmul.u32 %v943_v37, %v940_v25  ;;  %v4171_v54 = vmul.u32 %v942_v13, %v941_v63 }
 0x13a   :  { %v842_v33 = vclz %v841_v7  ;;  %v2075_v27 = vadd.s32 536870912, %v4155_v41  ;;  %v966_v29 = vmul.u32 %v964_v24, %v940_v25  ;;  %v970_v0 = vshll.u32 %v967_v12, 16 }
 0x13b   :  { %v944_v49 = vmul.u32 %v942_v13, %v940_v25  ;;  %v948_v59 = vshll.u32 %v945_v51, 16  ;;  %v969_v19 = vmul.u32 %v965_v14, %v941_v63  ;;  %v3226_v62 = vadd.s32 4294967169, %v2135_v20 }
 0x13c   :  { %v947_v30 = vmul.u32 %v943_v37, %v941_v63  ;;  %v950_v44 = vshll.u32 %v4171_v54, 16  ;;  %v972_v42 = vshll.u32 %v4166_v1, 16  ;;  %vm974_vm2 = vc.u32 %v966_v29, %v970_v0 }
 0x13d   :  { %vm952_vm3 = vc.u32 %v944_v49, %v948_v59  ;;  %v954_v6 = vadd.s32 %v948_v59, %v944_v49  ;;  %v975_v28 = vsel %vm974_vm2, 1, %v6065_v3  ;;  %v976_v21 = vadd.s32 %v970_v0, %v966_v29 }
 0x13e   :  { %v701_v56 = vcvt.s32.f32 %v694_v57  ;;  %v3200_v43 = vadd.s32 4294967294, %v842_v33  ;;  %v953_v24 = vsel %vm952_vm3, 1, %v6065_v3  ;;  %v977_v7 = vadd.s32 %v975_v28, %v969_v19 }
 0x13f   :  { %vm583_vm4 = vcmp.lt.s32.totalorder %v3635_v15, 0  ;;  %v955_v25 = vadd.s32 %v953_v24, %v947_v30  ;;  %vm956_vm5 = vc.u32 %v954_v6, %v950_v44  ;;  %vm978_vm6 = vc.u32 %v976_v21, %v972_v42 }
 0x140   :  { %v4181_v63 = vmul.f32 %v701_v56, %v699_v8  ;;  %v6143_v14 = vsub.s32 4, %v3824_v9  ;;  %v4190_v37 = vshrl.u32 %v2075_v27, 30  ;;  %v957_v20 = vsel %vm956_vm5, 1, %v6065_v3 }
 0x141   :  { %v1939_v57 = vand.u32 2147483647, %v1938_v4  ;;  %v1941_v33 = vcvt.s32.f32 %v1934_v50  ;;  %v979_v44 = vsel %vm978_vm6, 1, %v6065_v3  ;;  %v2141_v30 = vadd.s32 1, %v3226_v62 }
 0x142   :  { %v4188_v13 = vsel %vm583_vm4, %v6143_v14, %v3824_v9  ;;  %vm3201_vm7 = vcmp.lt.s32.totalorder %v3200_v43, 0  ;;  %v959_v29 = vadd.s32 %v957_v20, %v955_v25  ;;  %v971_v8 = vshrl.u32 %v967_v12, 16 }
 0x143   :  { %6144 = vst [vmem:[#allocation23_spill] sm:$0xff] %v4188_v13  ;;  %v981_v0 = vadd.s32 %v979_v44, %v977_v7  ;;  %v907_v49 = vshrl.u32 %v6063_v38, %v4092_v35  ;;  %v928_v9 = vsel %vm926_vm14, %v4120_v46, 2102212464  ;;  %v6060_v27 = vand.u32 2147483647, %v4103_v58 }
 0x144   :  { %vm2142_vm8 = vcmp.gt.s32.totalorder %v2141_v30, 0  ;;  %v2077_v4 = vshll.u32 %v4190_v37, 30  ;;  %v949_v50 = vshrl.u32 %v945_v51, 16  ;;  %v703_v62 = vxor.u32 2147483648, %v4181_v63  ;;  %v4206_v35 = vld [vmem:[%s6042_s2] ss:$0 sm:$0xff] }
 0x145   :  { %v982_v59 = vadd.s32 %v981_v0, %v971_v8  ;;  %v2143_v19 = vsel %vm2142_vm8, %v2141_v30, 0  ;;  %v4210_v46 = vadd.f32 %v4206_v35, %v4003_v22  ;;  %v4212_v28 = vmul.f32 %v1941_v33, %v1939_v57 }
 0x146   :  { %v2145_v6 = vand.u32 31, %v2143_v19  ;;  %v4215_v51 = vsel %vm3201_vm7, 0, %v3200_v43  ;;  %v960_v56 = vadd.s32 %v959_v29, %v949_v50  ;;  %v973_v24 = vshrl.u32 %v4166_v1, 16 }
 0x147   :  { %6145 = vst [vmem:[#allocation24_spill] sm:$0xff] %v4210_v46  ;;  %v927_v7 = vsel %vm923_vm13, %v907_v49, %v4112_v61  ;;  %v929_v25 = vsel %vm925_vm15, %v4118_v18, %v928_v9  ;;  %v2138_v22 = vand.u32 8388607, %v6060_v27  ;;  %v4229_v20 = vsub.s32 %v4155_v41, %v2077_v4 }
 0x148   :  { %v4226_v14 = vsub.s32 32, %v2145_v6  ;;  %v951_v43 = vshrl.u32 %v4171_v54, 16  ;;  %v983_v57 = vadd.s32 %v982_v59, %v973_v24  ;;  %v2148_v33 = vshll.u32 %v6063_v38, %v2145_v6 }
 0x149   :  { %v2151_v44 = vshll.u32 %v6061_v40, %v2145_v6  ;;  %v6146_v18 = vmov 2131351028   ;;  %v6147_v29 = vmov 2102212464   ;;  %v4242_v41 = vshrl.u32 %v2143_v19, 5 }
 0x14a   :  { %v2149_v61 = vshrl.u32 %v6061_v40, %v4226_v14  ;;  %v2152_v30 = vshrl.u32 %v6146_v18, %v4226_v14  ;;  %v2155_v8 = vshrl.u32 %v6147_v29, %v4226_v14  ;;  %v4240_v0 = vadd.s32 %v960_v56, %v951_v43 }
 0x14b   :  { %v2157_v54 = vshll.u32 %v6147_v29, %v2145_v6  ;;  %v2158_v49 = vshrl.u32 %v6141_v36, %v4226_v14  ;;  %v2139_v9 = vor.u32 8388608, %v2138_v22  ;;  %v2154_v59 = vshll.u32 %v6146_v18, %v2145_v6 }
 0x14c   :  { %v4247_v4 = vor.u32 %v2149_v61, %v2148_v33  ;;  %v4249_v50 = vor.u32 %v2152_v30, %v2151_v44  ;;  %v4254_v24 = vadd.s32 %v976_v21, %v972_v42  ;;  %v2160_v19 = vshll.u32 %v6141_v36, %v2145_v6  ;;  %v179_v44 = vpop.f32.mrf.mxu0 }
 0x14d   :  { %v2159_v56 = vor.u32 %v2158_v49, %v2157_v54  ;;  %v2161_v43 = vshrl.u32 %v6142_v39, %v4226_v14  ;;  %v830_v27 = vadd.s32 %v3985_v17, %v3961_v2  ;;  %v846_v22 = vsub.s32 32, %v4215_v51 }
 0x14e   :  { %v987_v33 = vadd.s32 1, %v983_v57  ;;  %v4262_v61 = vor.u32 %v2155_v8, %v2154_v59  ;;  %v850_v30 = vsub.s32 4294967266, %v4215_v51  ;;  %vm986_vm9 = vc.u32 %v4240_v0, %v4254_v24 }
 0x14f   :  { %v2162_v42 = vor.u32 %v2161_v43, %v2160_v19  ;;  %vm2163_vm10 = vcmp.lt.s32.totalorder %v4242_v41, 1  ;;  %v930_v1 = vsel %vm924_vm0, %v927_v7, %v929_v25  ;;  %vm2166_vm11 = vcmp.lt.s32.totalorder %v4242_v41, 4 }
 0x150   :  { %v2171_v2 = vsel %vm2163_vm10, %v4247_v4, %v4249_v50  ;;  %v4275_v17 = vshll.u32 %v2139_v9, 8  ;;  %v2080_v21 = vsub.s32 0, %v4229_v20  ;;  %vm2165_vm12 = vcmp.lt.s32.totalorder %v4242_v41, 3 }
 0x151   :  { %v2172_v6 = vsel %vm2166_vm11, %v2159_v56, 920167782  ;;  %v519_v8 = vmul.f32 2.0, %v179_v44  ;;  %v988_v54 = vsel %vm986_vm9, %v987_v33, %v983_v57  ;;  %vm2164_vm13 = vcmp.lt.s32.totalorder %v4242_v41, 2 }
 0x152   :  { %v2173_v60 = vsel %vm2165_vm12, %v4262_v61, %v2172_v6  ;;  %v2175_v7 = vsel %vm2163_vm10, %v4249_v50, %v4262_v61  ;;  %vm2079_vm14 = vcmp.lt.s32.totalorder %v4229_v20, 0  ;;  %v984_v25 = vmul.u32 %v4125_v34, %v930_v1 }
 0x153   :  { %v2174_v49 = vsel %vm2164_vm13, %v2171_v2, %v2173_v60  ;;  %v2176_v57 = vsel %vm2166_vm11, %v2162_v42, 1326507024  ;;  %v851_v9 = vadd.s32 127, %v850_v30  ;;  %v2180_v19 = vand.u32 65535, %v4275_v17 }
 0x154   :  { %v2177_v59 = vsel %vm2165_vm12, %v2159_v56, %v2176_v57  ;;  %v2204_v43 = vand.u32 65535, %v2174_v49  ;;  %v4298_v33 = vadd.s32 %v988_v54, %v984_v25  ;;  %v2181_v34 = vshrl.u32 %v4275_v17, 16  ;;  %v464_v25 = vpop.permute.xlu0 %463 }
 0x155   :  { %v2178_v44 = vsel %vm2164_vm13, %v2175_v7, %v2177_v59  ;;  %v2205_v1 = vshrl.u32 %v2174_v49, 16  ;;  %v6148_v2 = vand.u32 2147483647, %v3635_v15  ;;  %v6149_v6 = vmov 0 }
 0x156   :  { %v2081_v30 = vsel %vm2079_vm14, %v2080_v21, %v4229_v20  ;;  %v2182_v56 = vand.u32 65535, %v2178_v44  ;;  %v2183_v42 = vshrl.u32 %v2178_v44, 16  ;;  %v535_v60 = vsub.f32 %v4037_v55, %v519_v8 }
 0x157   :  { %vm4305_vm15 = vcmp.le.f32.partialorder %v6148_v2, 0.7853982  ;;  %v704_v54 = vsel %vm583_vm4, %v703_v62, %v4181_v63  ;;  %v1943_v7 = vxor.u32 2147483648, %v4212_v28  ;;  %v2207_v49 = vmul.u32 %v2205_v1, %v2180_v19 }
 0x158   :  { %v6150_v6 = vsel %vm4305_vm15, 4294967295, %v6149_v6  ;;  %v4317_v57 = vmul.u32 %v2204_v43, %v2181_v34  ;;  %v848_v59 = vshrl.u32 %v830_v27, %v846_v22  ;;  %v852_v2 = vshll.u32 %v851_v9, 23 }
 0x159   :  { %6151 = vst [vmem:[#allocation25_spill] sm:$0xff] %v6150_v6  ;;  %v2185_v40 = vmul.u32 %v2183_v42, %v2180_v19  ;;  %v4319_v21 = vmul.u32 %v2182_v56, %v2181_v34  ;;  %vm1823_vm0 = vcmp.lt.s32.totalorder %v3640_v23, 0  ;;  %v2082_v55 = vclz %v2081_v30 }
 0x15a   :  { %v990_v8 = vadd.s32 536870912, %v4298_v33  ;;  %v2206_v44 = vmul.u32 %v2204_v43, %v2180_v19  ;;  %v2210_v38 = vshll.u32 %v2207_v49, 16  ;;  %v2184_v12 = vmul.u32 %v2182_v56, %v2180_v19 }
 0x15b   :  { %v2188_v63 = vshll.u32 %v2185_v40, 16  ;;  %v2209_v62 = vmul.u32 %v2205_v1, %v2181_v34  ;;  %v551_v3 = vmax.f32 %v535_v60, 0.0  ;;  %v2187_v13 = vmul.u32 %v2183_v42, %v2181_v34 }
 0x15c   :  { %v2190_v46 = vshll.u32 %v4319_v21, 16  ;;  %v2212_v27 = vshll.u32 %v4317_v57, 16  ;;  %vm2214_vm1 = vc.u32 %v2206_v44, %v2210_v38  ;;  %v6152_v9 = vmov 0  }
 0x15d   :  { %vm2192_vm2 = vc.u32 %v2184_v12, %v2188_v63  ;;  %v2194_v22 = vadd.s32 %v2188_v63, %v2184_v12  ;;  %v2215_v16 = vsel %vm2214_vm1, 1, %v6152_v9  ;;  %v2216_v58 = vadd.s32 %v2210_v38, %v2206_v44 }
 0x15e   :  { %v6153_v30 = vand.u32 2147483647, %v3640_v23  ;;  %v6154_v43 = vmov 0  ;;  %v847_v19 = vshll.u32 %v4080_v53, %v4215_v51  ;;  %v4334_v34 = vshrl.u32 %v990_v8, 30 }
 0x15f   :  { %v2193_v1 = vsel %vm2192_vm2, 1, %v6152_v9  ;;  %v2217_v56 = vadd.s32 %v2215_v16, %v2209_v62  ;;  %vm2196_vm4 = vc.u32 %v2194_v22, %v2190_v46  ;;  %vm2218_vm5 = vc.u32 %v2216_v58, %v2212_v27 }
 0x160   :  { %vm4328_vm3 = vcmp.le.f32.partialorder %v6153_v30, 0.7853982  ;;  %v2195_v42 = vadd.s32 %v2193_v1, %v2187_v13  ;;  %v4338_v12 = vmul.f32 %v3631_v11, %v551_v3  ;;  %v4343_v38 = vsel %vm4305_vm15, %v3635_v15, %v704_v54  ;;  %v479_v3 = vpop.permute.xlu0 %478 }
 0x161   :  { %v6155_v43 = vsel %vm4328_vm3, 4294967295, %v6154_v43  ;;  %6158 = vst [vmem:[#allocation28_spill] sm:$0xff] %v4343_v38  ;;  %v853_v60 = vor.u32 4788187, %v852_v2  ;;  %v3224_v44 = vadd.s32 4294967294, %v2082_v55  ;;  %v2197_v53 = vsel %vm2196_vm4, 1, %v6152_v9 }
 0x162   :  { %6156 = vst [vmem:[#allocation26_spill] sm:$0xff] %v6155_v43  ;;  %v849_v51 = vor.u32 %v848_v59, %v847_v19  ;;  %v4347_v8 = vadd.f32 %v4206_v35, %v464_v25  ;;  %v2199_v16 = vadd.s32 %v2197_v53, %v2195_v42  ;;  %v2219_v13 = vsel %vm2218_vm5, 1, %v6152_v9 }
 0x163   :  { %6157 = vst [vmem:[#allocation27_spill] sm:$0xff] %v4338_v12  ;;  %v992_v46 = vshll.u32 %v4334_v34, 30  ;;  %v2189_v63 = vshrl.u32 %v2185_v40, 16  ;;  %v2211_v62 = vshrl.u32 %v2207_v49, 16  ;;  %v2221_v22 = vadd.s32 %v2219_v13, %v2217_v56  ;;  %v459_v13 = vpop.permute.xlu2 %458 }
 0x164   :  { %v4353_v54 = vmul.f32 %v4343_v38, %v4343_v38  ;;  %v1944_v59 = vsel %vm1823_vm0, %v1943_v7, %v4212_v28  ;;  %v6160_v25 = vsub.s32 4, %v3899_v26  ;;  %v1049_v55 = vand.u32 2139095040, %v4338_v12 }
 0x165   :  { %v854_v40 = vand.u32 2147483647, %v853_v60  ;;  %vm3225_vm6 = vcmp.lt.s32.totalorder %v3224_v44, 0  ;;  %v2200_v49 = vadd.s32 %v2199_v16, %v2189_v63  ;;  %v2222_v30 = vadd.s32 %v2221_v22, %v2211_v62  ;;  %v203_v16 = vpop.f32.mrf.mxu2 }
 0x166   :  { %6159 = vst [vmem:[#allocation29_spill] sm:$0xff] %v4353_v54  ;;  %v4363_v2 = vsel %vm1823_vm0, %v6160_v25, %v3899_v26  ;;  %v856_v19 = vcvt.s32.f32 %v849_v51  ;;  %v4367_v1 = vadd.f32 %v4206_v35, %v479_v3  ;;  %v2213_v56 = vshrl.u32 %v4317_v57, 16 }
 0x167   :  { %6161 = vst [vmem:[#allocation30_spill] sm:$0xff] %v4363_v2  ;;  %v1050_v28 = vshrl.u32 %v1049_v55, 23  ;;  %v4371_v7 = vsub.s32 %v4298_v33, %v992_v46  ;;  %v6163_v42 = vmov 683565275   ;;  %v2168_v60 = vsel %vm2166_vm11, %v4262_v61, 2102212464 }
 0x168   :  { %6162 = vst [vmem:[#allocation31_spill] sm:$0xff] %v4367_v1  ;;  %v2147_v26 = vshrl.u32 %v6163_v42, %v4226_v14  ;;  %v2191_v53 = vshrl.u32 %v4319_v21, 16  ;;  %v4382_v51 = vsel %vm4328_vm3, %v3640_v23, %v1944_v59  ;;  %v4384_v57 = vsel %vm3225_vm6, 0, %v3224_v44 }
 0x169   :  { %6164 = vst [vmem:[#allocation32_spill] sm:$0xff] %v4382_v51  ;;  %v2223_v33 = vadd.s32 %v2222_v30, %v2213_v56  ;;  %v3205_v46 = vadd.s32 4294967169, %v1050_v28  ;;  %v4386_v3 = vmul.f32 %v856_v19, %v854_v40  ;;  %v495_v14 = vadd.f32 %v4206_v35, %v459_v13 }
 0x16a   :  { %v2167_v61 = vsel %vm2163_vm10, %v2147_v26, %v4247_v4  ;;  %v4392_v21 = vadd.s32 %v2200_v49, %v2191_v53  ;;  %v2169_v63 = vsel %vm2165_vm12, %v4249_v50, %v2168_v60  ;;  %v6070_v44 = vand.u32 2147483647, %v4338_v12 }
 0x16b   :  { %v1056_v62 = vadd.s32 1, %v3205_v46  ;;  %v527_v22 = vmul.f32 2.0, %v203_v16  ;;  %v2086_v59 = vsub.s32 32, %v4384_v57  ;;  %v2090_v25 = vsub.s32 4294967266, %v4384_v57 }
 0x16c   :  { %v995_v35 = vsub.s32 0, %v4371_v7  ;;  %v4401_v55 = vadd.s32 %v2216_v58, %v2212_v27  ;;  %v4405_v4 = vmul.f32 %v4382_v51, %v4382_v51  ;;  %vm994_vm7 = vcmp.lt.s32.totalorder %v4371_v7, 0 }
 0x16d   :  { %v2227_v40 = vadd.s32 1, %v2223_v33  ;;  %vm1057_vm8 = vcmp.gt.s32.totalorder %v1056_v62, 0  ;;  %v2070_v50 = vadd.s32 %v4088_v10, %v4077_v47  ;;  %v2170_v49 = vsel %vm2164_vm13, %v2167_v61, %v2169_v63 }
 0x16e   :  { %6165 = vst [vmem:[#allocation33_spill] sm:$0xff] %v4405_v4  ;;  %vm2226_vm9 = vc.u32 %v4392_v21, %v4401_v55  ;;  %v1058_v30 = vsel %vm1057_vm8, %v1056_v62, 0  ;;  %v1053_v27 = vand.u32 8388607, %v6070_v44  ;;  %v543_v56 = vsub.f32 %v495_v14, %v527_v22 }
 0x16f   :  { %v1060_v19 = vand.u32 31, %v1058_v30  ;;  %v858_v28 = vxor.u32 2147483648, %v4386_v3  ;;  %v2088_v26 = vshrl.u32 %v2070_v50, %v2086_v59  ;;  %v2091_v60 = vadd.s32 127, %v2090_v25 }
 0x170   :  { %v996_v47 = vsel %vm994_vm7, %v995_v35, %v4371_v7  ;;  %v2224_v10 = vmul.u32 %v4275_v17, %v2170_v49  ;;  %v2228_v41 = vsel %vm2226_vm9, %v2227_v40, %v2223_v33  ;;  %v4423_v13 = vshrl.u32 %v1058_v30, 5 }
 0x171   :  { %v4420_v53 = vsub.s32 32, %v1060_v19  ;;  %v1063_v16 = vshll.u32 %v6163_v42, %v1060_v19  ;;  %v6166_v46 = vmov 2475754826   ;;  %v1069_v63 = vshll.u32 %v6146_v18, %v1060_v19 }
 0x172   :  { %v1066_v61 = vshll.u32 %v6166_v46, %v1060_v19  ;;  %v1072_v14 = vshll.u32 %v6147_v29, %v1060_v19  ;;  %v997_v62 = vclz %v996_v47  ;;  %v1054_v22 = vor.u32 8388608, %v1053_v27 }
 0x173   :  { %v1064_v59 = vshrl.u32 %v6166_v46, %v4420_v53  ;;  %v559_v25 = vmax.f32 %v543_v56, 0.0  ;;  %v1067_v17 = vshrl.u32 %v6146_v18, %v4420_v53  ;;  %v1070_v33 = vshrl.u32 %v6147_v29, %v4420_v53 }
 0x174   :  { %v1073_v35 = vshrl.u32 %v6141_v36, %v4420_v53  ;;  %v1075_v40 = vshll.u32 %v6141_v36, %v1060_v19  ;;  %vm738_vm10 = vcmp.lt.s32.totalorder %v3708_v32, 0  ;;  %v2092_v50 = vshll.u32 %v2091_v60, 23 }
 0x175   :  { %v4438_v49 = vadd.s32 %v2228_v41, %v2224_v10  ;;  %v4440_v30 = vor.u32 %v1064_v59, %v1063_v16  ;;  %v1076_v27 = vshrl.u32 %v6142_v39, %v4420_v53  ;;  %v4444_v56 = vor.u32 %v1067_v17, %v1066_v61 }
 0x176   :  { %v1071_v47 = vor.u32 %v1070_v33, %v1069_v63  ;;  %v1074_v44 = vor.u32 %v1073_v35, %v1072_v14  ;;  %vm1078_vm11 = vcmp.lt.s32.totalorder %v4423_v13, 1  ;;  %v2087_v58 = vshll.u32 %v4229_v20, %v4384_v57 }
 0x177   :  { %v3203_v19 = vadd.s32 4294967294, %v997_v62  ;;  %v1077_v23 = vor.u32 %v1076_v27, %v1075_v40  ;;  %v4449_v51 = vshll.u32 %v1054_v22, 8  ;;  %vm1080_vm12 = vcmp.lt.s32.totalorder %v4423_v13, 3 }
 0x178   :  { %vm1081_vm13 = vcmp.lt.s32.totalorder %v4423_v13, 4  ;;  %v1086_v60 = vsel %vm1078_vm11, %v4440_v30, %v4444_v56  ;;  %v4458_v10 = vmul.f32 %v3631_v11, %v559_v25  ;;  %v4460_v41 = vor.u32 %v2088_v26, %v2087_v58 }
 0x179   :  { %v2230_v20 = vadd.s32 536870912, %v4438_v49  ;;  %v1087_v57 = vsel %vm1081_vm13, %v1074_v44, 920167782  ;;  %v1090_v16 = vsel %vm1078_vm11, %v4444_v56, %v1071_v47  ;;  %v4468_v61 = vor.u32 4788187, %v2092_v50  ;;  %v182_v50 = vpop.f32.mrf.mxu0 }
 0x17a   :  { %6167 = vst [vmem:[#allocation34_spill] sm:$0xff] %v4458_v10  ;;  %vm1079_vm14 = vcmp.lt.s32.totalorder %v4423_v13, 2  ;;  %v1088_v63 = vsel %vm1080_vm12, %v1071_v47, %v1087_v57  ;;  %v1091_v58 = vsel %vm1081_vm13, %v1077_v23, 1326507024  ;;  %vm3204_vm0 = vcmp.lt.s32.totalorder %v3203_v19, 0 }
 0x17b   :  { %v1089_v26 = vsel %vm1079_vm14, %v1086_v60, %v1088_v63  ;;  %v1092_v14 = vsel %vm1080_vm12, %v1074_v44, %v1091_v58  ;;  %v1095_v62 = vand.u32 65535, %v4449_v51  ;;  %v2289_v17 = vand.u32 2139095040, %v4458_v10 }
 0x17c   :  { %v1093_v22 = vsel %vm1079_vm14, %v1090_v16, %v1092_v14  ;;  %v1119_v59 = vand.u32 65535, %v1089_v26  ;;  %v1120_v25 = vshrl.u32 %v1089_v26, 16  ;;  %v4483_v33 = vshrl.u32 %v2230_v20, 30 }
 0x17d   :  { %v1096_v23 = vshrl.u32 %v4449_v51, 16  ;;  %v1097_v35 = vand.u32 65535, %v1093_v22  ;;  %v1098_v40 = vshrl.u32 %v1093_v22, 16  ;;  %v4489_v44 = vsel %vm738_vm10, %v858_v28, %v4386_v3 }
 0x17e   :  { %v6168_v27 = vsub.s32 4, %v4051_v5  ;;  %v2096_v20 = vcvt.s32.f32 %v4460_v41  ;;  %v1122_v57 = vmul.u32 %v1120_v25, %v1095_v62  ;;  %v2094_v16 = vand.u32 2147483647, %v4468_v61 }
 0x17f   :  { %v4502_v63 = vadd.s32 %v4254_v24, %v4240_v0  ;;  %v1100_v58 = vmul.u32 %v1098_v40, %v1095_v62  ;;  %v1101_v26 = vmul.u32 %v1097_v35, %v1096_v23  ;;  %v4505_v3 = vsel %vm3204_vm0, 0, %v3203_v19 }
 0x180   :  { %v4496_v60 = vsel %vm738_vm10, %v6168_v27, %v4051_v5  ;;  %v1123_v28 = vmul.u32 %v1119_v59, %v1096_v23  ;;  %v2290_v14 = vshrl.u32 %v2289_v17, 23  ;;  %v520_v22 = vmul.f32 2.0, %v182_v50 }
 0x181   :  { %6169 = vst [vmem:[#allocation35_spill] sm:$0xff] %v4496_v60  ;;  %v2232_v5 = vshll.u32 %v4483_v33, 30  ;;  %v1099_v27 = vmul.u32 %v1097_v35, %v1095_v62  ;;  %v1103_v60 = vshll.u32 %v1100_v58, 16  ;;  %v1062_v61 = vshrl.u32 %v6163_v42, %v4420_v53 }
 0x182   :  { %v1083_v0 = vsel %vm1081_vm13, %v1071_v47, 2102212464  ;;  %v1121_v24 = vmul.u32 %v1119_v59, %v1095_v62  ;;  %v1125_v43 = vshll.u32 %v1122_v57, 16  ;;  %v1102_v2 = vmul.u32 %v1098_v40, %v1096_v23 }
 0x183   :  { %v1105_v19 = vshll.u32 %v1101_v26, 16  ;;  %vm1107_vm1 = vc.u32 %v1099_v27, %v1103_v60  ;;  %v1109_v38 = vadd.s32 %v1103_v60, %v1099_v27  ;;  %v1124_v50 = vmul.u32 %v1120_v25, %v1096_v23 }
 0x184   :  { %v1108_v17 = vsel %vm1107_vm1, 1, %v6152_v9  ;;  %v1127_v15 = vshll.u32 %v1123_v28, 16  ;;  %v3229_v35 = vadd.s32 4294967169, %v2290_v14  ;;  %vm1129_vm4 = vc.u32 %v1121_v24, %v1125_v43 }
 0x185   :  { %v1110_v4 = vadd.s32 %v1108_v17, %v1102_v2  ;;  %vm1111_vm2 = vc.u32 %v1109_v38, %v1105_v19  ;;  %v1131_v41 = vadd.s32 %v1125_v43, %v1121_v24  ;;  %v1082_v53 = vsel %vm1078_vm11, %v1062_v61, %v4440_v30 }
 0x186   :  { %v1084_v47 = vsel %vm1080_vm12, %v4444_v56, %v1083_v0  ;;  %v1112_v62 = vsel %vm1111_vm2, 1, %v6152_v9  ;;  %v1130_v59 = vsel %vm1129_vm4, 1, %v6152_v9  ;;  %v1104_v40 = vshrl.u32 %v1100_v58, 16 }
 0x187   :  { %v1114_v25 = vadd.s32 %v1112_v62, %v1110_v4  ;;  %v1132_v23 = vadd.s32 %v1130_v59, %v1124_v50  ;;  %vm1133_vm5 = vc.u32 %v1131_v41, %v1127_v15  ;;  %v4523_v38 = vsub.s32 %v4438_v49, %v2232_v5 }
 0x188   :  { %v1134_v43 = vsel %vm1133_vm5, 1, %v6152_v9  ;;  %v2296_v2 = vadd.s32 1, %v3229_v35  ;;  %v536_v30 = vsub.f32 %v3941_v31, %v520_v22  ;;  %v1106_v60 = vshrl.u32 %v1101_v26, 16 }
 0x189   :  { %v1115_v14 = vadd.s32 %v1114_v25, %v1104_v40  ;;  %v1126_v27 = vshrl.u32 %v1122_v57, 16  ;;  %v1136_v56 = vadd.s32 %v1134_v43, %v1132_v23  ;;  %v4527_v61 = vmul.f32 %v2096_v20, %v2094_v16 }
 0x18a   :  { %v1085_v58 = vsel %vm1079_vm14, %v1082_v53, %v1084_v47  ;;  %v6170_v4 = vand.u32 2147483647, %v4458_v10  ;;  %vm2297_vm6 = vcmp.gt.s32.totalorder %v2296_v2, 0  ;;  %v1128_v5 = vshrl.u32 %v1123_v28, 16 }
 0x18b   :  { %v4533_v49 = vadd.s32 %v1115_v14, %v1106_v60  ;;  %v1137_v24 = vadd.s32 %v1136_v56, %v1126_v27  ;;  %v2298_v19 = vsel %vm2297_vm6, %v2296_v2, 0  ;;  %v1001_v31 = vsub.s32 32, %v4505_v3 }
 0x18c   :  { %v2293_v0 = vand.u32 8388607, %v6170_v4  ;;  %v1005_v26 = vsub.s32 4294967266, %v4505_v3  ;;  %v4537_v57 = vadd.s32 %v1131_v41, %v1127_v15  ;;  %v2300_v20 = vand.u32 31, %v2298_v19 }
 0x18d   :  { %vm2234_vm7 = vcmp.lt.s32.totalorder %v4523_v38, 0  ;;  %v2235_v13 = vsub.s32 0, %v4523_v38  ;;  %v1138_v16 = vadd.s32 %v1137_v24, %v1128_v5  ;;  %v552_v22 = vmax.f32 %v536_v30, 0.0 }
 0x18e   :  { %v1139_v17 = vmul.u32 %v4449_v51, %v1085_v58  ;;  %vm1141_vm8 = vc.u32 %v4533_v49, %v4537_v57  ;;  %v2294_v28 = vor.u32 8388608, %v2293_v0  ;;  %v2301_v50 = vsub.s32 32, %v2300_v20 }
 0x18f   :  { %v1142_v35 = vadd.s32 1, %v1138_v16  ;;  %v4544_v53 = vshrl.u32 %v2298_v19, 5  ;;  %v2303_v15 = vshll.u32 %v6163_v42, %v2300_v20  ;;  %v2306_v41 = vshll.u32 %v6166_v46, %v2300_v20 }
 0x190   :  { %v2304_v47 = vshrl.u32 %v6166_v46, %v2301_v50  ;;  %v2307_v62 = vshrl.u32 %v6146_v18, %v2301_v50  ;;  %v2309_v59 = vshll.u32 %v6146_v18, %v2300_v20  ;;  %v2312_v51 = vshll.u32 %v6147_v29, %v2300_v20 }
 0x191   :  { %v1143_v40 = vsel %vm1141_vm8, %v1142_v35, %v1138_v16  ;;  %v2310_v25 = vshrl.u32 %v6147_v29, %v2301_v50  ;;  %v2313_v23 = vshrl.u32 %v6141_v36, %v2301_v50  ;;  %v2315_v43 = vshll.u32 %v6141_v36, %v2300_v20 }
 0x192   :  { %v1144_v2 = vadd.s32 %v1143_v40, %v1139_v17  ;;  %v2305_v30 = vor.u32 %v2304_v47, %v2303_v15  ;;  %v4555_v60 = vor.u32 %v2307_v62, %v2306_v41  ;;  %v2316_v14 = vshrl.u32 %v6142_v39, %v2301_v50 }
 0x193   :  { %v2236_v27 = vsel %vm2234_vm7, %v2235_v13, %v4523_v38  ;;  %v2311_v56 = vor.u32 %v2310_v25, %v2309_v59  ;;  %v2314_v58 = vor.u32 %v2313_v23, %v2312_v51  ;;  %v4562_v4 = vmul.f32 %v3631_v11, %v552_v22 }
 0x194   :  { %v1145_v0 = vadd.s32 536870912, %v1144_v2  ;;  %v2317_v5 = vor.u32 %v2316_v14, %v2315_v43  ;;  %vm2318_vm9 = vcmp.lt.s32.totalorder %v4544_v53, 1  ;;  %vm2321_vm10 = vcmp.lt.s32.totalorder %v4544_v53, 4 }
 0x195   :  { %6171 = vst [vmem:[#allocation36_spill] sm:$0xff] %v4562_v4  ;;  %vm2320_vm11 = vcmp.lt.s32.totalorder %v4544_v53, 3  ;;  %v2326_v24 = vsel %vm2318_vm9, %v2305_v30, %v4555_v60  ;;  %v2327_v19 = vsel %vm2321_vm10, %v2314_v58, 920167782  ;;  %v4572_v20 = vshll.u32 %v2294_v28, 8 }
 0x196   :  { %v4574_v13 = vshrl.u32 %v1145_v0, 30  ;;  %vm2319_vm12 = vcmp.lt.s32.totalorder %v4544_v53, 2  ;;  %v2328_v16 = vsel %vm2320_vm11, %v2311_v56, %v2327_v19  ;;  %v2330_v22 = vsel %vm2318_vm9, %v4555_v60, %v2311_v56 }
 0x197   :  { %v1006_v17 = vadd.s32 127, %v1005_v26  ;;  %v2237_v35 = vclz %v2236_v27  ;;  %v2329_v15 = vsel %vm2319_vm12, %v2326_v24, %v2328_v16  ;;  %v2331_v28 = vsel %vm2321_vm10, %v2317_v5, 1326507024 }
 0x198   :  { %v1147_v41 = vshll.u32 %v4574_v13, 30  ;;  %v2332_v47 = vsel %vm2320_vm11, %v2314_v58, %v2331_v28  ;;  %v2359_v62 = vand.u32 65535, %v2329_v15  ;;  %v1204_v59 = vand.u32 2139095040, %v4562_v4 }
 0x199   :  { %v2333_v51 = vsel %vm2319_vm12, %v2330_v22, %v2332_v47  ;;  %v2335_v26 = vand.u32 65535, %v4572_v20  ;;  %v2336_v40 = vshrl.u32 %v4572_v20, 16  ;;  %v2360_v25 = vshrl.u32 %v2329_v15, 16 }
 0x19a   :  { %v1002_v23 = vshll.u32 %v4371_v7, %v4505_v3  ;;  %v2302_v43 = vshrl.u32 %v6163_v42, %v2301_v50  ;;  %v2337_v14 = vand.u32 65535, %v2333_v51  ;;  %v2338_v27 = vshrl.u32 %v2333_v51, 16 }
 0x19b   :  { %v1003_v58 = vshrl.u32 %v4502_v63, %v1001_v31  ;;  %v4598_v0 = vsub.s32 %v1144_v2, %v1147_v41  ;;  %v2362_v5 = vmul.u32 %v2360_v25, %v2335_v26  ;;  %v2363_v24 = vmul.u32 %v2359_v62, %v2336_v40 }
 0x19c   :  { %v1007_v19 = vshll.u32 %v1006_v17, 23  ;;  %v3227_v16 = vadd.s32 4294967294, %v2237_v35  ;;  %v2322_v22 = vsel %vm2318_vm9, %v2302_v43, %v2305_v30  ;;  %v2340_v28 = vmul.u32 %v2338_v27, %v2335_v26 }
 0x19d   :  { %v2323_v15 = vsel %vm2321_vm10, %v2311_v56, 2102212464  ;;  %v2341_v7 = vmul.u32 %v2337_v14, %v2336_v40  ;;  %v2365_v3 = vshll.u32 %v2362_v5, 16  ;;  %v1205_v50 = vshrl.u32 %v1204_v59, 23 }
 0x19e   :  { %v2339_v47 = vmul.u32 %v2337_v14, %v2335_v26  ;;  %v2343_v51 = vshll.u32 %v2340_v28, 16  ;;  %v2361_v54 = vmul.u32 %v2359_v62, %v2335_v26  ;;  %v2364_v63 = vmul.u32 %v2360_v25, %v2336_v40 }
 0x19f   :  { %v1150_v31 = vsub.s32 0, %v4598_v0  ;;  %v2342_v2 = vmul.u32 %v2338_v27, %v2336_v40  ;;  %v2345_v41 = vshll.u32 %v2341_v7, 16  ;;  %v2367_v17 = vshll.u32 %v2363_v24, 16 }
 0x1a0   :  { %v6172_v35 = vand.u32 2147483647, %v3708_v32  ;;  %v6173_v30 = vmov 0  ;;  %vm2347_vm14 = vc.u32 %v2339_v47, %v2343_v51  ;;  %v2349_v56 = vadd.s32 %v2343_v51, %v2339_v47 }
 0x1a1   :  { %vm2369_vm0 = vc.u32 %v2361_v54, %v2365_v3  ;;  %v2371_v43 = vadd.s32 %v2365_v3, %v2361_v54  ;;  %vm1149_vm1 = vcmp.lt.s32.totalorder %v4598_v0, 0  ;;  %v2348_v62 = vsel %vm2347_vm14, 1, %v6152_v9 }
 0x1a2   :  { %vm4607_vm13 = vcmp.le.f32.partialorder %v6172_v35, 0.7853982  ;;  %v2370_v59 = vsel %vm2369_vm0, 1, %v6152_v9  ;;  %v3208_v26 = vadd.s32 4294967169, %v1205_v50  ;;  %v2350_v40 = vadd.s32 %v2348_v62, %v2342_v2 }
 0x1a3   :  { %v6174_v30 = vsel %vm4607_vm13, 4294967295, %v6173_v30  ;;  %vm2351_vm2 = vc.u32 %v2349_v56, %v2345_v41  ;;  %v2372_v25 = vadd.s32 %v2370_v59, %v2364_v63  ;;  %vm2373_vm4 = vc.u32 %v2371_v43, %v2367_v17 }
 0x1a4   :  { %6175 = vst [vmem:[#allocation37_spill] sm:$0xff] %v6174_v30  ;;  %v2324_v14 = vsel %vm2320_vm11, %v4555_v60, %v2323_v15  ;;  %v2352_v27 = vsel %vm2351_vm2, 1, %v6152_v9  ;;  %v2366_v47 = vshrl.u32 %v2362_v5, 16  ;;  %v2374_v54 = vsel %vm2373_vm4, 1, %v6152_v9 }
 0x1a5   :  { %v1151_v3 = vsel %vm1149_vm1, %v1150_v31, %v4598_v0  ;;  %v2344_v51 = vshrl.u32 %v2340_v28, 16  ;;  %v2354_v35 = vadd.s32 %v2352_v27, %v2350_v40  ;;  %v2376_v6 = vadd.s32 %v2374_v54, %v2372_v25 }
 0x1a6   :  { %v1004_v1 = vor.u32 %v1003_v58, %v1002_v23  ;;  %v1008_v50 = vor.u32 4788187, %v1007_v19  ;;  %vm3228_vm5 = vcmp.lt.s32.totalorder %v3227_v16, 0  ;;  %v1211_v2 = vadd.s32 1, %v3208_v26 }
 0x1a7   :  { %v2346_v63 = vshrl.u32 %v2341_v7, 16  ;;  %v2355_v41 = vadd.s32 %v2354_v35, %v2344_v51  ;;  %v2368_v56 = vshrl.u32 %v2363_v24, 16  ;;  %v2377_v62 = vadd.s32 %v2376_v6, %v2366_v47 }
 0x1a8   :  { %v1152_v59 = vclz %v1151_v3  ;;  %v2325_v60 = vsel %vm2319_vm12, %v2322_v22, %v2324_v14  ;;  %v6082_v5 = vand.u32 2147483647, %v4562_v4  ;;  %vm1212_vm6 = vcmp.gt.s32.totalorder %v1211_v2, 0 }
 0x1a9   :  { %v4623_v15 = vadd.s32 %v2355_v41, %v2346_v63  ;;  %v4625_v28 = vadd.s32 %v2371_v43, %v2367_v17  ;;  %v2378_v31 = vadd.s32 %v2377_v62, %v2368_v56  ;;  %v1213_v23 = vsel %vm1212_vm6, %v1211_v2, 0 }
 0x1aa   :  { %v4631_v58 = vsel %vm4607_vm13, %v3708_v32, %v4489_v44  ;;  %vm1978_vm7 = vcmp.lt.s32.totalorder %v3905_v52, 0  ;;  %v2100_v6 = vsub.s32 4, %v4190_v37  ;;  %v4636_v53 = vsel %vm3228_vm5, 0, %v3227_v16 }
 0x1ab   :  { %6176 = vst [vmem:[#allocation38_spill] sm:$0xff] %v4631_v58  ;;  %v1215_v24 = vand.u32 31, %v1213_v23  ;;  %v2098_v19 = vxor.u32 2147483648, %v4527_v61  ;;  %v1011_v22 = vcvt.s32.f32 %v1004_v1  ;;  %vm2381_vm8 = vc.u32 %v4623_v15, %v4625_v28 }
 0x1ac   :  { %v2382_v7 = vadd.s32 1, %v2378_v31  ;;  %v1009_v17 = vand.u32 2147483647, %v1008_v50  ;;  %v2379_v43 = vmul.u32 %v4572_v20, %v2325_v60  ;;  %v1208_v44 = vand.u32 8388607, %v6082_v5 }
 0x1ad   :  { %v4644_v26 = vsub.s32 32, %v1215_v24  ;;  %v2241_v40 = vsub.s32 32, %v4636_v53  ;;  %v2245_v16 = vsub.s32 4294967266, %v4636_v53  ;;  %v3206_v25 = vadd.s32 4294967294, %v1152_v59 }
 0x1ae   :  { %v2383_v14 = vsel %vm2381_vm8, %v2382_v7, %v2378_v31  ;;  %v1218_v1 = vshll.u32 %v6163_v42, %v1215_v24  ;;  %v1221_v20 = vshll.u32 %v6166_v46, %v1215_v24  ;;  %v1227_v51 = vshll.u32 %v6147_v29, %v1215_v24 }
 0x1af   :  { %v4648_v27 = vadd.s32 %v2383_v14, %v2379_v43  ;;  %v1219_v47 = vshrl.u32 %v6166_v46, %v4644_v26  ;;  %v1222_v54 = vshrl.u32 %v6146_v18, %v4644_v26  ;;  %v1225_v3 = vshrl.u32 %v6147_v29, %v4644_v26 }
 0x1b0   :  { %v1228_v35 = vshrl.u32 %v6141_v36, %v4644_v26  ;;  %v1209_v50 = vor.u32 8388608, %v1208_v44  ;;  %v4661_v2 = vshrl.u32 %v1213_v23, 5  ;;  %v1224_v63 = vshll.u32 %v6146_v18, %v1215_v24 }
 0x1b1   :  { %v1231_v41 = vshrl.u32 %v6142_v39, %v4644_v26  ;;  %v4666_v56 = vor.u32 %v1219_v47, %v1218_v1  ;;  %v4668_v62 = vor.u32 %v1222_v54, %v1221_v20  ;;  %v1230_v60 = vshll.u32 %v6141_v36, %v1215_v24 }
 0x1b2   :  { %v1229_v59 = vor.u32 %v1228_v35, %v1227_v51  ;;  %v2225_v31 = vadd.s32 %v4401_v55, %v4392_v21  ;;  %v2246_v7 = vadd.s32 127, %v2245_v16  ;;  %v2385_v43 = vadd.s32 536870912, %v4648_v27  ;;  %v206_v16 = vpop.f32.mrf.mxu2 }
 0x1b3   :  { %v1226_v23 = vor.u32 %v1225_v3, %v1224_v63  ;;  %v4676_v44 = vmul.f32 %v4631_v58, %v4631_v58  ;;  %v4681_v14 = vsel %vm1978_vm7, %v2098_v19, %v4527_v61  ;;  %v4686_v24 = vsel %vm1978_vm7, %v2100_v6, %v4190_v37 }
 0x1b4   :  { %6178 = vst [vmem:[#allocation40_spill] sm:$0xff] %v4686_v24  ;;  %v1232_v1 = vor.u32 %v1231_v41, %v1230_v60  ;;  %v4688_v21 = vmul.f32 %v1011_v22, %v1009_v17  ;;  %v2243_v55 = vshrl.u32 %v2225_v31, %v2241_v40  ;;  %vm1233_vm9 = vcmp.lt.s32.totalorder %v4661_v2, 1 }
 0x1b5   :  { %6177 = vst [vmem:[#allocation39_spill] sm:$0xff] %v4676_v44  ;;  %vm1236_vm10 = vcmp.lt.s32.totalorder %v4661_v2, 4  ;;  %vm3207_vm11 = vcmp.lt.s32.totalorder %v3206_v25, 0  ;;  %v1241_v61 = vsel %vm1233_vm9, %v4666_v56, %v4668_v62  ;;  %v4698_v37 = vshll.u32 %v1209_v50, 8 }
 0x1b6   :  { %v1242_v19 = vsel %vm1236_vm10, %v1229_v59, 920167782  ;;  %v2247_v6 = vshll.u32 %v2246_v7, 23  ;;  %v4700_v22 = vshrl.u32 %v2385_v43, 30  ;;  %vm1235_vm12 = vcmp.lt.s32.totalorder %v4661_v2, 3 }
 0x1b7   :  { %v1245_v17 = vsel %vm1233_vm9, %v4668_v62, %v1226_v23  ;;  %vm1234_vm14 = vcmp.lt.s32.totalorder %v4661_v2, 2  ;;  %v1243_v40 = vsel %vm1235_vm12, %v1226_v23, %v1242_v19  ;;  %v1246_v47 = vsel %vm1236_vm10, %v1232_v1, 1326507024 }
 0x1b8   :  { %v528_v20 = vmul.f32 2.0, %v206_v16  ;;  %v2242_v54 = vshll.u32 %v4523_v38, %v4636_v53  ;;  %v4713_v3 = vsel %vm3207_vm11, 0, %v3206_v25  ;;  %v1244_v51 = vsel %vm1234_vm14, %v1241_v61, %v1243_v40 }
 0x1b9   :  { %v1247_v35 = vsel %vm1235_vm12, %v1229_v59, %v1246_v47  ;;  %v1250_v63 = vand.u32 65535, %v4698_v37  ;;  %v1274_v41 = vand.u32 65535, %v1244_v51  ;;  %v1275_v60 = vshrl.u32 %v1244_v51, 16 }
 0x1ba   :  { %v1248_v50 = vsel %vm1234_vm14, %v1245_v17, %v1247_v35  ;;  %v2387_v31 = vshll.u32 %v4700_v22, 30  ;;  %v1251_v7 = vshrl.u32 %v4698_v37, 16  ;;  %v4724_v25 = vor.u32 %v2243_v55, %v2242_v54 }
 0x1bb   :  { %v1252_v38 = vand.u32 65535, %v1248_v50  ;;  %v1253_v53 = vshrl.u32 %v1248_v50, 16  ;;  %v4726_v43 = vor.u32 4788187, %v2247_v6  ;;  %v1277_v1 = vmul.u32 %v1275_v60, %v1250_v63 }
 0x1bc   :  { %v544_v59 = vsub.f32 %v4347_v8, %v528_v20  ;;  %v1140_v16 = vadd.s32 %v4537_v57, %v4533_v49  ;;  %v1156_v61 = vsub.s32 32, %v4713_v3  ;;  %v1160_v40 = vsub.s32 4294967266, %v4713_v3  ;;  %v185_v20 = vpop.f32.mrf.mxu0 }
 0x1bd   :  { %v1255_v19 = vmul.u32 %v1253_v53, %v1250_v63  ;;  %v1256_v17 = vmul.u32 %v1252_v38, %v1251_v7  ;;  %v1276_v47 = vmul.u32 %v1274_v41, %v1250_v63  ;;  %v1278_v51 = vmul.u32 %v1274_v41, %v1251_v7 }
 0x1be   :  { %v1280_v35 = vshll.u32 %v1277_v1, 16  ;;  %v4734_v55 = vsub.s32 %v4648_v27, %v2387_v31  ;;  %v1238_v6 = vsel %vm1236_vm10, %v1226_v23, 2102212464  ;;  %v1254_v54 = vmul.u32 %v1252_v38, %v1250_v63 }
 0x1bf   :  { %v1258_v8 = vshll.u32 %v1255_v19, 16  ;;  %v1257_v50 = vmul.u32 %v1253_v53, %v1251_v7  ;;  %v1279_v49 = vmul.u32 %v1275_v60, %v1251_v7  ;;  %v560_v57 = vmax.f32 %v544_v59, 0.0 }
 0x1c0   :  { %vm1284_vm0 = vc.u32 %v1276_v47, %v1280_v35  ;;  %v1260_v5 = vshll.u32 %v1256_v17, 16  ;;  %v1217_v41 = vshrl.u32 %v6163_v42, %v4644_v26  ;;  %v1282_v31 = vshll.u32 %v1278_v51, 16 }
 0x1c1   :  { %vm1262_vm1 = vc.u32 %v1254_v54, %v1258_v8  ;;  %v1264_v58 = vadd.s32 %v1258_v8, %v1254_v54  ;;  %v1285_v24 = vsel %vm1284_vm0, 1, %v6152_v9  ;;  %v521_v32 = vmul.f32 2.0, %v185_v20 }
 0x1c2   :  { %v1263_v27 = vsel %vm1262_vm1, 1, %v6152_v9  ;;  %v6179_v23 = vand.u32 2147483647, %v3905_v52  ;;  %v6180_v63 = vmov 0  ;;  %v1286_v7 = vadd.s32 %v1280_v35, %v1276_v47 }
 0x1c3   :  { %v1265_v60 = vadd.s32 %v1263_v27, %v1257_v50  ;;  %vm1266_vm4 = vc.u32 %v1264_v58, %v1260_v5  ;;  %v1287_v38 = vadd.s32 %v1285_v24, %v1279_v49  ;;  %vm893_vm5 = vcmp.lt.s32.totalorder %v4009_v48, 0 }
 0x1c4   :  { %vm4744_vm2 = vcmp.le.f32.partialorder %v6179_v23, 0.7853982  ;;  %v1237_v26 = vsel %vm1233_vm9, %v1217_v41, %v4666_v56  ;;  %v1239_v53 = vsel %vm1235_vm12, %v4668_v62, %v1238_v6  ;;  %v1267_v59 = vsel %vm1266_vm4, 1, %v6152_v9 }
 0x1c5   :  { %v6181_v63 = vsel %vm4744_vm2, 4294967295, %v6180_v63  ;;  %v4757_v54 = vmul.f32 %v3631_v11, %v560_v57  ;;  %vm2389_vm6 = vcmp.lt.s32.totalorder %v4734_v55, 0  ;;  %v1259_v5 = vshrl.u32 %v1255_v19, 16 }
 0x1c6   :  { %6182 = vst [vmem:[#allocation41_spill] sm:$0xff] %v6181_v63  ;;  %v1269_v58 = vadd.s32 %v1267_v59, %v1265_v60  ;;  %vm1288_vm7 = vc.u32 %v1286_v7, %v1282_v31  ;;  %v2390_v24 = vsub.s32 0, %v4734_v55  ;;  %v1281_v47 = vshrl.u32 %v1277_v1, 16 }
 0x1c7   :  { %6183 = vst [vmem:[#allocation42_spill] sm:$0xff] %v4757_v54  ;;  %v1289_v35 = vsel %vm1288_vm7, 1, %v6152_v9  ;;  %v537_v56 = vsub.f32 %v3947_v45, %v521_v32  ;;  %v1261_v8 = vshrl.u32 %v1256_v17, 16  ;;  %v2444_v6 = vand.u32 2139095040, %v4757_v54 }
 0x1c8   :  { %v1270_v20 = vadd.s32 %v1269_v58, %v1259_v5  ;;  %v1291_v62 = vadd.s32 %v1289_v35, %v1287_v38  ;;  %v6184_v50 = vand.u32 2147483647, %v4009_v48  ;;  %v6185_v49 = vmov 0 }
 0x1c9   :  { %v1013_v19 = vxor.u32 2147483648, %v4688_v21  ;;  %v2249_v57 = vand.u32 2147483647, %v4726_v43  ;;  %v2251_v1 = vcvt.s32.f32 %v4724_v25  ;;  %v1158_v41 = vshrl.u32 %v1140_v16, %v1156_v61 }
 0x1ca   :  { %vm4766_vm8 = vcmp.le.f32.partialorder %v6184_v50, 0.7853982  ;;  %v4773_v27 = vadd.s32 %v1270_v20, %v1261_v8  ;;  %v1283_v32 = vshrl.u32 %v1278_v51, 16  ;;  %v1292_v45 = vadd.s32 %v1291_v62, %v1281_v47 }
 0x1cb   :  { %v6186_v49 = vsel %vm4766_vm8, 4294967295, %v6185_v49  ;;  %v2445_v17 = vshrl.u32 %v2444_v6, 23  ;;  %v1161_v23 = vadd.s32 127, %v1160_v40  ;;  %v2391_v60 = vsel %vm2389_vm6, %v2390_v24, %v4734_v55  ;;  %v469_v24 = vpop.permute.xlu1 %468  ;;  %v3326_v6 = vld [vmem:[%s6042_s2] ss:$0 sm:$0xff]  ;;  %s5661_s2 = sld [smem:[#allocation4 + $0x1]] }
 0x1cc   :  { %6187 = vst [vmem:[#allocation43_spill] sm:$0xff] %v6186_v49  ;;  %v1240_v38 = vsel %vm1234_vm14, %v1237_v26, %v1239_v53  ;;  %v4780_v59 = vadd.s32 %v1286_v7, %v1282_v31  ;;  %v1293_v5 = vadd.s32 %v1292_v45, %v1283_v32  ;;  %v6086_v43 = vand.u32 2147483647, %v4757_v54 }
 0x1cd   :  { %v3232_v25 = vadd.s32 4294967169, %v2445_v17  ;;  %v553_v16 = vmax.f32 %v537_v56, 0.0  ;;  %v4787_v61 = vsel %vm4744_vm2, %v3905_v52, %v4681_v14  ;;  %v1015_v40 = vsub.s32 4, %v4334_v34  ;;  %v474_v14 = vpop.permute.xlu2 %473 }
 0x1ce   :  { %6188 = vst [vmem:[#allocation44_spill] sm:$0xff] %v4787_v61  ;;  %v1157_v51 = vshll.u32 %v4598_v0, %v4713_v3  ;;  %vm1296_vm9 = vc.u32 %v4773_v27, %v4780_v59  ;;  %v1014_v2 = vsel %vm893_vm5, %v1013_v19, %v4688_v21  ;;  %v4797_v31 = vmul.f32 %v2251_v1, %v2249_v57 }
 0x1cf   :  { %v1297_v7 = vadd.s32 1, %v1293_v5  ;;  %v2451_v26 = vadd.s32 1, %v3232_v25  ;;  %v1162_v58 = vshll.u32 %v1161_v23, 23  ;;  %v2392_v47 = vclz %v2391_v60 }
 0x1d0   :  { %v1159_v53 = vor.u32 %v1158_v41, %v1157_v51  ;;  %v1294_v35 = vmul.u32 %v4698_v37, %v1240_v38  ;;  %v2448_v0 = vand.u32 8388607, %v6086_v43  ;;  %v4803_v3 = vmul.f32 %v3631_v11, %v553_v16 }
 0x1d1   :  { %v1298_v56 = vsel %vm1296_vm9, %v1297_v7, %v1293_v5  ;;  %vm2452_vm10 = vcmp.gt.s32.totalorder %v2451_v26, 0  ;;  %v4807_v21 = vmul.f32 %v4787_v61, %v4787_v61  ;;  %v4812_v8 = vsel %vm893_vm5, %v1015_v40, %v4334_v34 }
 0x1d2   :  { %6189 = vst [vmem:[#allocation45_spill] sm:$0xff] %v4803_v3  ;;  %v1299_v20 = vadd.s32 %v1298_v56, %v1294_v35  ;;  %v2453_v62 = vsel %vm2452_vm10, %v2451_v26, 0  ;;  %v4817_v37 = vsel %vm4766_vm8, %v4009_v48, %v1014_v2  ;;  %v4822_v50 = vadd.f32 %v3326_v6, %v474_v14 }
 0x1d3   :  { %6190 = vst [vmem:[#allocation46_spill] sm:$0xff] %v4807_v21  ;;  %v4824_v19 = vadd.f32 %v3326_v6, %v469_v24  ;;  %v2455_v57 = vand.u32 31, %v2453_v62  ;;  %v1163_v34 = vor.u32 4788187, %v1162_v58  ;;  %v1166_v41 = vcvt.s32.f32 %v1159_v53 }
 0x1d4   :  { %6191 = vst [vmem:[#allocation47_spill] sm:$0xff] %v4812_v8  ;;  %v1300_v32 = vadd.s32 536870912, %v1299_v20  ;;  %v3230_v45 = vadd.s32 4294967294, %v2392_v47  ;;  %v2449_v17 = vor.u32 8388608, %v2448_v0  ;;  %v1359_v60 = vand.u32 2139095040, %v4803_v3 }
 0x1d5   :  { %6192 = vst [vmem:[#allocation48_spill] sm:$0xff] %v4817_v37  ;;  %v2456_v23 = vsub.s32 32, %v2455_v57  ;;  %v4830_v5 = vshrl.u32 %v2453_v62, 5  ;;  %v2458_v25 = vshll.u32 %v6163_v42, %v2455_v57  ;;  %v2461_v16 = vshll.u32 %v6166_v46, %v2455_v57 }
 0x1d6   :  { %v4828_v38 = vshrl.u32 %v1300_v32, 30  ;;  %v2464_v2 = vshll.u32 %v6146_v18, %v2455_v57  ;;  %v2467_v26 = vshll.u32 %v6147_v29, %v2455_v57  ;;  %v2470_v58 = vshll.u32 %v6141_v36, %v2455_v57 }
 0x1d7   :  { %v2459_v40 = vshrl.u32 %v6166_v46, %v2456_v23  ;;  %v2462_v51 = vshrl.u32 %v6146_v18, %v2456_v23  ;;  %v2465_v7 = vshrl.u32 %v6147_v29, %v2456_v23  ;;  %v2468_v53 = vshrl.u32 %v6141_v36, %v2456_v23 }
 0x1d8   :  { %v2471_v14 = vshrl.u32 %v6142_v39, %v2456_v23  ;;  %v1302_v24 = vshll.u32 %v4828_v38, 30  ;;  %v1164_v0 = vand.u32 2147483647, %v1163_v34  ;;  %vm2473_vm11 = vcmp.lt.s32.totalorder %v4830_v5, 1 }
 0x1d9   :  { %v2460_v47 = vor.u32 %v2459_v40, %v2458_v25  ;;  %v2463_v35 = vor.u32 %v2462_v51, %v2461_v16  ;;  %v2466_v56 = vor.u32 %v2465_v7, %v2464_v2  ;;  %v2469_v62 = vor.u32 %v2468_v53, %v2467_v26 }
 0x1da   :  { %v2472_v6 = vor.u32 %v2471_v14, %v2470_v58  ;;  %vm3231_vm12 = vcmp.lt.s32.totalorder %v3230_v45, 0  ;;  %vm2476_vm14 = vcmp.lt.s32.totalorder %v4830_v5, 4  ;;  %v4847_v43 = vshll.u32 %v2449_v17, 8 }
 0x1db   :  { %v2481_v32 = vsel %vm2473_vm11, %v2460_v47, %v2463_v35  ;;  %vm2474_vm0 = vcmp.lt.s32.totalorder %v4830_v5, 2  ;;  %vm2475_vm1 = vcmp.lt.s32.totalorder %v4830_v5, 3  ;;  %v2482_v57 = vsel %vm2476_vm14, %v2469_v62, 920167782 }
 0x1dc   :  { %v1360_v34 = vshrl.u32 %v1359_v60, 23  ;;  %v4853_v25 = vsub.s32 %v1299_v20, %v1302_v24  ;;  %v2483_v16 = vsel %vm2475_vm1, %v2466_v56, %v2482_v57  ;;  %v2485_v40 = vsel %vm2473_vm11, %v2463_v35, %v2466_v56 }
 0x1dd   :  { %v2486_v17 = vsel %vm2476_vm14, %v2472_v6, 1326507024  ;;  %v4861_v51 = vmul.f32 %v1166_v41, %v1164_v0  ;;  %v2380_v2 = vadd.s32 %v4625_v28, %v4623_v15  ;;  %v2484_v7 = vsel %vm2474_vm0, %v2481_v32, %v2483_v16 }
 0x1de   :  { %v2487_v20 = vsel %vm2475_vm1, %v2469_v62, %v2486_v17  ;;  %v2490_v26 = vand.u32 65535, %v4847_v43  ;;  %v2514_v53 = vand.u32 65535, %v2484_v7  ;;  %v2515_v58 = vshrl.u32 %v2484_v7, 16 }
 0x1df   :  { %v2488_v60 = vsel %vm2474_vm0, %v2485_v40, %v2487_v20  ;;  %v4873_v14 = vsel %vm3231_vm12, 0, %v3230_v45  ;;  %v2491_v41 = vshrl.u32 %v4847_v43, 16  ;;  %v1305_v28 = vsub.s32 0, %v4853_v25 }
 0x1e0   :  { %v2492_v24 = vand.u32 65535, %v2488_v60  ;;  %v2493_v15 = vshrl.u32 %v2488_v60, 16  ;;  %v2457_v0 = vshrl.u32 %v6163_v42, %v2456_v23  ;;  %v2517_v6 = vmul.u32 %v2515_v58, %v2490_v26 }
 0x1e1   :  { %v3211_v62 = vadd.s32 4294967169, %v1360_v34  ;;  %vm1304_vm4 = vcmp.lt.s32.totalorder %v4853_v25, 0  ;;  %v2478_v32 = vsel %vm2476_vm14, %v2466_v56, 2102212464  ;;  %v2396_v45 = vsub.s32 32, %v4873_v14 }
 0x1e2   :  { %v2495_v57 = vmul.u32 %v2493_v15, %v2490_v26  ;;  %v2496_v16 = vmul.u32 %v2492_v24, %v2491_v41  ;;  %v2518_v17 = vmul.u32 %v2514_v53, %v2491_v41  ;;  %v2520_v7 = vshll.u32 %v2517_v6, 16 }
 0x1e3   :  { %v2477_v20 = vsel %vm2473_vm11, %v2457_v0, %v2460_v47  ;;  %v2494_v23 = vmul.u32 %v2492_v24, %v2490_v26  ;;  %v6095_v34 = vand.u32 2147483647, %v4803_v3  ;;  %v1306_v1 = vsel %vm1304_vm4, %v1305_v28, %v4853_v25 }
 0x1e4   :  { %v2498_v60 = vshll.u32 %v2495_v57, 16  ;;  %v2479_v56 = vsel %vm2475_vm1, %v2463_v35, %v2478_v32  ;;  %v2516_v48 = vmul.u32 %v2514_v53, %v2490_v26  ;;  %v1366_v61 = vadd.s32 1, %v3211_v62 }
 0x1e5   :  { %v2497_v52 = vmul.u32 %v2493_v15, %v2491_v41  ;;  %v2500_v49 = vshll.u32 %v2496_v16, 16  ;;  %v2519_v63 = vmul.u32 %v2515_v58, %v2491_v41  ;;  %v2522_v21 = vshll.u32 %v2518_v17, 16 }
 0x1e6   :  { %vm2502_vm5 = vc.u32 %v2494_v23, %v2498_v60  ;;  %v2504_v40 = vadd.s32 %v2498_v60, %v2494_v23  ;;  %vm2524_vm6 = vc.u32 %v2516_v48, %v2520_v7  ;;  %v2526_v0 = vadd.s32 %v2520_v7, %v2516_v48 }
 0x1e7   :  { %v2503_v8 = vsel %vm2502_vm5, 1, %v6152_v9  ;;  %v2525_v24 = vsel %vm2524_vm6, 1, %v6152_v9  ;;  %v2480_v28 = vsel %vm2474_vm0, %v2477_v20, %v2479_v56  ;;  %v1363_v53 = vand.u32 8388607, %v6095_v34 }
 0x1e8   :  { %v2505_v47 = vadd.s32 %v2503_v8, %v2497_v52  ;;  %vm2506_vm7 = vc.u32 %v2504_v40, %v2500_v49  ;;  %v2527_v26 = vadd.s32 %v2525_v24, %v2519_v63  ;;  %v2499_v15 = vshrl.u32 %v2495_v57, 16 }
 0x1e9   :  { %v2507_v35 = vsel %vm2506_vm7, 1, %v6152_v9  ;;  %vm2528_vm9 = vc.u32 %v2526_v0, %v2522_v21  ;;  %vm1367_vm10 = vcmp.gt.s32.totalorder %v1366_v61, 0  ;;  %v1307_v58 = vclz %v1306_v1 }
 0x1ea   :  { %v2509_v62 = vadd.s32 %v2507_v35, %v2505_v47  ;;  %v2521_v41 = vshrl.u32 %v2517_v6, 16  ;;  %v2529_v52 = vsel %vm2528_vm9, 1, %v6152_v9  ;;  %v1368_v49 = vsel %vm1367_vm10, %v1366_v61, 0 }
 0x1eb   :  { %v2501_v8 = vshrl.u32 %v2496_v16, 16  ;;  %v2531_v32 = vadd.s32 %v2529_v52, %v2527_v26  ;;  %v1370_v5 = vand.u32 31, %v1368_v49  ;;  %v2398_v40 = vshrl.u32 %v2380_v2, %v2396_v45 }
 0x1ec   :  { %v2510_v48 = vadd.s32 %v2509_v62, %v2499_v15  ;;  %v2400_v7 = vsub.s32 4294967266, %v4873_v14  ;;  %v2534_v63 = vmul.u32 %v4847_v43, %v2480_v28  ;;  %v1364_v20 = vor.u32 8388608, %v1363_v53  ;;  %v209_v53 = vpop.f32.mrf.mxu2 }
 0x1ed   :  { %v2523_v57 = vshrl.u32 %v2518_v17, 16  ;;  %v2532_v60 = vadd.s32 %v2531_v32, %v2521_v41  ;;  %v4902_v56 = vsub.s32 32, %v1370_v5  ;;  %v3209_v1 = vadd.s32 4294967294, %v1307_v58 }
 0x1ee   :  { %v4900_v23 = vadd.s32 %v2510_v48, %v2501_v8  ;;  %v4904_v6 = vadd.s32 %v2526_v0, %v2522_v21  ;;  %v4906_v61 = vshrl.u32 %v1368_v49, 5  ;;  %v1373_v16 = vshll.u32 %v6163_v42, %v1370_v5 }
 0x1ef   :  { %v2533_v47 = vadd.s32 %v2532_v60, %v2523_v57  ;;  %v1376_v2 = vshll.u32 %v6166_v46, %v1370_v5  ;;  %v1379_v45 = vshll.u32 %v6146_v18, %v1370_v5  ;;  %v1382_v43 = vshll.u32 %v6147_v29, %v1370_v5 }
 0x1f0   :  { %vm2536_vm11 = vc.u32 %v4900_v23, %v4904_v6  ;;  %v1374_v17 = vshrl.u32 %v6166_v46, %v4902_v56  ;;  %v1377_v21 = vshrl.u32 %v6146_v18, %v4902_v56  ;;  %v1380_v24 = vshrl.u32 %v6147_v29, %v4902_v56 }
 0x1f1   :  { %v2537_v0 = vadd.s32 1, %v2533_v47  ;;  %v1383_v28 = vshrl.u32 %v6141_v36, %v4902_v56  ;;  %v1385_v35 = vshll.u32 %v6141_v36, %v1370_v5  ;;  %v1386_v26 = vshrl.u32 %v6142_v39, %v4902_v56 }
 0x1f2   :  { %vm3210_vm12 = vcmp.lt.s32.totalorder %v3209_v1, 0  ;;  %v4925_v15 = vor.u32 %v1374_v17, %v1373_v16  ;;  %v4927_v62 = vor.u32 %v1377_v21, %v1376_v2  ;;  %v1381_v58 = vor.u32 %v1380_v24, %v1379_v45 }
 0x1f3   :  { %v2401_v41 = vadd.s32 127, %v2400_v7  ;;  %v2538_v52 = vsel %vm2536_vm11, %v2537_v0, %v2533_v47  ;;  %v1384_v49 = vor.u32 %v1383_v28, %v1382_v43  ;;  %v1387_v8 = vor.u32 %v1386_v26, %v1385_v35 }
 0x1f4   :  { %v6193_v48 = vshll.u32 %v4734_v55, %v4873_v14  ;;  %v2539_v5 = vadd.s32 %v2538_v52, %v2534_v63  ;;  %vm1388_vm14 = vcmp.lt.s32.totalorder %v4906_v61, 1  ;;  %v529_v57 = vmul.f32 2.0, %v209_v53 }
 0x1f5   :  { %v4935_v60 = vsel %vm3210_vm12, 0, %v3209_v1  ;;  %vm1391_vm0 = vcmp.lt.s32.totalorder %v4906_v61, 4  ;;  %v1396_v7 = vsel %vm1388_vm14, %v4925_v15, %v4927_v62  ;;  %v4942_v16 = vshll.u32 %v1364_v20, 8 }
 0x1f6   :  { %v4932_v32 = vor.u32 %v2398_v40, %v6193_v48  ;;  %v2540_v47 = vadd.s32 536870912, %v2539_v5  ;;  %vm1390_vm1 = vcmp.lt.s32.totalorder %v4906_v61, 3  ;;  %v1397_v55 = vsel %vm1391_vm0, %v1384_v49, 920167782 }
 0x1f7   :  { %v1400_v14 = vsel %vm1388_vm14, %v4927_v62, %v1381_v58  ;;  %v2402_v40 = vshll.u32 %v2401_v41, 23  ;;  %vm1389_vm4 = vcmp.lt.s32.totalorder %v4906_v61, 2  ;;  %v1398_v63 = vsel %vm1390_vm1, %v1381_v58, %v1397_v55 }
 0x1f8   :  { %v1401_v20 = vsel %vm1391_vm0, %v1387_v8, 1326507024  ;;  %v1315_v1 = vsub.s32 4294967266, %v4935_v60  ;;  %v4956_v2 = vshrl.u32 %v2540_v47, 30  ;;  %v1399_v45 = vsel %vm1389_vm4, %v1396_v7, %v1398_v63 }
 0x1f9   :  { %v1402_v43 = vsel %vm1390_vm1, %v1384_v49, %v1401_v20  ;;  %v1405_v21 = vand.u32 65535, %v4942_v16  ;;  %v1429_v24 = vand.u32 65535, %v1399_v45  ;;  %v1430_v0 = vshrl.u32 %v1399_v45, 16 }
 0x1fa   :  { %v1403_v17 = vsel %vm1389_vm4, %v1400_v14, %v1402_v43  ;;  %v545_v53 = vsub.f32 %v4824_v19, %v529_v57  ;;  %v4967_v41 = vor.u32 4788187, %v2402_v40  ;;  %v2542_v52 = vshll.u32 %v4956_v2, 30 }
 0x1fb   :  { %v1407_v35 = vand.u32 65535, %v1403_v17  ;;  %v1408_v26 = vshrl.u32 %v1403_v17, 16  ;;  %v1406_v8 = vshrl.u32 %v4942_v16, 16  ;;  %v1432_v49 = vmul.u32 %v1430_v0, %v1405_v21 }
 0x1fc   :  { %v1295_v7 = vadd.s32 %v4780_v59, %v4773_v27  ;;  %v1311_v47 = vsub.s32 32, %v4935_v60  ;;  %v1316_v14 = vadd.s32 127, %v1315_v1  ;;  %v1431_v40 = vmul.u32 %v1429_v24, %v1405_v21 }
 0x1fd   :  { %v1410_v55 = vmul.u32 %v1408_v26, %v1405_v21  ;;  %v1411_v63 = vmul.u32 %v1407_v35, %v1406_v8  ;;  %v1433_v20 = vmul.u32 %v1429_v24, %v1406_v8  ;;  %v1435_v45 = vshll.u32 %v1432_v49, 16 }
 0x1fe   :  { %v1409_v19 = vmul.u32 %v1407_v35, %v1405_v21  ;;  %v561_v43 = vmax.f32 %v545_v53, 0.0  ;;  %v4975_v17 = vsub.s32 %v2539_v5, %v2542_v52  ;;  %v1372_v34 = vshrl.u32 %v6163_v42, %v4902_v56  ;;  %v188_v53 = vpop.f32.mrf.mxu0  ;;  %v6194_v56 = vld [vmem:[#allocation22_spill] sm:$0xff] }
 0x1ff   :  { %v1413_v57 = vshll.u32 %v1410_v55, 16  ;;  %v1412_v28 = vmul.u32 %v1408_v26, %v1406_v8  ;;  %v1434_v48 = vmul.u32 %v1430_v0, %v1406_v8  ;;  %v1415_v44 = vshll.u32 %v1411_v63, 16 }
 0x200   :  { %vm1439_vm6 = vc.u32 %v1431_v40, %v1435_v45  ;;  %v1437_v1 = vshll.u32 %v1433_v20, 16  ;;  %v1441_v35 = vadd.s32 %v1435_v45, %v1431_v40  ;;  %v1393_v21 = vsel %vm1391_vm0, %v1381_v58, 2102212464 }
 0x201   :  { %vm1417_vm5 = vc.u32 %v1409_v19, %v1413_v57  ;;  %v1419_v27 = vadd.s32 %v1413_v57, %v1409_v19  ;;  %v1440_v30 = vsel %vm1439_vm6, 1, %v6152_v9  ;;  %vm2133_vm9 = vcmp.lt.s32.totalorder %v6194_v56, 0 }
 0x202   :  { %v1418_v59 = vsel %vm1417_vm5, 1, %v6152_v9  ;;  %v1442_v24 = vadd.s32 %v1440_v30, %v1434_v48  ;;  %vm2544_vm10 = vcmp.lt.s32.totalorder %v4975_v17, 0  ;;  %v2545_v0 = vsub.s32 0, %v4975_v17 }
 0x203   :  { %v1420_v5 = vadd.s32 %v1418_v59, %v1412_v28  ;;  %vm1421_vm7 = vc.u32 %v1419_v27, %v1415_v44  ;;  %vm1443_vm11 = vc.u32 %v1441_v35, %v1437_v1  ;;  %vm1048_vm12 = vcmp.lt.s32.totalorder %v4338_v12, 0 }
 0x204   :  { %v1422_v26 = vsel %vm1421_vm7, 1, %v6152_v9  ;;  %v1414_v52 = vshrl.u32 %v1410_v55, 16  ;;  %v1444_v45 = vsel %vm1443_vm11, 1, %v6152_v9  ;;  %v4990_v58 = vmul.f32 %v3631_v11, %v561_v43 }
 0x205   :  { %v1424_v8 = vadd.s32 %v1422_v26, %v1420_v5  ;;  %v1317_v30 = vshll.u32 %v1316_v14, 23  ;;  %v1436_v44 = vshrl.u32 %v1432_v49, 16  ;;  %v1446_v28 = vadd.s32 %v1444_v45, %v1442_v24 }
 0x206   :  { %v522_v48 = vmul.f32 2.0, %v188_v53  ;;  %v6195_v19 = vand.u32 2147483647, %v6194_v56  ;;  %v6196_v57 = vmov 0  ;;  %v1392_v55 = vsel %vm1388_vm14, %v1372_v34, %v4925_v15 }
 0x207   :  { %v1394_v40 = vsel %vm1390_vm1, %v4927_v62, %v1393_v21  ;;  %v1416_v43 = vshrl.u32 %v1411_v63, 16  ;;  %v1425_v27 = vadd.s32 %v1424_v8, %v1414_v52  ;;  %v6199_v49 = vand.u32 2147483647, %v4338_v12 }
 0x208   :  { %vm4994_vm0 = vcmp.le.f32.partialorder %v6195_v19, 0.7853982  ;;  %v6200_v14 = vmov 0  ;;  %v1313_v59 = vshrl.u32 %v1295_v7, %v1311_v47  ;;  %v2546_v5 = vsel %vm2544_vm10, %v2545_v0, %v4975_v17 }
 0x209   :  { %v6197_v57 = vsel %vm4994_vm0, 4294967295, %v6196_v57  ;;  %vm5006_vm5 = vcmp.le.f32.partialorder %v6199_v49, 0.7853982  ;;  %v1438_v24 = vshrl.u32 %v1433_v20, 16  ;;  %v1447_v53 = vadd.s32 %v1446_v28, %v1436_v44 }
 0x20a   :  { %6198 = vst [vmem:[#allocation49_spill] sm:$0xff] %v6197_v57  ;;  %v6201_v14 = vsel %vm5006_vm5, 4294967295, %v6200_v14  ;;  %v2404_v34 = vand.u32 2147483647, %v4967_v41  ;;  %v5014_v15 = vadd.s32 %v1425_v27, %v1416_v43  ;;  %v5016_v62 = vadd.s32 %v1441_v35, %v1437_v1  ;;  %v6203_v41 = vld [vmem:[#allocation20_spill] sm:$0xff] }
 0x20b   :  { %6202 = vst [vmem:[#allocation50_spill] sm:$0xff] %v6201_v14  ;;  %v2599_v63 = vand.u32 2139095040, %v4990_v58  ;;  %v1312_v21 = vshll.u32 %v4853_v25, %v4935_v60  ;;  %v1318_v26 = vor.u32 4788187, %v1317_v30  ;;  %v1395_v7 = vsel %vm1389_vm4, %v1392_v55, %v1394_v40 }
 0x20c   :  { %v1448_v47 = vadd.s32 %v1447_v53, %v1438_v24  ;;  %v2547_v52 = vclz %v2546_v5  ;;  %vm1451_vm14 = vc.u32 %v5014_v15, %v5016_v62  ;;  %v538_v0 = vsub.f32 %v6203_v41, %v522_v48 }
 0x20d   :  { %v2600_v20 = vshrl.u32 %v2599_v63, 23  ;;  %v5028_v1 = vmul.f32 %v4817_v37, %v4817_v37  ;;  %v2255_v35 = vsub.s32 4, %v4483_v33  ;;  %vm2288_vm1 = vcmp.lt.s32.totalorder %v4458_v10, 0 }
 0x20e   :  { %v1314_v25 = vor.u32 %v1313_v59, %v1312_v21  ;;  %v1452_v60 = vadd.s32 1, %v1448_v47  ;;  %v6204_v61 = vxor.u32 2147483648, %v4797_v31  ;;  %v6205_v45 = vcvt.s32.f32 %v4932_v32 }
 0x20f   :  { %v1449_v44 = vmul.u32 %v4942_v16, %v1395_v7  ;;  %v3235_v28 = vadd.s32 4294967169, %v2600_v20  ;;  %v6206_v48 = vxor.u32 2147483648, %v4861_v51  ;;  %v1319_v55 = vand.u32 2147483647, %v1318_v26 }
 0x210   :  { %v2254_v8 = vsel %vm2133_vm9, %v6204_v61, %v4797_v31  ;;  %v2407_v30 = vmul.f32 %v6205_v45, %v2404_v34  ;;  %v1453_v40 = vsel %vm1451_vm14, %v1452_v60, %v1448_v47  ;;  %v6098_v43 = vand.u32 2147483647, %v4990_v58 }
 0x211   :  { %v1169_v19 = vsel %vm1048_vm12, %v6206_v48, %v4861_v51  ;;  %v3233_v27 = vadd.s32 4294967294, %v2547_v52  ;;  %v1454_v49 = vadd.s32 %v1453_v40, %v1449_v44  ;;  %v2606_v59 = vadd.s32 1, %v3235_v28 }
 0x212   :  { %v554_v31 = vmax.f32 %v538_v0, 0.0  ;;  %v5049_v32 = vsel %vm4994_vm0, %v6194_v56, %v2254_v8  ;;  %v1170_v16 = vsub.s32 4, %v4574_v13  ;;  %v2410_v5 = vsub.s32 4, %v4700_v22 }
 0x213   :  { %6207 = vst [vmem:[#allocation20_spill] sm:$0xff] %v5049_v32  ;;  %v1321_v24 = vcvt.s32.f32 %v1314_v25  ;;  %v5056_v51 = vsel %vm5006_vm5, %v4338_v12, %v1169_v19  ;;  %v2408_v53 = vxor.u32 2147483648, %v2407_v30  ;;  %v1455_v34 = vadd.s32 536870912, %v1454_v49 }
 0x214   :  { %6208 = vst [vmem:[#allocation51_spill] sm:$0xff] %v5056_v51  ;;  %vm2607_vm4 = vcmp.gt.s32.totalorder %v2606_v59, 0  ;;  %v5061_v63 = vsel %vm2133_vm9, %v2255_v35, %v4483_v33  ;;  %v2603_v26 = vand.u32 8388607, %v6098_v43  ;;  %vm3234_vm6 = vcmp.lt.s32.totalorder %v3233_v27, 0 }
 0x215   :  { %6209 = vst [vmem:[#allocation52_spill] sm:$0xff] %v5061_v63  ;;  %v1322_v21 = vmul.f32 %v1321_v24, %v1319_v55  ;;  %v2608_v7 = vsel %vm2607_vm4, %v2606_v59, 0  ;;  %v5065_v47 = vshrl.u32 %v1455_v34, 30  ;;  %v5068_v20 = vmul.f32 %v3631_v11, %v554_v31 }
 0x216   :  { %v2610_v52 = vand.u32 31, %v2608_v7  ;;  %v5072_v41 = vmul.f32 %v5049_v32, %v5049_v32  ;;  %v5077_v33 = vsel %vm1048_vm12, %v1170_v16, %v4574_v13  ;;  %v5081_v0 = vmul.f32 %v5056_v51, %v5056_v51 }
 0x217   :  { %6210 = vst [vmem:[#allocation53_spill] sm:$0xff] %v5077_v33  ;;  %vm6106_vm7 = vcmp.lt.s32.totalorder %v4562_v4, 0  ;;  %v5086_v35 = vsel %vm2288_vm1, %v2408_v53, %v2407_v30  ;;  %v5091_v25 = vsel %vm2288_vm1, %v2410_v5, %v4700_v22  ;;  %v1457_v60 = vshll.u32 %v5065_v47, 30 }
 0x218   :  { %6211 = vst [vmem:[#allocation54_spill] sm:$0xff] %v5081_v0  ;;  %v2611_v61 = vsub.s32 32, %v2610_v52  ;;  %v1323_v13 = vxor.u32 2147483648, %v1322_v21  ;;  %v2535_v8 = vadd.s32 %v4904_v6, %v4900_v23  ;;  %v2550_v45 = vsel %vm3234_vm6, 0, %v3233_v27 }
 0x219   :  { %6212 = vst [vmem:[#allocation55_spill] sm:$0xff] %v5091_v25  ;;  %v2604_v44 = vor.u32 8388608, %v2603_v26  ;;  %v5096_v28 = vshrl.u32 %v2608_v7, 5  ;;  %v2613_v48 = vshll.u32 %v6163_v42, %v2610_v52  ;;  %v2616_v30 = vshll.u32 %v6166_v46, %v2610_v52 }
 0x21a   :  { %v1514_v19 = vand.u32 2139095040, %v5068_v20  ;;  %v2614_v22 = vshrl.u32 %v6166_v46, %v2611_v61  ;;  %v2617_v55 = vshrl.u32 %v6146_v18, %v2611_v61  ;;  %v2619_v40 = vshll.u32 %v6146_v18, %v2610_v52 }
 0x21b   :  { %v2620_v59 = vshrl.u32 %v6147_v29, %v2611_v61  ;;  %v5105_v31 = vsub.s32 %v1454_v49, %v1457_v60  ;;  %v2622_v23 = vshll.u32 %v6147_v29, %v2610_v52  ;;  %v2623_v6 = vshrl.u32 %v6141_v36, %v2611_v61 }
 0x21c   :  { %v2625_v27 = vshll.u32 %v6141_v36, %v2610_v52  ;;  %v2615_v16 = vor.u32 %v2614_v22, %v2613_v48  ;;  %v2618_v5 = vor.u32 %v2617_v55, %v2616_v30  ;;  %v2626_v53 = vshrl.u32 %v6142_v39, %v2611_v61 }
 0x21d   :  { %v2621_v24 = vor.u32 %v2620_v59, %v2619_v40  ;;  %v5113_v34 = vsel %vm6106_vm7, %v1323_v13, %v1322_v21  ;;  %v2551_v26 = vsub.s32 32, %v2550_v45  ;;  %v2624_v7 = vor.u32 %v2623_v6, %v2622_v23 }
 0x21e   :  { %v1515_v43 = vshrl.u32 %v1514_v19, 23  ;;  %v2555_v49 = vsub.s32 4294967266, %v2550_v45  ;;  %v2627_v60 = vor.u32 %v2626_v53, %v2625_v27  ;;  %vm2628_vm9 = vcmp.lt.s32.totalorder %v5096_v28, 1 }
 0x21f   :  { %vm2631_vm10 = vcmp.lt.s32.totalorder %v5096_v28, 4  ;;  %vm2630_vm11 = vcmp.lt.s32.totalorder %v5096_v28, 3  ;;  %v2636_v52 = vsel %vm2628_vm9, %v2615_v16, %v2618_v5  ;;  %v5122_v30 = vshll.u32 %v2604_v44, 8 }
 0x220   :  { %v2637_v48 = vsel %vm2631_vm10, %v2624_v7, 920167782  ;;  %v1460_v21 = vsub.s32 0, %v5105_v31  ;;  %vm2629_vm12 = vcmp.lt.s32.totalorder %v5096_v28, 2  ;;  %v2640_v19 = vsel %vm2628_vm9, %v2618_v5, %v2621_v24 }
 0x221   :  { %v2638_v13 = vsel %vm2630_vm11, %v2621_v24, %v2637_v48  ;;  %vm1459_vm14 = vcmp.lt.s32.totalorder %v5105_v31, 0  ;;  %v2641_v55 = vsel %vm2631_vm10, %v2627_v60, 1326507024  ;;  %v3214_v44 = vadd.s32 4294967169, %v1515_v43 }
 0x222   :  { %v2639_v22 = vsel %vm2629_vm12, %v2636_v52, %v2638_v13  ;;  %v2553_v40 = vshrl.u32 %v2535_v8, %v2551_v26  ;;  %v2642_v59 = vsel %vm2630_vm11, %v2624_v7, %v2641_v55  ;;  %v2552_v27 = vshll.u32 %v4975_v17, %v2550_v45 }
 0x223   :  { %v2669_v23 = vand.u32 65535, %v2639_v22  ;;  %v2670_v6 = vshrl.u32 %v2639_v22, 16  ;;  %v2556_v53 = vadd.s32 127, %v2555_v49  ;;  %v2643_v48 = vsel %vm2629_vm12, %v2640_v19, %v2642_v59 }
 0x224   :  { %v2645_v51 = vand.u32 65535, %v5122_v30  ;;  %v5143_v52 = vadd.s32 %v5016_v62, %v5014_v15  ;;  %v1461_v43 = vsel %vm1459_vm14, %v1460_v21, %v5105_v31  ;;  %v2646_v8 = vshrl.u32 %v5122_v30, 16 }
 0x225   :  { %v2647_v26 = vand.u32 65535, %v2643_v48  ;;  %v2633_v7 = vsel %vm2631_vm10, %v2621_v24, 2102212464  ;;  %v2648_v60 = vshrl.u32 %v2643_v48, 16  ;;  %v1521_v45 = vadd.s32 1, %v3214_v44 }
 0x226   :  { %v2672_v17 = vmul.u32 %v2670_v6, %v2645_v51  ;;  %v5149_v49 = vor.u32 %v2553_v40, %v2552_v27  ;;  %v2612_v13 = vshrl.u32 %v6163_v42, %v2611_v61  ;;  %v2673_v22 = vmul.u32 %v2669_v23, %v2646_v8 }
 0x227   :  { %v2651_v19 = vmul.u32 %v2647_v26, %v2646_v8  ;;  %v2557_v55 = vshll.u32 %v2556_v53, 23  ;;  %v2650_v15 = vmul.u32 %v2648_v60, %v2645_v51  ;;  %v1462_v59 = vclz %v1461_v43 }
 0x228   :  { %v2675_v62 = vshll.u32 %v2672_v17, 16  ;;  %v2632_v12 = vsel %vm2628_vm9, %v2612_v13, %v2615_v16  ;;  %v2634_v24 = vsel %vm2630_vm11, %v2618_v5, %v2633_v7  ;;  %v2671_v48 = vmul.u32 %v2669_v23, %v2645_v51  ;;  %v212_v7 = vpop.f32.mrf.mxu2 }
 0x229   :  { %v2649_v44 = vmul.u32 %v2647_v26, %v2645_v51  ;;  %v2652_v40 = vmul.u32 %v2648_v60, %v2646_v8  ;;  %v2653_v27 = vshll.u32 %v2650_v15, 16  ;;  %vm1522_vm1 = vcmp.gt.s32.totalorder %v1521_v45, 0 }
 0x22a   :  { %v2655_v61 = vshll.u32 %v2651_v19, 16  ;;  %v2674_v25 = vmul.u32 %v2670_v6, %v2646_v8  ;;  %v2677_v32 = vshll.u32 %v2673_v22, 16  ;;  %vm2679_vm4 = vc.u32 %v2671_v48, %v2675_v62 }
 0x22b   :  { %vm2657_vm6 = vc.u32 %v2649_v44, %v2653_v27  ;;  %v2659_v53 = vadd.s32 %v2653_v27, %v2649_v44  ;;  %v2680_v21 = vsel %vm2679_vm4, 1, %v6152_v9  ;;  %v2681_v43 = vadd.s32 %v2675_v62, %v2671_v48 }
 0x22c   :  { %v2658_v56 = vsel %vm2657_vm6, 1, %v6152_v9  ;;  %v2682_v16 = vadd.s32 %v2680_v21, %v2674_v25  ;;  %v6213_v13 = vand.u32 2147483647, %v5068_v20  ;;  %v1523_v23 = vsel %vm1522_vm1, %v1521_v45, 0 }
 0x22d   :  { %v3212_v51 = vadd.s32 4294967294, %v1462_v59  ;;  %v2660_v26 = vadd.s32 %v2658_v56, %v2652_v40  ;;  %vm2661_vm9 = vc.u32 %v2659_v53, %v2655_v61  ;;  %vm2683_vm10 = vc.u32 %v2681_v43, %v2677_v32 }
 0x22e   :  { %v1518_v5 = vand.u32 8388607, %v6213_v13  ;;  %v2635_v6 = vsel %vm2629_vm12, %v2632_v12, %v2634_v24  ;;  %v2654_v8 = vshrl.u32 %v2650_v15, 16  ;;  %v2662_v60 = vsel %vm2661_vm9, 1, %v6152_v9 }
 0x22f   :  { %v2684_v62 = vsel %vm2683_vm10, 1, %v6152_v9  ;;  %v2664_v48 = vadd.s32 %v2662_v60, %v2660_v26  ;;  %v2676_v44 = vshrl.u32 %v2672_v17, 16  ;;  %v1525_v21 = vand.u32 31, %v1523_v23 }
 0x230   :  { %v2686_v25 = vadd.s32 %v2684_v62, %v2682_v16  ;;  %v5165_v27 = vor.u32 4788187, %v2557_v55  ;;  %v2656_v45 = vshrl.u32 %v2651_v19, 16  ;;  %v1519_v59 = vor.u32 8388608, %v1518_v5 }
 0x231   :  { %v5167_v56 = vmul.f32 2.0, %v212_v7  ;;  %v2665_v40 = vadd.s32 %v2664_v48, %v2654_v8  ;;  %v2678_v61 = vshrl.u32 %v2673_v22, 16  ;;  %v5169_v28 = vsub.s32 32, %v1525_v21 }
 0x232   :  { %v2687_v53 = vadd.s32 %v2686_v25, %v2676_v44  ;;  %vm3213_vm11 = vcmp.lt.s32.totalorder %v3212_v51, 0  ;;  %v5171_v12 = vadd.s32 %v2681_v43, %v2677_v32  ;;  %v2689_v15 = vmul.u32 %v5122_v30, %v2635_v6 }
 0x233   :  { %v5174_v24 = vshrl.u32 %v1523_v23, 5  ;;  %v5176_v17 = vadd.s32 %v2665_v40, %v2656_v45  ;;  %v1528_v19 = vshll.u32 %v6163_v42, %v1525_v21  ;;  %v1531_v16 = vshll.u32 %v6166_v46, %v1525_v21 }
 0x234   :  { %v2688_v55 = vadd.s32 %v2687_v53, %v2678_v61  ;;  %v1529_v22 = vshrl.u32 %v6166_v46, %v5169_v28  ;;  %v1532_v13 = vshrl.u32 %v6146_v18, %v5169_v28  ;;  %v1534_v32 = vshll.u32 %v6146_v18, %v1525_v21 }
 0x235   :  { %v1535_v30 = vshrl.u32 %v6147_v29, %v5169_v28  ;;  %vm2691_vm12 = vc.u32 %v5176_v17, %v5171_v12  ;;  %v1537_v5 = vshll.u32 %v6147_v29, %v1525_v21  ;;  %v1538_v23 = vshrl.u32 %v6141_v36, %v5169_v28 }
 0x236   :  { %v2692_v43 = vadd.s32 1, %v2688_v55  ;;  %v5192_v26 = vor.u32 %v1529_v22, %v1528_v19  ;;  %v5194_v7 = vor.u32 %v1532_v13, %v1531_v16  ;;  %vm1543_vm14 = vcmp.lt.s32.totalorder %v5174_v24, 1 }
 0x237   :  { %v5196_v6 = vor.u32 %v1535_v30, %v1534_v32  ;;  %v1539_v60 = vor.u32 %v1538_v23, %v1537_v5  ;;  %v1540_v62 = vshll.u32 %v6141_v36, %v1525_v21  ;;  %v1541_v48 = vshrl.u32 %v6142_v39, %v5169_v28 }
 0x238   :  { %v2693_v8 = vsel %vm2691_vm12, %v2692_v43, %v2688_v55  ;;  %v5203_v44 = vsel %vm3213_vm11, 0, %v3212_v51  ;;  %vm1546_vm1 = vcmp.lt.s32.totalorder %v5174_v24, 4  ;;  %v1551_v45 = vsel %vm1543_vm14, %v5192_v26, %v5194_v7 }
 0x239   :  { %v2694_v25 = vadd.s32 %v2693_v8, %v2689_v15  ;;  %v1542_v40 = vor.u32 %v1541_v48, %v1540_v62  ;;  %vm1545_vm4 = vcmp.lt.s32.totalorder %v5174_v24, 3  ;;  %v1552_v21 = vsel %vm1546_vm1, %v1539_v60, 920167782 }
 0x23a   :  { %v5213_v61 = vshll.u32 %v1519_v59, 8  ;;  %vm6107_vm6 = vcmp.lt.s32.totalorder %v5174_v24, 2  ;;  %v1553_v51 = vsel %vm1545_vm4, %v5196_v6, %v1552_v21  ;;  %v1555_v15 = vsel %vm1543_vm14, %v5194_v7, %v5196_v6 }
 0x23b   :  { %v2695_v53 = vadd.s32 536870912, %v2694_v25  ;;  %v1466_v55 = vsub.s32 32, %v5203_v44  ;;  %v1470_v19 = vsub.s32 4294967266, %v5203_v44  ;;  %v1554_v59 = vsel %vm6107_vm6, %v1551_v45, %v1553_v51 }
 0x23c   :  { %v1556_v16 = vsel %vm1546_vm1, %v1542_v40, 1326507024  ;;  %v1584_v32 = vand.u32 65535, %v1554_v59  ;;  %v1585_v30 = vshrl.u32 %v1554_v59, 16  ;;  %v1560_v23 = vand.u32 65535, %v5213_v61 }
 0x23d   :  { %v5229_v22 = vshrl.u32 %v2695_v53, 30  ;;  %v1557_v13 = vsel %vm1545_vm4, %v1539_v60, %v1556_v16  ;;  %v546_v8 = vsub.f32 %v4822_v50, %v5167_v56  ;;  %v1561_v48 = vshrl.u32 %v5213_v61, 16 }
 0x23e   :  { %v1558_v5 = vsel %vm6107_vm6, %v1555_v15, %v1557_v13  ;;  %v2559_v60 = vand.u32 2147483647, %v5165_v27  ;;  %v1467_v21 = vshll.u32 %v5105_v31, %v5203_v44  ;;  %v1471_v53 = vadd.s32 127, %v1470_v19 }
 0x23f   :  { %v2697_v62 = vshll.u32 %v5229_v22, 30  ;;  %v1562_v45 = vand.u32 65535, %v1558_v5  ;;  %v1563_v40 = vshrl.u32 %v1558_v5, 16  ;;  %v1587_v51 = vmul.u32 %v1585_v30, %v1560_v23 }
 0x240   :  { %v1468_v15 = vshrl.u32 %v5143_v52, %v1466_v55  ;;  %v1588_v13 = vmul.u32 %v1584_v32, %v1561_v48  ;;  %v1586_v56 = vmul.u32 %v1584_v32, %v1560_v23  ;;  %v562_v0 = vmax.f32 %v546_v8, 0.0 }
 0x241   :  { %v5245_v59 = vsub.s32 %v2694_v25, %v2697_v62  ;;  %v1565_v16 = vmul.u32 %v1563_v40, %v1560_v23  ;;  %v1566_v50 = vmul.u32 %v1562_v45, %v1561_v48  ;;  %v1590_v43 = vshll.u32 %v1587_v51, 16 }
 0x242   :  { %v1564_v27 = vmul.u32 %v1562_v45, %v1560_v23  ;;  %v1472_v33 = vshll.u32 %v1471_v53, 23  ;;  %v1567_v31 = vmul.u32 %v1563_v40, %v1561_v48  ;;  %v1589_v19 = vmul.u32 %v1585_v30, %v1561_v48 }
 0x243   :  { %vm2699_vm9 = vcmp.lt.s32.totalorder %v5245_v59, 0  ;;  %v2700_v5 = vsub.s32 0, %v5245_v59  ;;  %v1568_v14 = vshll.u32 %v1565_v16, 16  ;;  %v1570_v44 = vshll.u32 %v1566_v50, 16 }
 0x244   :  { %v1592_v25 = vshll.u32 %v1588_v13, 16  ;;  %vm1594_vm11 = vc.u32 %v1586_v56, %v1590_v43  ;;  %v6214_v55 = vand.u32 2147483647, %v4458_v10  ;;  %v6215_v32 = vmov 0 }
 0x245   :  { %vm1572_vm10 = vc.u32 %v1564_v27, %v1568_v14  ;;  %v1574_v52 = vadd.s32 %v1568_v14, %v1564_v27  ;;  %v2701_v8 = vsel %vm2699_vm9, %v2700_v5, %v5245_v59  ;;  %v1595_v23 = vsel %vm1594_vm11, 1, %v6152_v9 }
 0x246   :  { %vm5251_vm12 = vcmp.le.f32.partialorder %v6214_v55, 0.7853982  ;;  %v1573_v62 = vsel %vm1572_vm10, 1, %v6152_v9  ;;  %v1596_v45 = vadd.s32 %v1590_v43, %v1586_v56  ;;  %v1597_v30 = vadd.s32 %v1595_v23, %v1589_v19  ;;  %v191_v19 = vpop.f32.mrf.mxu0 }
 0x247   :  { %v6216_v32 = vsel %vm5251_vm12, 4294967295, %v6215_v32  ;;  %v1575_v40 = vadd.s32 %v1573_v62, %v1567_v31  ;;  %vm1576_vm7 = vc.u32 %v1574_v52, %v1570_v44  ;;  %v5259_v14 = vmul.f32 %v3631_v11, %v562_v0 }
 0x248   :  { %6217 = vst [vmem:[#allocation56_spill] sm:$0xff] %v6216_v32  ;;  %v6218_v48 = vand.u32 2147483647, %v4562_v4  ;;  %v6219_v53 = vmov 0  ;;  %v1527_v5 = vshrl.u32 %v6163_v42, %v5169_v28  ;;  %v1548_v27 = vsel %vm1546_vm1, %v5196_v6, 2102212464 }
 0x249   :  { %v1577_v43 = vsel %vm1576_vm7, 1, %v6152_v9  ;;  %vm1598_vm9 = vc.u32 %v1596_v45, %v1592_v25  ;;  %v2702_v56 = vclz %v2701_v8  ;;  %v1569_v31 = vshrl.u32 %v1565_v16, 16 }
 0x24a   :  { %vm5263_vm6 = vcmp.le.f32.partialorder %v6218_v48, 0.7853982  ;;  %v1579_v0 = vadd.s32 %v1577_v43, %v1575_v40  ;;  %v1599_v44 = vsel %vm1598_vm9, 1, %v6152_v9  ;;  %v1473_v52 = vor.u32 4788187, %v1472_v33 }
 0x24b   :  { %v6220_v53 = vsel %vm5263_vm6, 4294967295, %v6219_v53  ;;  %v1591_v55 = vshrl.u32 %v1587_v51, 16  ;;  %v1601_v62 = vadd.s32 %v1599_v44, %v1597_v30  ;;  %v2754_v23 = vand.u32 2139095040, %v5259_v14 }
 0x24c   :  { %6221 = vst [vmem:[#allocation57_spill] sm:$0xff] %v6220_v53  ;;  %v1547_v28 = vsel %vm1543_vm14, %v1527_v5, %v5192_v26  ;;  %v1549_v6 = vsel %vm1545_vm4, %v5194_v7, %v1548_v27  ;;  %v1571_v48 = vshrl.u32 %v1566_v50, 16  ;;  %v1580_v8 = vadd.s32 %v1579_v0, %v1569_v31 }
 0x24d   :  { %v1469_v16 = vor.u32 %v1468_v15, %v1467_v21  ;;  %v1593_v40 = vshrl.u32 %v1588_v13, 16  ;;  %v1602_v43 = vadd.s32 %v1601_v62, %v1591_v55  ;;  %v523_v37 = vmul.f32 2.0, %v191_v19 }
 0x24e   :  { %v3236_v57 = vadd.s32 4294967294, %v2702_v56  ;;  %v5281_v33 = vadd.s32 %v1580_v8, %v1571_v48  ;;  %v5283_v51 = vadd.s32 %v1596_v45, %v1592_v25  ;;  %v2755_v30 = vshrl.u32 %v2754_v23, 23  ;;  %v6225_v25 = vld [vmem:[#allocation24_spill] sm:$0xff] }
 0x24f   :  { %v6222_v44 = vcvt.s32.f32 %v5149_v49  ;;  %v1474_v26 = vand.u32 2147483647, %v1473_v52  ;;  %vm6223_vm7 = vcmp.lt.s32.totalorder %v5174_v24, 2  ;;  %v1603_v7 = vadd.s32 %v1602_v43, %v1593_v40 }
 0x250   :  { %v1550_v5 = vsel %vm6223_vm7, %v1547_v28, %v1549_v6  ;;  %v5293_v21 = vsel %vm5251_vm12, %v4458_v10, %v5086_v35  ;;  %v1325_v15 = vsub.s32 4, %v4828_v38  ;;  %vm1606_vm14 = vc.u32 %v5281_v33, %v5283_v51 }
 0x251   :  { %v2562_v63 = vmul.f32 %v6222_v44, %v2559_v60  ;;  %6224 = vst [vmem:[#allocation58_spill] sm:$0xff] %v5293_v21  ;;  %v3238_v13 = vadd.s32 4294967169, %v2755_v30  ;;  %v1476_v50 = vcvt.s32.f32 %v1469_v16  ;;  %v1607_v49 = vadd.s32 1, %v1603_v7 }
 0x252   :  { %v6110_v60 = vand.u32 2147483647, %v5259_v14  ;;  %v539_v24 = vsub.f32 %v6225_v25, %v523_v37  ;;  %v5304_v45 = vsel %vm5263_vm6, %v4562_v4, %v5113_v34  ;;  %vm3237_vm1 = vcmp.lt.s32.totalorder %v3236_v57, 0 }
 0x253   :  { %6226 = vst [vmem:[#allocation24_spill] sm:$0xff] %v5304_v45  ;;  %v1604_v35 = vmul.u32 %v5213_v61, %v1550_v5  ;;  %v2761_v27 = vadd.s32 1, %v3238_v13  ;;  %v2563_v56 = vxor.u32 2147483648, %v2562_v63  ;;  %v2565_v31 = vsub.s32 4, %v4956_v2 }
 0x254   :  { %v5308_v0 = vmul.f32 %v1476_v50, %v1474_v26  ;;  %v1608_v19 = vsel %vm1606_vm14, %v1607_v49, %v1603_v7  ;;  %v5312_v52 = vmul.f32 %v5293_v21, %v5293_v21  ;;  %vm2443_vm4 = vcmp.lt.s32.totalorder %v4757_v54, 0 }
 0x255   :  { %v1609_v37 = vadd.s32 %v1608_v19, %v1604_v35  ;;  %vm2762_vm10 = vcmp.gt.s32.totalorder %v2761_v27, 0  ;;  %v5315_v34 = vsel %vm3237_vm1, 0, %v3236_v57  ;;  %v2758_v61 = vand.u32 8388607, %v6110_v60 }
 0x256   :  { %v2763_v55 = vsel %vm2762_vm10, %v2761_v27, 0  ;;  %v555_v62 = vmax.f32 %v539_v24, 0.0  ;;  %vm6227_vm11 = vcmp.lt.s32.totalorder %v4562_v4, 0  ;;  %v5326_v28 = vmul.f32 %v5304_v45, %v5304_v45 }
 0x257   :  { %v5322_v23 = vsel %vm6227_vm11, %v1325_v15, %v4828_v38  ;;  %v1610_v6 = vadd.s32 536870912, %v1609_v37  ;;  %v2765_v48 = vand.u32 31, %v2763_v55  ;;  %v5328_v8 = vsel %vm2443_vm4, %v2563_v56, %v2562_v63 }
 0x258   :  { %6228 = vst [vmem:[#allocation59_spill] sm:$0xff] %v5322_v23  ;;  %v5331_v57 = vsel %vm2443_vm4, %v2565_v31, %v4956_v2  ;;  %v2706_v43 = vsub.s32 32, %v5315_v34  ;;  %v2710_v38 = vsub.s32 4294967266, %v5315_v34  ;;  %v2759_v26 = vor.u32 8388608, %v2758_v61 }
 0x259   :  { %6229 = vst [vmem:[#allocation60_spill] sm:$0xff] %v5326_v28  ;;  %v5337_v30 = vshrl.u32 %v1610_v6, 30  ;;  %v2766_v44 = vsub.s32 32, %v2765_v48  ;;  %v5339_v5 = vshrl.u32 %v2763_v55, 5  ;;  %v2768_v63 = vshll.u32 %v6163_v42, %v2765_v48 }
 0x25a   :  { %6230 = vst [vmem:[#allocation61_spill] sm:$0xff] %v5331_v57  ;;  %v5343_v7 = vmul.f32 %v3631_v11, %v555_v62  ;;  %v2771_v13 = vshll.u32 %v6166_v46, %v2765_v48  ;;  %v2774_v50 = vshll.u32 %v6146_v18, %v2765_v48  ;;  %v2777_v24 = vshll.u32 %v6147_v29, %v2765_v48 }
 0x25b   :  { %v1612_v2 = vshll.u32 %v5337_v30, 30  ;;  %v2769_v15 = vshrl.u32 %v6166_v46, %v2766_v44  ;;  %v2772_v49 = vshrl.u32 %v6146_v18, %v2766_v44  ;;  %v2775_v25 = vshrl.u32 %v6147_v29, %v2766_v44 }
 0x25c   :  { %v2778_v35 = vshrl.u32 %v6141_v36, %v2766_v44  ;;  %v2690_v27 = vadd.s32 %v5171_v12, %v5176_v17  ;;  %v2707_v56 = vshll.u32 %v5245_v59, %v5315_v34  ;;  %v6231_v61 = vand.u32 2147483647, %v4757_v54  ;;  %v215_v17 = vpop.f32.mrf.mxu2 }
 0x25d   :  { %v5357_v31 = vsub.s32 %v1609_v37, %v1612_v2  ;;  %v2770_v19 = vor.u32 %v2769_v15, %v2768_v63  ;;  %v6232_v55 = vmov 0  ;;  %vm6120_vm7 = vcmp.lt.s32.totalorder %v4803_v3, 0 }
 0x25e   :  { %vm5361_vm9 = vcmp.le.f32.partialorder %v6231_v61, 0.7853982  ;;  %v5366_v62 = vor.u32 %v2772_v49, %v2771_v13  ;;  %v2776_v6 = vor.u32 %v2775_v25, %v2774_v50  ;;  %v2779_v60 = vor.u32 %v2778_v35, %v2777_v24 }
 0x25f   :  { %v6233_v55 = vsel %vm5361_vm9, 4294967295, %v6232_v55  ;;  %v1669_v12 = vand.u32 2139095040, %v5343_v7  ;;  %v2708_v40 = vshrl.u32 %v2690_v27, %v2706_v43  ;;  %v1615_v59 = vsub.s32 0, %v5357_v31 }
 0x260   :  { %6234 = vst [vmem:[#allocation62_spill] sm:$0xff] %v6233_v55  ;;  %v2780_v37 = vshll.u32 %v6141_v36, %v2765_v48  ;;  %v2781_v34 = vshrl.u32 %v6142_v39, %v2766_v44  ;;  %v2711_v63 = vadd.s32 127, %v2710_v38  ;;  %vm1614_vm14 = vcmp.lt.s32.totalorder %v5357_v31, 0 }
 0x261   :  { %vm2783_vm1 = vcmp.lt.s32.totalorder %v5339_v5, 1  ;;  %v5374_v2 = vshll.u32 %v2759_v26, 8  ;;  %vm2786_vm4 = vcmp.lt.s32.totalorder %v5339_v5, 4  ;;  %v531_v13 = vmul.f32 2.0, %v215_v17 }
 0x262   :  { %v2782_v15 = vor.u32 %v2781_v34, %v2780_v37  ;;  %v2791_v43 = vsel %vm2783_vm1, %v2770_v19, %v5366_v62  ;;  %vm2785_vm10 = vcmp.lt.s32.totalorder %v5339_v5, 3  ;;  %v2792_v48 = vsel %vm2786_vm4, %v2779_v60, 920167782  ;;  %v6235_v37 = vld [vmem:[#allocation31_spill] sm:$0xff] }
 0x263   :  { %v2795_v38 = vsel %vm2783_vm1, %v5366_v62, %v2776_v6  ;;  %v1670_v50 = vshrl.u32 %v1669_v12, 23  ;;  %v1616_v26 = vsel %vm1614_vm14, %v1615_v59, %v5357_v31  ;;  %vm6121_vm11 = vcmp.lt.s32.totalorder %v5339_v5, 2 }
 0x264   :  { %v2793_v49 = vsel %vm2785_vm10, %v2776_v6, %v2792_v48  ;;  %v2796_v25 = vsel %vm2786_vm4, %v2782_v15, 1326507024  ;;  %v2712_v24 = vshll.u32 %v2711_v63, 23  ;;  %v2800_v61 = vand.u32 65535, %v5374_v2 }
 0x265   :  { %v2794_v35 = vsel %vm6121_vm11, %v2791_v43, %v2793_v49  ;;  %v2797_v27 = vsel %vm2785_vm10, %v2779_v60, %v2796_v25  ;;  %v547_v34 = vsub.f32 %v6235_v37, %v531_v13  ;;  %v1617_v48 = vclz %v1616_v26 }
 0x266   :  { %v2798_v12 = vsel %vm6121_vm11, %v2795_v38, %v2797_v27  ;;  %v2824_v17 = vand.u32 65535, %v2794_v35  ;;  %v2825_v59 = vshrl.u32 %v2794_v35, 16  ;;  %v2801_v16 = vshrl.u32 %v5374_v2, 16 }
 0x267   :  { %v2802_v15 = vand.u32 65535, %v2798_v12  ;;  %v2803_v63 = vshrl.u32 %v2798_v12, 16  ;;  %v5405_v43 = vsel %vm5361_vm9, %v4757_v54, %v5328_v8  ;;  %v6236_v60 = vxor.u32 2147483648, %v5308_v0 }
 0x268   :  { %v2827_v49 = vmul.u32 %v2825_v59, %v2800_v61  ;;  %v3217_v13 = vadd.s32 4294967169, %v1670_v50  ;;  %v5414_v26 = vor.u32 %v2708_v40, %v2707_v56  ;;  %v5416_v25 = vor.u32 4788187, %v2712_v24 }
 0x269   :  { %v5412_v38 = vsel %vm6120_vm7, %v6236_v60, %v5308_v0  ;;  %v2767_v35 = vshrl.u32 %v6163_v42, %v2766_v44  ;;  %v2828_v27 = vmul.u32 %v2824_v17, %v2801_v16  ;;  %v2805_v12 = vmul.u32 %v2803_v63, %v2800_v61 }
 0x26a   :  { %v2806_v37 = vmul.u32 %v2802_v15, %v2801_v16  ;;  %v6122_v8 = vand.u32 2147483647, %v5343_v7  ;;  %v563_v54 = vmax.f32 %v547_v34, 0.0  ;;  %v3215_v45 = vadd.s32 4294967294, %v1617_v48 }
 0x26b   :  { %v2787_v4 = vsel %vm2783_vm1, %v2767_v35, %v2770_v19  ;;  %v2788_v0 = vsel %vm2786_vm4, %v2776_v6, 2102212464  ;;  %v2830_v50 = vshll.u32 %v2827_v49, 16  ;;  %v2804_v40 = vmul.u32 %v2802_v15, %v2800_v61 }
 0x26c   :  { %v2808_v56 = vshll.u32 %v2805_v12, 16  ;;  %v2826_v24 = vmul.u32 %v2824_v17, %v2800_v61  ;;  %v1676_v60 = vadd.s32 1, %v3217_v13  ;;  %v2807_v21 = vmul.u32 %v2803_v63, %v2801_v16 }
 0x26d   :  { %v2810_v44 = vshll.u32 %v2806_v37, 16  ;;  %v2829_v55 = vmul.u32 %v2825_v59, %v2801_v16  ;;  %v2832_v57 = vshll.u32 %v2828_v27, 16  ;;  %vm3216_vm11 = vcmp.lt.s32.totalorder %v3215_v45, 0 }
 0x26e   :  { %vm2812_vm14 = vc.u32 %v2804_v40, %v2808_v56  ;;  %v2814_v10 = vadd.s32 %v2808_v56, %v2804_v40  ;;  %vm2834_vm7 = vc.u32 %v2826_v24, %v2830_v50  ;;  %v2836_v34 = vadd.s32 %v2830_v50, %v2826_v24 }
 0x26f   :  { %v2789_v19 = vsel %vm2785_vm10, %v5366_v62, %v2788_v0  ;;  %v2813_v6 = vsel %vm2812_vm14, 1, %v6152_v9  ;;  %v2835_v48 = vsel %vm2834_vm7, 1, %v6152_v9  ;;  %v2831_v17 = vshrl.u32 %v2827_v49, 16 }
 0x270   :  { %v2815_v15 = vadd.s32 %v2813_v6, %v2807_v21  ;;  %vm2816_vm1 = vc.u32 %v2814_v10, %v2810_v44  ;;  %v2837_v61 = vadd.s32 %v2835_v48, %v2829_v55  ;;  %vm2838_vm4 = vc.u32 %v2836_v34, %v2832_v57 }
 0x271   :  { %v2817_v16 = vsel %vm2816_vm1, 1, %v6152_v9  ;;  %v2839_v59 = vsel %vm2838_vm4, 1, %v6152_v9  ;;  %v1673_v63 = vand.u32 8388607, %v6122_v8  ;;  %v2809_v13 = vshrl.u32 %v2805_v12, 16 }
 0x272   :  { %v2819_v35 = vadd.s32 %v2817_v16, %v2815_v15  ;;  %v2841_v50 = vadd.s32 %v2839_v59, %v2837_v61  ;;  %vm1677_vm10 = vcmp.gt.s32.totalorder %v1676_v60, 0  ;;  %v5434_v62 = vsel %vm3216_vm11, 0, %v3215_v45 }
 0x273   :  { %vm6237_vm7 = vcmp.lt.s32.totalorder %v5339_v5, 2  ;;  %v2811_v21 = vshrl.u32 %v2806_v37, 16  ;;  %v1678_v55 = vsel %vm1677_vm10, %v1676_v60, 0  ;;  %v2833_v40 = vshrl.u32 %v2828_v27, 16 }
 0x274   :  { %v2790_v10 = vsel %vm6237_vm7, %v2787_v4, %v2789_v19  ;;  %v2820_v0 = vadd.s32 %v2819_v35, %v2809_v13  ;;  %v2842_v49 = vadd.s32 %v2841_v50, %v2831_v17  ;;  %v1680_v56 = vand.u32 31, %v1678_v55 }
 0x275   :  { %v5442_v12 = vadd.s32 %v5283_v51, %v5281_v33  ;;  %v5445_v45 = vmul.f32 %v3631_v11, %v563_v54  ;;  %v5449_v4 = vadd.s32 %v2836_v34, %v2832_v57  ;;  %v1625_v27 = vsub.s32 4294967266, %v5434_v62 }
 0x276   :  { %v5447_v6 = vadd.s32 %v2820_v0, %v2811_v21  ;;  %v2843_v5 = vadd.s32 %v2842_v49, %v2833_v40  ;;  %v1681_v37 = vsub.s32 32, %v1680_v56  ;;  %v2844_v60 = vmul.u32 %v5374_v2, %v2790_v10 }
 0x277   :  { %v1674_v19 = vor.u32 8388608, %v1673_v63  ;;  %v5453_v48 = vshrl.u32 %v1678_v55, 5  ;;  %v1683_v11 = vshll.u32 %v6163_v42, %v1680_v56  ;;  %v1686_v54 = vshll.u32 %v6166_v46, %v1680_v56 }
 0x278   :  { %vm2846_vm11 = vc.u32 %v5447_v6, %v5449_v4  ;;  %v2847_v33 = vadd.s32 1, %v2843_v5  ;;  %v1684_v51 = vshrl.u32 %v6166_v46, %v1681_v37  ;;  %v1687_v57 = vshrl.u32 %v6146_v18, %v1681_v37 }
 0x279   :  { %v1689_v34 = vshll.u32 %v6146_v18, %v1680_v56  ;;  %v1692_v15 = vshll.u32 %v6147_v29, %v1680_v56  ;;  %v1690_v61 = vshrl.u32 %v6147_v29, %v1681_v37  ;;  %v1693_v16 = vshrl.u32 %v6141_v36, %v1681_v37 }
 0x27a   :  { %v2848_v2 = vsel %vm2846_vm11, %v2847_v33, %v2843_v5  ;;  %v1695_v17 = vshll.u32 %v6141_v36, %v1680_v56  ;;  %v1685_v63 = vor.u32 %v1684_v51, %v1683_v11  ;;  %v1688_v13 = vor.u32 %v1687_v57, %v1686_v54 }
 0x27b   :  { %v2849_v59 = vadd.s32 %v2848_v2, %v2844_v60  ;;  %v1696_v35 = vshrl.u32 %v6142_v39, %v1681_v37  ;;  %v1691_v10 = vor.u32 %v1690_v61, %v1689_v34  ;;  %v1694_v21 = vor.u32 %v1693_v16, %v1692_v15 }
 0x27c   :  { %v5468_v55 = vshll.u32 %v1674_v19, 8  ;;  %vm1698_vm14 = vcmp.lt.s32.totalorder %v5453_v48, 1  ;;  %vm1701_vm1 = vcmp.lt.s32.totalorder %v5453_v48, 4  ;;  %v5472_v49 = vadd.s32 127, %v1625_v27 }
 0x27d   :  { %v2850_v0 = vadd.s32 536870912, %v2849_v59  ;;  %v1697_v40 = vor.u32 %v1696_v35, %v1695_v17  ;;  %vm1700_vm4 = vcmp.lt.s32.totalorder %v5453_v48, 3  ;;  %v1706_v56 = vsel %vm1698_vm14, %v1685_v63, %v1688_v13 }
 0x27e   :  { %v1707_v5 = vsel %vm1701_vm1, %v1694_v21, 920167782  ;;  %vm6124_vm10 = vcmp.lt.s32.totalorder %v5453_v48, 2  ;;  %v1710_v33 = vsel %vm1698_vm14, %v1688_v13, %v1691_v10  ;;  %v1703_v11 = vsel %vm1701_vm1, %v1691_v10, 2102212464 }
 0x27f   :  { %v5477_v60 = vshrl.u32 %v2850_v0, 30  ;;  %v1708_v19 = vsel %vm1700_vm4, %v1691_v10, %v1707_v5  ;;  %v1711_v54 = vsel %vm1701_vm1, %v1697_v40, 1326507024  ;;  %v1715_v51 = vand.u32 65535, %v5468_v55 }
 0x280   :  { %v1709_v27 = vsel %vm6124_vm10, %v1706_v56, %v1708_v19  ;;  %v1712_v34 = vsel %vm1700_vm4, %v1694_v21, %v1711_v54  ;;  %v2909_v2 = vand.u32 2139095040, %v5445_v45  ;;  %v1682_v61 = vshrl.u32 %v6163_v42, %v1681_v37 }
 0x281   :  { %v2852_v57 = vshll.u32 %v5477_v60, 30  ;;  %v1739_v15 = vand.u32 65535, %v1709_v27  ;;  %v1713_v16 = vsel %vm6124_vm10, %v1710_v33, %v1712_v34  ;;  %v1716_v17 = vshrl.u32 %v5468_v55, 16 }
 0x282   :  { %v1740_v35 = vshrl.u32 %v1709_v27, 16  ;;  %v1717_v0 = vand.u32 65535, %v1713_v16  ;;  %v1718_v40 = vshrl.u32 %v1713_v16, 16  ;;  %v1702_v21 = vsel %vm1698_vm14, %v1682_v61, %v1685_v63 }
 0x283   :  { %v5495_v10 = vsub.s32 %v2849_v59, %v2852_v57  ;;  %v1704_v5 = vsel %vm1700_vm4, %v1688_v13, %v1703_v11  ;;  %v1743_v37 = vmul.u32 %v1739_v15, %v1716_v17  ;;  %v2910_v27 = vshrl.u32 %v2909_v2, 23 }
 0x284   :  { %v1742_v19 = vmul.u32 %v1740_v35, %v1715_v51  ;;  %v1720_v54 = vmul.u32 %v1718_v40, %v1715_v51  ;;  %v1721_v59 = vmul.u32 %v1717_v0, %v1716_v17  ;;  %v1741_v57 = vmul.u32 %v1739_v15, %v1715_v51 }
 0x285   :  { %vm2854_vm7 = vcmp.lt.s32.totalorder %v5495_v10, 0  ;;  %v2855_v33 = vsub.s32 0, %v5495_v10  ;;  %v1744_v34 = vmul.u32 %v1740_v35, %v1716_v17  ;;  %v1719_v44 = vmul.u32 %v1717_v0, %v1715_v51 }
 0x286   :  { %v1745_v16 = vshll.u32 %v1742_v19, 16  ;;  %v1722_v24 = vmul.u32 %v1718_v40, %v1716_v17  ;;  %v1723_v63 = vshll.u32 %v1720_v54, 16  ;;  %v1725_v50 = vshll.u32 %v1721_v59, 16 }
 0x287   :  { %v2856_v8 = vsel %vm2854_vm7, %v2855_v33, %v5495_v10  ;;  %v1746_v13 = vshrl.u32 %v1742_v19, 16  ;;  %v1747_v11 = vshll.u32 %v1743_v37, 16  ;;  %v6238_v56 = vand.u32 2147483647, %v4803_v3 }
 0x288   :  { %v2857_v61 = vclz %v2856_v8  ;;  %v6239_v28 = vmov 0  ;;  %vm1727_vm14 = vc.u32 %v1719_v44, %v1723_v63  ;;  %v1729_v2 = vadd.s32 %v1723_v63, %v1719_v44 }
 0x289   :  { %vm5507_vm11 = vcmp.le.f32.partialorder %v6238_v56, 0.7853982  ;;  %vm1749_vm1 = vc.u32 %v1741_v57, %v1745_v16  ;;  %v1751_v15 = vadd.s32 %v1745_v16, %v1741_v57  ;;  %v1728_v33 = vsel %vm1727_vm14, 1, %v6152_v9 }
 0x28a   :  { %v6240_v28 = vsel %vm5507_vm11, 4294967295, %v6239_v28  ;;  %v3239_v35 = vadd.s32 4294967294, %v2857_v61  ;;  %v1750_v51 = vsel %vm1749_vm1, 1, %v6152_v9  ;;  %v3241_v17 = vadd.s32 4294967169, %v2910_v27 }
 0x28b   :  { %6241 = vst [vmem:[#allocation31_spill] sm:$0xff] %v6240_v28  ;;  %v1730_v8 = vadd.s32 %v1728_v33, %v1722_v24  ;;  %vm1731_vm4 = vc.u32 %v1729_v2, %v1725_v50  ;;  %v1752_v0 = vadd.s32 %v1750_v51, %v1744_v34  ;;  %vm1753_vm7 = vc.u32 %v1751_v15, %v1747_v11 }
 0x28c   :  { %vm3240_vm10 = vcmp.lt.s32.totalorder %v3239_v35, 0  ;;  %v1724_v40 = vshrl.u32 %v1720_v54, 16  ;;  %v1732_v56 = vsel %vm1731_vm4, 1, %v6152_v9  ;;  %v1754_v19 = vsel %vm1753_vm7, 1, %v6152_v9 }
 0x28d   :  { %v5515_v53 = vsel %vm3240_vm10, 0, %v3239_v35  ;;  %v1734_v44 = vadd.s32 %v1732_v56, %v1730_v8  ;;  %v1756_v57 = vadd.s32 %v1754_v19, %v1752_v0  ;;  %v6242_v16 = vand.u32 2147483647, %v5445_v45 }
 0x28e   :  { %v1622_v27 = vshll.u32 %v5357_v31, %v5434_v62  ;;  %v6243_v24 = vsub.s32 32, %v5434_v62  ;;  %v1627_v54 = vshll.u32 %v5472_v49, 23  ;;  %v2916_v34 = vadd.s32 1, %v3241_v17 }
 0x28f   :  { %v2913_v63 = vand.u32 8388607, %v6242_v16  ;;  %v1726_v61 = vshrl.u32 %v1721_v59, 16  ;;  %v1735_v2 = vadd.s32 %v1734_v44, %v1724_v40  ;;  %v1748_v33 = vshrl.u32 %v1743_v37, 16 }
 0x290   :  { %v1623_v50 = vshrl.u32 %v5442_v12, %v6243_v24  ;;  %v1757_v35 = vadd.s32 %v1756_v57, %v1746_v13  ;;  %v2865_v51 = vsub.s32 4294967266, %v5515_v53  ;;  %vm6244_vm10 = vcmp.lt.s32.totalorder %v5453_v48, 2 }
 0x291   :  { %v1705_v8 = vsel %vm6244_vm10, %v1702_v21, %v1704_v5  ;;  %v1755_v0 = vadd.s32 %v1751_v15, %v1747_v11  ;;  %vm2917_vm14 = vcmp.gt.s32.totalorder %v2916_v34, 0  ;;  %v1736_v56 = vadd.s32 %v1735_v2, %v1726_v61 }
 0x292   :  { %v1758_v31 = vadd.s32 %v1757_v35, %v1748_v33  ;;  %v2914_v19 = vor.u32 8388608, %v2913_v63  ;;  %v2918_v62 = vsel %vm2917_vm14, %v2916_v34, 0  ;;  %v6245_v12 = vsub.s32 4, %v5065_v47 }
 0x293   :  { %vm6246_vm1 = vcmp.lt.s32.totalorder %v4803_v3, 0  ;;  %v5539_v37 = vsel %vm5507_vm11, %v4803_v3, %v5412_v38  ;;  %v2920_v21 = vand.u32 31, %v2918_v62  ;;  %v6248_v5 = vand.u32 2147483647, %v5416_v25 }
 0x294   :  { %v5533_v49 = vsel %vm6246_vm1, %v6245_v12, %v5065_v47  ;;  %v6249_v59 = vcvt.s32.f32 %v5414_v26  ;;  %v5548_v11 = vor.u32 %v1623_v50, %v1622_v27  ;;  %vm1761_vm4 = vc.u32 %v1736_v56, %v1755_v0 }
 0x295   :  { %6247 = vst [vmem:[#allocation63_spill] sm:$0xff] %v5533_v49  ;;  %v1762_v47 = vadd.s32 1, %v1758_v31  ;;  %v5550_v15 = vor.u32 4788187, %v1627_v54  ;;  %v2845_v17 = vadd.s32 %v5449_v4, %v5447_v6  ;;  %v1759_v38 = vmul.u32 %v5468_v55, %v1705_v8 }
 0x296   :  { %v5546_v13 = vmul.f32 %v6249_v59, %v6248_v5  ;;  %v2921_v40 = vsub.s32 32, %v2920_v21  ;;  %v2861_v44 = vsub.s32 32, %v5515_v53  ;;  %v2866_v57 = vadd.s32 127, %v2865_v51  ;;  %v6250_v5 = vld [vmem:[#allocation23_spill] sm:$0xff] }
 0x297   :  { %v1763_v25 = vsel %vm1761_vm4, %v1762_v47, %v1758_v31  ;;  %v5556_v16 = vshll.u32 %v2914_v19, 8  ;;  %v2923_v63 = vshll.u32 %v6163_v42, %v2920_v21  ;;  %v2926_v24 = vshll.u32 %v6166_v46, %v2920_v21 }
 0x298   :  { %v1764_v26 = vadd.s32 %v1763_v25, %v1759_v38  ;;  %v2924_v27 = vshrl.u32 %v6166_v46, %v2921_v40  ;;  %v2927_v50 = vshrl.u32 %v6146_v18, %v2921_v40  ;;  %v2930_v6 = vshrl.u32 %v6147_v29, %v2921_v40 }
 0x299   :  { %v2932_v4 = vshll.u32 %v6147_v29, %v2920_v21  ;;  %v2933_v55 = vshrl.u32 %v6141_v36, %v2921_v40  ;;  %v5565_v34 = vshrl.u32 %v2918_v62, 5  ;;  %v2929_v61 = vshll.u32 %v6146_v18, %v2920_v21 }
 0x29a   :  { %v1765_v54 = vadd.s32 536870912, %v1764_v26  ;;  %v2936_v2 = vshrl.u32 %v6142_v39, %v2921_v40  ;;  %v2925_v33 = vor.u32 %v2924_v27, %v2923_v63  ;;  %v5569_v35 = vor.u32 %v2927_v50, %v2926_v24 }
 0x29b   :  { %v2934_v51 = vor.u32 %v2933_v55, %v2932_v4  ;;  %v2935_v46 = vshll.u32 %v6141_v36, %v2920_v21  ;;  %v2867_v31 = vshll.u32 %v2866_v57, 23  ;;  %v2931_v29 = vor.u32 %v2930_v6, %v2929_v61  ;;  %v6252_v36 = vld [vmem:[#allocation29_spill] sm:$0xff] }
 0x29c   :  { %v5573_v19 = vshrl.u32 %v1765_v54, 30  ;;  %v5577_v12 = vshrl.u32 %v2845_v17, %v2861_v44  ;;  %vm2938_vm7 = vcmp.lt.s32.totalorder %v5565_v34, 1  ;;  %vm2941_vm10 = vcmp.lt.s32.totalorder %v5565_v34, 4 }
 0x29d   :  { %v2937_v18 = vor.u32 %v2936_v2, %v2935_v46  ;;  %v710_v21 = vmul.f32 -0.001358992, %v6252_v36  ;;  %v1760_v38 = vadd.s32 %v1755_v0, %v1736_v56  ;;  %v2946_v57 = vsel %vm2938_vm7, %v2925_v33, %v5569_v35 }
 0x29e   :  { %v1767_v47 = vshll.u32 %v5573_v19, 30  ;;  %v2947_v17 = vsel %vm2941_vm10, %v2934_v51, 920167782  ;;  %v2955_v44 = vand.u32 65535, %v5556_v16  ;;  %v5592_v25 = vor.u32 4788187, %v2867_v31 }
 0x29f   :  { %vm2940_vm14 = vcmp.lt.s32.totalorder %v5565_v34, 3  ;;  %v2950_v27 = vsel %vm2938_vm7, %v5569_v35, %v2931_v29  ;;  %v2922_v0 = vshrl.u32 %v6163_v42, %v2921_v40  ;;  %vm6129_vm1 = vcmp.lt.s32.totalorder %v5565_v34, 2 }
 0x2a0   :  { %v1768_v63 = vsub.s32 %v1764_v26, %v1767_v47  ;;  %v2948_v56 = vsel %vm2940_vm14, %v2931_v29, %v2947_v17  ;;  %v2951_v24 = vsel %vm2941_vm10, %v2937_v18, 1326507024  ;;  %v2956_v42 = vshrl.u32 %v5556_v16, 16 }
 0x2a1   :  { %v2949_v26 = vsel %vm6129_vm1, %v2946_v57, %v2948_v56  ;;  %v2952_v6 = vsel %vm2940_vm14, %v2934_v51, %v2951_v24  ;;  %v5613_v61 = vsel %vm2938_vm7, %v2922_v0, %v2925_v33  ;;  %v2943_v18 = vsel %vm2941_vm10, %v2931_v29, 2102212464 }
 0x2a2   :  { %vm1769_vm4 = vcmp.lt.s32.totalorder %v1768_v63, 0  ;;  %v1770_v50 = vsub.s32 0, %v1768_v63  ;;  %v2953_v4 = vsel %vm6129_vm1, %v2950_v27, %v2952_v6  ;;  %v2979_v40 = vand.u32 65535, %v2949_v26 }
 0x2a3   :  { %v2980_v55 = vshrl.u32 %v2949_v26, 16  ;;  %v2957_v2 = vand.u32 65535, %v2953_v4  ;;  %v2958_v46 = vshrl.u32 %v2953_v4, 16  ;;  %v711_v27 = vadd.f32 0.041655596, %v710_v21 }
 0x2a4   :  { %v1771_v54 = vsel %vm1769_vm4, %v1770_v50, %v1768_v63  ;;  %v2983_v51 = vmul.u32 %v2979_v40, %v2956_v42  ;;  %v717_v56 = vmul.f32 -0.00019511016, %v6252_v36  ;;  %v2981_v50 = vmul.u32 %v2979_v40, %v2955_v44 }
 0x2a5   :  { %v1772_v31 = vclz %v1771_v54  ;;  %v2982_v47 = vmul.u32 %v2980_v55, %v2955_v44  ;;  %v2960_v57 = vmul.u32 %v2958_v46, %v2955_v44  ;;  %v2961_v17 = vmul.u32 %v2957_v2, %v2956_v42 }
 0x2a6   :  { %v2959_v26 = vmul.u32 %v2957_v2, %v2955_v44  ;;  %v2962_v48 = vmul.u32 %v2958_v46, %v2956_v42  ;;  %v2984_v0 = vmul.u32 %v2980_v55, %v2956_v42  ;;  %v2987_v54 = vshll.u32 %v2983_v51, 16 }
 0x2a7   :  { %v3218_v24 = vadd.s32 4294967294, %v1772_v31  ;;  %v2985_v6 = vshll.u32 %v2982_v47, 16  ;;  %v2963_v33 = vshll.u32 %v2960_v57, 16  ;;  %v2986_v8 = vshrl.u32 %v2982_v47, 16 }
 0x2a8   :  { %v2965_v4 = vshll.u32 %v2961_v17, 16  ;;  %v712_v47 = vmul.f32 %v711_v27, %v6252_v36  ;;  %v2966_v32 = vshrl.u32 %v2961_v17, 16 }
 0x2a9   :  { %vm3219_vm7 = vcmp.lt.s32.totalorder %v3218_v24, 0  ;;  %vm2989_vm4 = vc.u32 %v2981_v50, %v2985_v6  ;;  %vm2967_vm10 = vc.u32 %v2959_v26, %v2963_v33  ;;  %v2969_v62 = vadd.s32 %v2963_v33, %v2959_v26 }
 0x2aa   :  { %v1775_v29 = vsel %vm3219_vm7, 0, %v3218_v24  ;;  %v2990_v59 = vsel %vm2989_vm4, 1, %v6152_v9  ;;  %v2968_v2 = vsel %vm2967_vm10, 1, %v6152_v9  ;;  %v2991_v40 = vadd.s32 %v2985_v6, %v2981_v50 }
 0x2ab   :  { %v1776_v21 = vsub.s32 32, %v1775_v29  ;;  %v1777_v3 = vshll.u32 %v1768_v63, %v1775_v29  ;;  %v1780_v28 = vsub.s32 4294967266, %v1775_v29  ;;  %v2970_v44 = vadd.s32 %v2968_v2, %v2962_v48 }
 0x2ac   :  { %vm2971_vm1 = vc.u32 %v2969_v62, %v2965_v4  ;;  %v2992_v46 = vadd.s32 %v2990_v59, %v2984_v0  ;;  %v2964_v24 = vshrl.u32 %v2960_v57, 16  ;;  %vm2993_vm7 = vc.u32 %v2991_v40, %v2987_v54  ;;  %v6254_v0 = vld [vmem:[#allocation33_spill] sm:$0xff] }
 0x2ad   :  { %v1778_v42 = vshrl.u32 %v1760_v38, %v1776_v21  ;;  %v1781_v55 = vadd.s32 127, %v1780_v28  ;;  %v2972_v31 = vsel %vm2971_vm1, 1, %v6152_v9  ;;  %v718_v26 = vadd.f32 0.008332121, %v717_v56 }
 0x2ae   :  { %v2974_v49 = vadd.s32 %v2972_v31, %v2970_v44  ;;  %v2994_v63 = vsel %vm2993_vm7, 1, %v6152_v9  ;;  %v713_v29 = vadd.f32 -0.4999988, %v712_v47  ;;  %v2944_v28 = vsel %vm2940_vm14, %v5569_v35, %v2943_v18 }
 0x2af   :  { %v1779_v33 = vor.u32 %v1778_v42, %v1777_v3  ;;  %v1782_v23 = vshll.u32 %v1781_v55, 23  ;;  %v2996_v62 = vadd.s32 %v2994_v63, %v2992_v46  ;;  %v719_v59 = vmul.f32 %v718_v26, %v6252_v36  ;;  %v6261_v55 = vld [vmem:[#allocation28_spill] sm:$0xff] }
 0x2b0   :  { %v2975_v48 = vadd.s32 %v2974_v49, %v2964_v24  ;;  %v714_v57 = vmul.f32 %v713_v29, %v6252_v36  ;;  %v6253_v3 = vsel %vm4305_vm15, 0, %v6250_v5  ;;  %vm6132_vm1 = vcmp.lt.s32.totalorder %v5343_v7, 0 }
 0x2b1   :  { %v1783_v38 = vor.u32 4788187, %v1782_v23  ;;  %v725_v27 = vadd.s32 3, %v6253_v3  ;;  %v2988_v49 = vshrl.u32 %v2983_v51, 16  ;;  %v2997_v17 = vadd.s32 %v2996_v62, %v2986_v8 }
 0x2b2   :  { %v5633_v9 = vadd.s32 %v2975_v48, %v2966_v32  ;;  %v720_v56 = vadd.f32 -0.16666654, %v719_v59  ;;  %v1786_v23 = vcvt.s32.f32 %v1779_v33  ;;  %v5635_v6 = vadd.s32 %v2991_v40, %v2987_v54  ;;  %v6260_v40 = vld [vmem:[#allocation16_spill] sm:$0xff] }
 0x2b3   :  { %v1784_v50 = vand.u32 2147483647, %v1783_v38  ;;  %v1950_v35 = vmul.f32 -0.001358992, %v6254_v0  ;;  %vm6255_vm14 = vcmp.lt.s32.totalorder %v5565_v34, 2  ;;  %v2998_v18 = vadd.s32 %v2997_v17, %v2988_v49 }
 0x2b4   :  { %v2945_v39 = vsel %vm6255_vm14, %v5613_v61, %v2944_v28  ;;  %v715_v5 = vadd.f32 1.0, %v714_v57  ;;  %v721_v4 = vmul.f32 %v720_v56, %v6252_v36  ;;  %v6256_v32 = vshll.u32 %v5495_v10, %v5515_v53 }
 0x2b5   :  { %v6257_v51 = vand.u32 2147483647, %v5343_v7  ;;  %v6258_v54 = vmov 0  ;;  %v1787_v21 = vmul.f32 %v1786_v23, %v1784_v50  ;;  %vm3001_vm4 = vc.u32 %v5633_v9, %v5635_v6 }
 0x2b6   :  { %v2864_v8 = vor.u32 %v5577_v12, %v6256_v32  ;;  %v726_v34 = vand.u32 3, %v725_v27  ;;  %v3002_v61 = vadd.s32 1, %v2998_v18  ;;  %v722_v36 = vadd.f32 1.0, %v721_v4 }
 0x2b7   :  { %vm5648_vm15 = vcmp.le.f32.partialorder %v6257_v51, 0.7853982  ;;  %v1951_v2 = vadd.f32 0.041655596, %v1950_v35  ;;  %v1957_v53 = vmul.f32 -0.00019511016, %v6254_v0  ;;  %v1631_v10 = vcvt.s32.f32 %v5548_v11 }
 0x2b8   :  { %v6259_v54 = vsel %vm5648_vm15, 4294967295, %v6258_v54  ;;  %v1788_v12 = vxor.u32 2147483648, %v1787_v21  ;;  %v2999_v44 = vmul.u32 %v5556_v16, %v2945_v39  ;;  %v2869_v46 = vand.u32 2147483647, %v5592_v25 }
 0x2b9   :  { %v3003_v42 = vsel %vm3001_vm4, %v3002_v61, %v2998_v18  ;;  %v723_v31 = vmul.f32 %v722_v36, %v6261_v55  ;;  %v732_v47 = vxor.u32 2147483648, %v715_v5  ;;  %v2718_v24 = vxor.u32 2147483648, %v5546_v13 }
 0x2ba   :  { %v6262_v26 = vand.u32 2147483647, %v5550_v15  ;;  %v3004_v33 = vadd.s32 %v3003_v42, %v2999_v44  ;;  %v1958_v63 = vadd.f32 0.008332121, %v1957_v53  ;;  %v2871_v16 = vcvt.s32.f32 %v2864_v8  ;;  %v6274_v44 = vld [vmem:[#allocation30_spill] sm:$0xff] }
 0x2bb   :  { %vm728_vm10 = vcmp.eq.s32.totalorder %v726_v34, 0  ;;  %v729_v29 = vxor.u32 2147483648, %v723_v31  ;;  %v1952_v48 = vmul.f32 %v1951_v2, %v6254_v0  ;;  %v6263_v25 = vand.u32 2147483647, %v4990_v58 }
 0x2bc   :  { %v1632_v11 = vmul.f32 %v1631_v10, %v6262_v26  ;;  %v6266_v59 = vand.u32 2147483647, %v5068_v20  ;;  %v1789_v15 = vsel %vm6132_vm1, %v1788_v12, %v1787_v21  ;;  %v3005_v28 = vadd.s32 536870912, %v3004_v33 }
 0x2bd   :  { %vm5670_vm4 = vcmp.le.f32.partialorder %v6263_v25, 0.7853982  ;;  %vm731_vm7 = vcmp.eq.s32.totalorder %v726_v34, 2  ;;  %v1959_v57 = vmul.f32 %v1958_v63, %v6254_v0  ;;  %v2872_v3 = vmul.f32 %v2871_v16, %v2869_v46 }
 0x2be   :  { %vm5676_vm14 = vcmp.le.f32.partialorder %v6266_v59, 0.7853982  ;;  %vm727_vm11 = vcmp.lt.s32.totalorder %v726_v34, 2  ;;  %v730_v27 = vsel %vm728_vm10, %v715_v5, %v729_v29  ;;  %v733_v49 = vsel %vm731_vm7, %v732_v47, %v723_v31 }
 0x2bf   :  { %v1633_v17 = vxor.u32 2147483648, %v1632_v11  ;;  %v5683_v56 = vshrl.u32 %v3005_v28, 30  ;;  %v734_v50 = vsel %vm727_vm11, %v730_v27, %v733_v49  ;;  %v1960_v23 = vadd.f32 -0.16666654, %v1959_v57 }
 0x2c0   :  { %v5687_v35 = vmul.f32 %v5405_v43, %v5405_v43  ;;  %v5692_v39 = vsel %vm5648_vm15, %v5343_v7, %v1789_v15  ;;  %vm6269_vm1 = vweird.f32 %v6260_v40  ;;  %v1953_v5 = vadd.f32 -0.4999988, %v1952_v48  ;;  %v6279_v15 = vld [vmem:[#allocation32_spill] sm:$0xff] }
 0x2c1   :  { %v735_v18 = vsel %vm6269_vm1, nan, %v734_v50  ;;  %v5698_v4 = vmul.f32 %v5539_v37, %v5539_v37  ;;  %v6270_v32 = vsub.s32 4, %v5229_v22  ;;  %vm6271_vm11 = vcmp.lt.s32.totalorder %v4990_v58, 0 }
 0x2c2   :  { %v3007_v51 = vshll.u32 %v5683_v56, 30  ;;  %v3061_v21 = vmul.f32 %v735_v18, %v735_v18  ;;  %vm6272_vm10 = vmmov %vm6271_vm11  ;;  %v2873_v61 = vxor.u32 2147483648, %v2872_v3  ;;  %v5712_v36 = vstv %s5661_s2 }
 0x2c3   :  { %v5705_v8 = vsel %vm6271_vm11, %v6270_v32, %v5229_v22  ;;  %v2719_v34 = vsel %vm6272_vm10, %v2718_v24, %v5546_v13  ;;  %v1961_v2 = vmul.f32 %v1960_v23, %v6254_v0  ;;  %vm6273_vm1 = vcmp.lt.s32.totalorder %v5068_v20, 0  ;;  %v299_v32 = vpop.f32.mrf.mxu1 }
 0x2c4   :  { %v1634_v53 = vsel %vm6273_vm1, %v1633_v17, %v1632_v11  ;;  %v5719_v10 = vmul.f32 %v5692_v39, %v5692_v39  ;;  %v5721_v22 = vsub.s32 %v3004_v33, %v3007_v51  ;;  %v3078_v12 = vmul.f32 %v5712_v36, %v3061_v21  ;;  %vm6280_vm10 = vmmov %vm6273_vm1  ;;  %v6281_v51 = vld [vmem:[#allocation17_spill] sm:$0xff]  ;;  %v6282_v21 = vld [vmem:[#allocation35_spill] sm:$0xff] }
 0x2c5   :  { %vm2753_vm7 = vcmp.lt.s32.totalorder %v5259_v14, 0  ;;  %v1948_v40 = vsel %vm4328_vm3, 0, %v6274_v44  ;;  %v1954_v46 = vmul.f32 %v1953_v5, %v6254_v0  ;;  %v1962_v42 = vadd.f32 1.0, %v1961_v2 }
 0x2c6   :  { %v1635_v55 = vsub.s32 4, %v5337_v30  ;;  %vm3009_vm11 = vcmp.lt.s32.totalorder %v5721_v22, 0  ;;  %v3010_v31 = vsub.s32 0, %v5721_v22  ;;  %v3094_v47 = vmul.f32 1.442695, %v3078_v12 }
 0x2c7   :  { %v5735_v24 = vsel %vm5670_vm4, %v4990_v58, %v2719_v34  ;;  %v5740_v26 = vsel %vm5676_vm14, %v5068_v20, %v1634_v53  ;;  %v2874_v0 = vsel %vm2753_vm7, %v2873_v61, %v2872_v3  ;;  %v2875_v11 = vsub.s32 4, %v5477_v60  ;;  %v6284_v53 = vld [vmem:[#allocation39_spill] sm:$0xff] }
 0x2c8   :  { %v1802_v33 = vmul.f32 -0.00019511016, %v5719_v10  ;;  %v3011_v63 = vsel %vm3009_vm11, %v3010_v31, %v5721_v22  ;;  %3293 = vpow2.f32 %v3094_v47  ;;  %v1965_v16 = vadd.s32 3, %v1948_v40 }
 0x2c9   :  { %v6276_v29 = vand.u32 2147483647, %v5259_v14  ;;  %v3012_v25 = vclz %v3011_v63  ;;  %v1955_v59 = vadd.f32 1.0, %v1954_v46  ;;  %v1963_v28 = vmul.f32 %v1962_v42, %v6279_v15 }
 0x2ca   :  { %v5756_v57 = vmul.f32 %v5735_v24, %v5735_v24  ;;  %v5761_v3 = vsel %vm6280_vm10, %v1635_v55, %v5337_v30  ;;  %v5765_v27 = vmul.f32 %v5740_v26, %v5740_v26  ;;  %v1966_v49 = vand.u32 3, %v1965_v16 }
 0x2cb   :  { %vm5749_vm3 = vcmp.le.f32.partialorder %v6276_v29, 0.7853982  ;;  %v5770_v17 = vsel %vm2753_vm7, %v2875_v11, %v5477_v60  ;;  %v1790_v23 = vsub.s32 4, %v5573_v19  ;;  %v3242_v18 = vadd.s32 4294967294, %v3012_v25 }
 0x2cc   :  { %v5775_v50 = vsel %vm5749_vm3, %v5259_v14, %v2874_v0  ;;  %v1803_v30 = vadd.f32 0.008332121, %v1802_v33  ;;  %v3000_v5 = vadd.s32 %v5635_v6, %v5633_v9  ;;  %vm1964_vm1 = vweird.f32 %v6281_v51 }
 0x2cd   :  { %v863_v60 = vsel %vm4607_vm13, 0, %v6282_v21  ;;  %vm3243_vm7 = vcmp.lt.s32.totalorder %v3242_v18, 0  ;;  %v1969_v61 = vxor.u32 2147483648, %v1963_v28  ;;  %v1972_v2 = vxor.u32 2147483648, %v1955_v59 }
 0x2ce   :  { %v865_v12 = vmul.f32 -0.001358992, %v6284_v53  ;;  %v3294_v44 = vpop.eup %3293  ;;  %v3015_v13 = vsel %vm3243_vm7, 0, %v3242_v18  ;;  %vm1967_vm11 = vcmp.lt.s32.totalorder %v1966_v49, 2  ;;  %vm1968_vm10 = vcmp.eq.s32.totalorder %v1966_v49, 0 }
 0x2cf   :  { %v872_v40 = vmul.f32 -0.00019511016, %v6284_v53  ;;  %v3016_v46 = vsub.s32 32, %v3015_v13  ;;  %v3020_v9 = vsub.s32 4294967266, %v3015_v13  ;;  %v3142_v6 = vmul.f32 %v3294_v44, %v299_v32 }
 0x2d0   :  { %vm1971_vm15 = vcmp.eq.s32.totalorder %v1966_v49, 2  ;;  %v1970_v42 = vsel %vm1968_vm10, %v1955_v59, %v1969_v61  ;;  %v866_v31 = vadd.f32 0.041655596, %v865_v12  ;;  %v3017_v0 = vshll.u32 %v5721_v22, %v3015_v13  ;;  %v6286_v61 = vld [vmem:[#allocation46_spill] sm:$0xff] }
 0x2d1   :  { %v1973_v55 = vsel %vm1971_vm15, %v1972_v2, %v1963_v28  ;;  %v873_v47 = vadd.f32 0.008332121, %v872_v40  ;;  %v3018_v11 = vshrl.u32 %v3000_v5, %v3016_v46  ;;  %v3021_v33 = vadd.s32 127, %v3020_v9  ;;  %3158 = vst [vmem:[#allocation11] sm:$0xff] %v3142_v6  ;;  %v6287_v9 = vld [vmem:[#allocation18_spill] sm:$0xff] }
 0x2d2   :  { %v1974_v63 = vsel %vm1967_vm11, %v1970_v42, %v1973_v55  ;;  %v867_v29 = vmul.f32 %v866_v31, %v6284_v53  ;;  %v880_v15 = vadd.s32 3, %v863_v60  ;;  %v5793_v59 = vmul.f32 %v5775_v50, %v5775_v50 }
 0x2d3   :  { %v1975_v16 = vsel %vm1964_vm1, nan, %v1974_v63  ;;  %v874_v25 = vmul.f32 %v873_v47, %v6284_v53  ;;  %v3019_v28 = vor.u32 %v3018_v11, %v3017_v0  ;;  %v3022_v49 = vshll.u32 %v3021_v33, 23  ;;  %v6291_v47 = vld [vmem:[#allocation40_spill] sm:$0xff] }
 0x2d4   :  { %v3069_v18 = vmul.f32 %v1975_v16, %v1975_v16  ;;  %vm6285_vm13 = vcmp.lt.s32.totalorder %v5343_v7, 0  ;;  %v3030_v5 = vsub.s32 4, %v5683_v56  ;;  %v868_v32 = vadd.f32 -0.4999988, %v867_v29  ;;  %v6293_v29 = vld [vmem:[#allocation38_spill] sm:$0xff] }
 0x2d5   :  { %v5798_v22 = vsel %vm6285_vm13, %v1790_v23, %v5573_v19  ;;  %v875_v51 = vadd.f32 -0.16666654, %v874_v25  ;;  %v1804_v21 = vmul.f32 %v1803_v30, %v5719_v10  ;;  %vm2908_vm15 = vcmp.lt.s32.totalorder %v5445_v45, 0 }
 0x2d6   :  { %v3023_v34 = vor.u32 4788187, %v3022_v49  ;;  %v3086_v60 = vmul.f32 %v5712_v36, %v3069_v18  ;;  %v2105_v2 = vmul.f32 -0.001358992, %v6286_v61  ;;  %v869_v12 = vmul.f32 %v868_v32, %v6284_v53 }
 0x2d7   :  { %v876_v44 = vmul.f32 %v875_v51, %v6284_v53  ;;  %v881_v13 = vand.u32 3, %v880_v15  ;;  %v2112_v19 = vmul.f32 -0.00019511016, %v6286_v61  ;;  %v3026_v40 = vcvt.s32.f32 %v3019_v28 }
 0x2d8   :  { %v3024_v23 = vand.u32 2147483647, %v3023_v34  ;;  %v3110_v46 = vmul.f32 1.442695, %v3086_v60  ;;  %vm879_vm1 = vweird.f32 %v6287_v9  ;;  %v2106_v30 = vadd.f32 0.041655596, %v2105_v2  ;;  %v323_v2 = vpop.f32.mrf.mxu3 }
 0x2d9   :  { %v6288_v6 = vand.u32 2147483647, %v5445_v45  ;;  %v870_v55 = vadd.f32 1.0, %v869_v12  ;;  %v877_v31 = vadd.f32 1.0, %v876_v44  ;;  %v2103_v53 = vsel %vm4744_vm2, 0, %v6291_v47 }
 0x2da   :  { %v2113_v11 = vadd.f32 0.008332121, %v2112_v19  ;;  %v3027_v33 = vmul.f32 %v3026_v40, %v3024_v23  ;;  %3295 = vpow2.f32 %v3110_v46  ;;  %v2107_v63 = vmul.f32 %v2106_v30, %v6286_v61  ;;  %v6294_v19 = vld [vmem:[#allocation47_spill] sm:$0xff] }
 0x2db   :  { %vm5811_vm7 = vcmp.le.f32.partialorder %v6288_v6, 0.7853982  ;;  %v1020_v16 = vmul.f32 -0.001358992, %v5028_v1  ;;  %v878_v25 = vmul.f32 %v877_v31, %v6293_v29  ;;  %vm882_vm11 = vcmp.lt.s32.totalorder %v881_v13, 2 }
 0x2dc   :  { %v887_v15 = vxor.u32 2147483648, %v870_v55  ;;  %v2114_v28 = vmul.f32 %v2113_v11, %v6286_v61  ;;  %v3028_v49 = vxor.u32 2147483648, %v3027_v33  ;;  %vm883_vm10 = vcmp.eq.s32.totalorder %v881_v13, 0 }
 0x2dd   :  { %v2108_v18 = vadd.f32 -0.4999988, %v2107_v63  ;;  %v2120_v32 = vadd.s32 3, %v2103_v53  ;;  %v884_v51 = vxor.u32 2147483648, %v878_v25  ;;  %vm886_vm13 = vcmp.eq.s32.totalorder %v881_v13, 2  ;;  %v6296_v63 = vld [vmem:[#allocation19_spill] sm:$0xff] }
 0x2de   :  { %v2115_v34 = vadd.f32 -0.16666654, %v2114_v28  ;;  %v1021_v60 = vadd.f32 0.041655596, %v1020_v16  ;;  %v888_v12 = vsel %vm886_vm13, %v887_v15, %v878_v25  ;;  %v1018_v40 = vsel %vm4766_vm8, 0, %v6294_v19 }
 0x2df   :  { %v2109_v44 = vmul.f32 %v2108_v18, %v6286_v61  ;;  %v1027_v46 = vmul.f32 -0.00019511016, %v5028_v1  ;;  %v3029_v30 = vsel %vm2908_vm15, %v3028_v49, %v3027_v33  ;;  %v885_v6 = vsel %vm883_vm10, %v870_v55, %v884_v51 }
 0x2e0   :  { %v2116_v31 = vmul.f32 %v2115_v34, %v6286_v61  ;;  %v1022_v47 = vmul.f32 %v1021_v60, %v5028_v1  ;;  %v3296_v0 = vpop.eup %3295  ;;  %v889_v53 = vsel %vm882_vm11, %v885_v6, %v888_v12  ;;  %vm2119_vm2 = vweird.f32 %v6296_v63 }
 0x2e1   :  { %v2110_v11 = vadd.f32 1.0, %v2109_v44  ;;  %v2121_v16 = vand.u32 3, %v2120_v32  ;;  %v1028_v29 = vadd.f32 0.008332121, %v1027_v46  ;;  %v3150_v25 = vmul.f32 %v3296_v0, %v323_v2  ;;  %v6297_v32 = vld [vmem:[#allocation44_spill] sm:$0xff] }
 0x2e2   :  { %v890_v15 = vsel %vm879_vm1, nan, %v889_v53  ;;  %v2117_v28 = vadd.f32 1.0, %v2116_v31  ;;  %v1023_v18 = vadd.f32 -0.4999988, %v1022_v47  ;;  %v5838_v61 = vsel %vm2908_vm15, %v3030_v5, %v5683_v56  ;;  %v6298_v46 = vld [vmem:[#allocation52_spill] sm:$0xff]  ;;  %v6300_v47 = vld [vmem:[#allocation21_spill] sm:$0xff] }
 0x2e3   :  { %v5843_v13 = vsel %vm5811_vm7, %v5445_v45, %v3029_v30  ;;  %v3062_v55 = vmul.f32 %v890_v15, %v890_v15  ;;  %v1029_v33 = vmul.f32 %v1028_v29, %v5028_v1  ;;  %v1805_v49 = vadd.f32 -0.16666654, %v1804_v21  ;;  %3166 = vst [vmem:[#allocation11 + $0x40] sm:$0xff] %v3150_v25 }
 0x2e4   :  { %v2118_v9 = vmul.f32 %v2117_v28, %v6297_v32  ;;  %v2127_v51 = vxor.u32 2147483648, %v2110_v11  ;;  %v1024_v34 = vmul.f32 %v1023_v18, %v5028_v1  ;;  %v1035_v56 = vadd.s32 3, %v1018_v40 }
 0x2e5   :  { %v3079_v60 = vmul.f32 %v5712_v36, %v3062_v55  ;;  %v1030_v2 = vadd.f32 -0.16666654, %v1029_v33  ;;  %v2260_v5 = vmul.f32 -0.001358992, %v5072_v41  ;;  %v5852_v12 = vmul.f32 %v5843_v13, %v5843_v13 }
 0x2e6   :  { %vm2123_vm8 = vcmp.eq.s32.totalorder %v2121_v16, 0  ;;  %v2124_v44 = vxor.u32 2147483648, %v2118_v9  ;;  %vm2126_vm15 = vcmp.eq.s32.totalorder %v2121_v16, 2  ;;  %v1025_v19 = vadd.f32 1.0, %v1024_v34 }
 0x2e7   :  { %v3096_v21 = vmul.f32 1.442695, %v3079_v60  ;;  %v1031_v23 = vmul.f32 %v1030_v2, %v5028_v1  ;;  %v2258_v6 = vsel %vm4994_vm0, 0, %v6298_v46  ;;  %vm2122_vm1 = vcmp.lt.s32.totalorder %v2121_v16, 2  ;;  %v6302_v60 = vld [vmem:[#allocation53_spill] sm:$0xff] }
 0x2e8   :  { %v2125_v31 = vsel %vm2123_vm8, %v2110_v11, %v2124_v44  ;;  %v2128_v40 = vsel %vm2126_vm15, %v2127_v51, %v2118_v9  ;;  %vm1034_vm11 = vweird.f32 %v6300_v47  ;;  %v2261_v0 = vadd.f32 0.041655596, %v2260_v5  ;;  %v6301_v11 = vld [vmem:[#allocation48_spill] sm:$0xff] }
 0x2e9   :  { %3297 = vpow2.f32 %v3096_v21  ;;  %v2129_v53 = vsel %vm2122_vm1, %v2125_v31, %v2128_v40  ;;  %v1032_v29 = vadd.f32 1.0, %v1031_v23  ;;  %v1036_v25 = vand.u32 3, %v1035_v56  ;;  %v302_v56 = vpop.f32.mrf.mxu1 }
 0x2ea   :  { %v2130_v15 = vsel %vm2119_vm2, nan, %v2129_v53  ;;  %v2262_v28 = vmul.f32 %v2261_v0, %v5072_v41  ;;  %v2267_v1 = vmul.f32 -0.00019511016, %v5072_v41  ;;  %v2275_v18 = vadd.s32 3, %v2258_v6 }
 0x2eb   :  { %v3042_v55 = vmul.f32 -0.00019511016, %v5852_v12  ;;  %v3070_v16 = vmul.f32 %v2130_v15, %v2130_v15  ;;  %v1033_v33 = vmul.f32 %v1032_v29, %v6301_v11  ;;  %v1042_v32 = vxor.u32 2147483648, %v1025_v19 }
 0x2ec   :  { %v1806_v9 = vmul.f32 %v1805_v49, %v5719_v10  ;;  %v2263_v51 = vadd.f32 -0.4999988, %v2262_v28  ;;  %v2268_v34 = vadd.f32 0.008332121, %v2267_v1  ;;  %v1173_v63 = vsel %vm5006_vm5, 0, %v6302_v60  ;;  %v6304_v1 = vld [vmem:[#allocation54_spill] sm:$0xff] }
 0x2ed   :  { %v3087_v5 = vmul.f32 %v5712_v36, %v3070_v16  ;;  %vm1037_vm0 = vcmp.lt.s32.totalorder %v1036_v25, 2  ;;  %vm1038_vm10 = vcmp.eq.s32.totalorder %v1036_v25, 0  ;;  %v1039_v44 = vxor.u32 2147483648, %v1033_v33 }
 0x2ee   :  { %vm1041_vm13 = vcmp.eq.s32.totalorder %v1036_v25, 2  ;;  %v2264_v21 = vmul.f32 %v2263_v51, %v5072_v41  ;;  %v2269_v23 = vmul.f32 %v2268_v34, %v5072_v41  ;;  %v2276_v46 = vand.u32 3, %v2275_v18 }
 0x2ef   :  { %v3298_v30 = vpop.eup %3297  ;;  %v3112_v49 = vmul.f32 1.442695, %v3087_v5  ;;  %v1040_v6 = vsel %vm1038_vm10, %v1025_v19, %v1039_v44  ;;  %v1043_v31 = vsel %vm1041_vm13, %v1042_v32, %v1033_v33  ;;  %v1190_v40 = vadd.s32 3, %v1173_v63  ;;  %v6305_v33 = vld [vmem:[#allocation22_spill] sm:$0xff]  ;;  %v326_v63 = vpop.f32.mrf.mxu3  ;;  %v6306_v44 = vld [vmem:[#allocation20_spill] sm:$0xff] }
 0x2f0   :  { %v3143_v0 = vmul.f32 %v3298_v30, %v302_v56  ;;  %v1044_v53 = vsel %vm1037_vm0, %v1040_v6, %v1043_v31  ;;  %v2265_v29 = vadd.f32 1.0, %v2264_v21  ;;  %v2270_v15 = vadd.f32 -0.16666654, %v2269_v23  ;;  %v6307_v23 = vld [vmem:[#allocation55_spill] sm:$0xff] }
 0x2f1   :  { %3299 = vpow2.f32 %v3112_v49  ;;  %v1045_v28 = vsel %vm1034_vm11, nan, %v1044_v53  ;;  %v1175_v25 = vmul.f32 -0.001358992, %v6304_v1  ;;  %v1182_v16 = vmul.f32 -0.00019511016, %v6304_v1 }
 0x2f2   :  { %v5876_v11 = vadd.f32 1.0, %v1806_v9  ;;  %v3043_v18 = vadd.f32 0.008332121, %v3042_v55  ;;  %3159 = vst [vmem:[#allocation11 + $0x8] sm:$0xff] %v3143_v0  ;;  %v3063_v51 = vmul.f32 %v1045_v28, %v1045_v28  ;;  %v2271_v19 = vmul.f32 %v2270_v15, %v5072_v41 }
 0x2f3   :  { %vm2274_vm5 = vweird.f32 %v6305_v33  ;;  %vm2277_vm2 = vcmp.lt.s32.totalorder %v2276_v46, 2  ;;  %vm2278_vm8 = vcmp.eq.s32.totalorder %v2276_v46, 0  ;;  %v1176_v32 = vadd.f32 0.041655596, %v1175_v25 }
 0x2f4   :  { %v1183_v34 = vadd.f32 0.008332121, %v1182_v16  ;;  %v3080_v47 = vmul.f32 %v5712_v36, %v3063_v51  ;;  %v2272_v60 = vadd.f32 1.0, %v2271_v19  ;;  %vm2281_vm15 = vcmp.eq.s32.totalorder %v2276_v46, 2  ;;  %v6309_v16 = vld [vmem:[#allocation59_spill] sm:$0xff] }
 0x2f5   :  { %v2282_v2 = vxor.u32 2147483648, %v2265_v29  ;;  %v1177_v9 = vmul.f32 %v1176_v32, %v6304_v1  ;;  %v1191_v56 = vand.u32 3, %v1190_v40  ;;  %v2415_v5 = vmul.f32 -0.001358992, %v5312_v52 }
 0x2f6   :  { %v1184_v55 = vmul.f32 %v1183_v34, %v6304_v1  ;;  %v3098_v41 = vmul.f32 1.442695, %v3080_v47  ;;  %v2273_v21 = vmul.f32 %v2272_v60, %v6306_v44  ;;  %v2413_v49 = vsel %vm5251_vm12, 0, %v6307_v23 }
 0x2f7   :  { %v2422_v6 = vmul.f32 -0.00019511016, %v5312_v52  ;;  %v3300_v31 = vpop.eup %3299  ;;  %v5890_v0 = vmul.f32 %v3043_v18, %v5852_v12  ;;  %v1178_v53 = vadd.f32 -0.4999988, %v1177_v9  ;;  %v2416_v28 = vadd.f32 0.041655596, %v2415_v5 }
 0x2f8   :  { %v1185_v15 = vadd.f32 -0.16666654, %v1184_v55  ;;  %v3151_v25 = vmul.f32 %v3300_v31, %v326_v63  ;;  %3301 = vpow2.f32 %v3098_v41  ;;  %v2279_v40 = vxor.u32 2147483648, %v2273_v21  ;;  %v6311_v55 = vld [vmem:[#allocation27_spill] sm:$0xff]  ;;  %v6312_v63 = vld [vmem:[#allocation60_spill] sm:$0xff]  ;;  %v305_v31 = vpop.f32.mrf.mxu1 }
 0x2f9   :  { %v1328_v19 = vsel %vm5263_vm6, 0, %v6309_v16  ;;  %v1179_v32 = vmul.f32 %v1178_v53, %v6304_v1  ;;  %v2417_v47 = vmul.f32 %v2416_v28, %v5312_v52  ;;  %v2423_v60 = vadd.f32 0.008332121, %v2422_v6 }
 0x2fa   :  { %v1186_v34 = vmul.f32 %v1185_v15, %v6304_v1  ;;  %3167 = vst [vmem:[#allocation11 + $0x48] sm:$0xff] %v3151_v25  ;;  %v2280_v18 = vsel %vm2278_vm8, %v2265_v29, %v2279_v40  ;;  %v2283_v9 = vsel %vm2281_vm15, %v2282_v2, %v2273_v21  ;;  %vm1189_vm12 = vweird.f32 %v6311_v55  ;;  %v6313_v21 = vld [vmem:[#allocation51_spill] sm:$0xff] }
 0x2fb   :  { %vm1192_vm1 = vcmp.lt.s32.totalorder %v1191_v56, 2  ;;  %v1330_v5 = vmul.f32 -0.001358992, %v6312_v63  ;;  %v2284_v41 = vsel %vm2277_vm2, %v2280_v18, %v2283_v9  ;;  %v1180_v44 = vadd.f32 1.0, %v1179_v32 }
 0x2fc   :  { %v1187_v23 = vadd.f32 1.0, %v1186_v34  ;;  %v2418_v30 = vadd.f32 -0.4999988, %v2417_v47  ;;  %v2285_v1 = vsel %vm2274_vm5, nan, %v2284_v41  ;;  %v2424_v6 = vmul.f32 %v2423_v60, %v5312_v52 }
 0x2fd   :  { %v2430_v53 = vadd.s32 3, %v2413_v49  ;;  %v1337_v29 = vmul.f32 -0.00019511016, %v6312_v63  ;;  %v3071_v2 = vmul.f32 %v2285_v1, %v2285_v1  ;;  %v1197_v28 = vxor.u32 2147483648, %v1180_v44 }
 0x2fe   :  { %v1188_v15 = vmul.f32 %v1187_v23, %v6313_v21  ;;  %v2419_v25 = vmul.f32 %v2418_v30, %v5312_v52  ;;  %v3302_v46 = vpop.eup %3301  ;;  %vm1193_vm6 = vcmp.eq.s32.totalorder %v1191_v56, 0  ;;  %v2425_v40 = vadd.f32 -0.16666654, %v2424_v6  ;;  %v6314_v30 = vld [vmem:[#allocation34_spill] sm:$0xff]  ;;  %v6315_v21 = vld [vmem:[#allocation61_spill] sm:$0xff] }
 0x2ff   :  { %v1331_v16 = vadd.f32 0.041655596, %v1330_v5  ;;  %v1345_v51 = vadd.s32 3, %v1328_v19  ;;  %v3144_v32 = vmul.f32 %v3302_v46, %v305_v31  ;;  %v3088_v33 = vmul.f32 %v5712_v36, %v3071_v2 }
 0x300   :  { %v1194_v34 = vxor.u32 2147483648, %v1188_v15  ;;  %vm1196_vm11 = vcmp.eq.s32.totalorder %v1191_v56, 2  ;;  %v2420_v47 = vadd.f32 1.0, %v2419_v25  ;;  %v2426_v49 = vmul.f32 %v2425_v40, %v5312_v52 }
 0x301   :  { %v1332_v60 = vmul.f32 %v1331_v16, %v6312_v63  ;;  %v1338_v18 = vadd.f32 0.008332121, %v1337_v29  ;;  %3160 = vst [vmem:[#allocation11 + $0x10] sm:$0xff] %v3144_v32  ;;  %v3114_v9 = vmul.f32 1.442695, %v3088_v33  ;;  %v1198_v23 = vsel %vm1196_vm11, %v1197_v28, %v1188_v15  ;;  %v6317_v15 = vld [vmem:[#allocation58_spill] sm:$0xff]  ;;  %v329_v32 = vpop.f32.mrf.mxu3 }
 0x302   :  { %v1195_v41 = vsel %vm1193_vm6, %v1180_v44, %v1194_v34  ;;  %vm2429_vm0 = vweird.f32 %v6314_v30  ;;  %v2431_v1 = vand.u32 3, %v2430_v53  ;;  %v2427_v5 = vadd.f32 1.0, %v2426_v49 }
 0x303   :  { %v1199_v19 = vsel %vm1192_vm1, %v1195_v41, %v1198_v23  ;;  %v1333_v31 = vadd.f32 -0.4999988, %v1332_v60  ;;  %v1346_v6 = vand.u32 3, %v1345_v51  ;;  %3303 = vpow2.f32 %v3114_v9  ;;  %v6318_v23 = vld [vmem:[#allocation36_spill] sm:$0xff] }
 0x304   :  { %v1200_v2 = vsel %vm1189_vm12, nan, %v1199_v19  ;;  %v1339_v52 = vmul.f32 %v1338_v18, %v6312_v63  ;;  %v2568_v25 = vsel %vm5361_vm9, 0, %v6315_v21  ;;  %v2428_v28 = vmul.f32 %v2427_v5, %v6317_v15 }
 0x305   :  { %v3064_v44 = vmul.f32 %v1200_v2, %v1200_v2  ;;  %v2437_v46 = vxor.u32 2147483648, %v2420_v47  ;;  %v1334_v56 = vmul.f32 %v1333_v31, %v6312_v63  ;;  %vm2432_vm10 = vcmp.lt.s32.totalorder %v2431_v1, 2 }
 0x306   :  { %vm2433_vm13 = vcmp.eq.s32.totalorder %v2431_v1, 0  ;;  %v1340_v53 = vadd.f32 -0.16666654, %v1339_v52  ;;  %v2570_v40 = vmul.f32 -0.001358992, %v5687_v35  ;;  %v2434_v16 = vxor.u32 2147483648, %v2428_v28 }
 0x307   :  { %v3081_v55 = vmul.f32 %v5712_v36, %v3064_v44  ;;  %vm2436_vm5 = vcmp.eq.s32.totalorder %v2431_v1, 2  ;;  %v1335_v51 = vadd.f32 1.0, %v1334_v56  ;;  %vm1347_vm9 = vcmp.lt.s32.totalorder %v1346_v6, 2  ;;  %v6319_v44 = vld [vmem:[#allocation63_spill] sm:$0xff] }
 0x308   :  { %v1341_v33 = vmul.f32 %v1340_v53, %v6312_v63  ;;  %v2571_v34 = vadd.f32 0.041655596, %v2570_v40  ;;  %v2577_v49 = vmul.f32 -0.00019511016, %v5687_v35  ;;  %v2585_v60 = vadd.s32 3, %v2568_v25  ;;  %v6320_v25 = vld [vmem:[#allocation31_spill] sm:$0xff] }
 0x309   :  { %v3100_v18 = vmul.f32 1.442695, %v3081_v55  ;;  %v2435_v9 = vsel %vm2433_vm13, %v2420_v47, %v2434_v16  ;;  %v2438_v41 = vsel %vm2436_vm5, %v2437_v46, %v2428_v28  ;;  %vm1344_vm2 = vweird.f32 %v6318_v23  ;;  %v3304_v5 = vpop.eup %3303  ;;  %v6322_v28 = vld [vmem:[#allocation24_spill] sm:$0xff] }
 0x30a   :  { %v1352_v19 = vxor.u32 2147483648, %v1335_v51  ;;  %v2439_v31 = vsel %vm2432_vm10, %v2435_v9, %v2438_v41  ;;  %v1342_v2 = vadd.f32 1.0, %v1341_v33  ;;  %v2572_v52 = vmul.f32 %v2571_v34, %v5687_v35  ;;  %v308_v34 = vpop.f32.mrf.mxu1 }
 0x30b   :  { %v2578_v21 = vadd.f32 0.008332121, %v2577_v49  ;;  %v3152_v29 = vmul.f32 %v3304_v5, %v329_v32  ;;  %3305 = vpow2.f32 %v3100_v18  ;;  %v2440_v63 = vsel %vm2429_vm0, nan, %v2439_v31 }
 0x30c   :  { %vm6321_vm8 = vnez %v6320_v25  ;;  %v3072_v15 = vmul.f32 %v2440_v63, %v2440_v63  ;;  %v1343_v46 = vmul.f32 %v1342_v2, %v6322_v28  ;;  %v2573_v56 = vadd.f32 -0.4999988, %v2572_v52  ;;  %v6323_v25 = vld [vmem:[#allocation42_spill] sm:$0xff] }
 0x30d   :  { %v1483_v47 = vsel %vm6321_vm8, 0, %v6319_v44  ;;  %v2579_v1 = vmul.f32 %v2578_v21, %v5687_v35  ;;  %3168 = vst [vmem:[#allocation11 + $0x50] sm:$0xff] %v3152_v29  ;;  %vm1348_vm15 = vcmp.eq.s32.totalorder %v1346_v6, 0  ;;  %vm1351_vm12 = vcmp.eq.s32.totalorder %v1346_v6, 2 }
 0x30e   :  { %v2586_v53 = vand.u32 3, %v2585_v60  ;;  %v1485_v40 = vmul.f32 -0.001358992, %v5698_v4  ;;  %v3089_v55 = vmul.f32 %v5712_v36, %v3072_v15  ;;  %v1349_v30 = vxor.u32 2147483648, %v1343_v46 }
 0x30f   :  { %v2574_v16 = vmul.f32 %v2573_v56, %v5687_v35  ;;  %v1500_v32 = vadd.s32 3, %v1483_v47  ;;  %v5941_v33 = vmul.f32 %v5876_v11, %v5692_v39  ;;  %v2580_v49 = vadd.f32 -0.16666654, %v2579_v1  ;;  %v332_v1 = vpop.f32.mrf.mxu3 }
 0x310   :  { %v1486_v18 = vadd.f32 0.041655596, %v1485_v40  ;;  %v1492_v9 = vmul.f32 -0.00019511016, %v5698_v4  ;;  %v3116_v41 = vmul.f32 1.442695, %v3089_v55  ;;  %v1350_v5 = vsel %vm1348_vm15, %v1335_v51, %v1349_v30 }
 0x311   :  { %v1353_v60 = vsel %vm1351_vm12, %v1352_v19, %v1343_v46  ;;  %v2575_v31 = vadd.f32 1.0, %v2574_v16  ;;  %v3306_v2 = vpop.eup %3305  ;;  %v2581_v21 = vmul.f32 %v2580_v49, %v5687_v35  ;;  %v5948_v39 = vadd.f32 -0.16666654, %v5890_v0 }
 0x312   :  { %v1354_v52 = vsel %vm1347_vm9, %v1350_v5, %v1353_v60  ;;  %v1487_v29 = vmul.f32 %v1486_v18, %v5698_v4  ;;  %v1493_v63 = vadd.f32 0.008332121, %v1492_v9  ;;  %v3145_v11 = vmul.f32 %v3306_v2, %v308_v34  ;;  %v6324_v5 = vld [vmem:[#allocation45_spill] sm:$0xff] }
 0x313   :  { %3307 = vpow2.f32 %v3116_v41  ;;  %v1355_v44 = vsel %vm1344_vm2, nan, %v1354_v52  ;;  %vm2584_vm1 = vweird.f32 %v6323_v25  ;;  %v2582_v19 = vadd.f32 1.0, %v2581_v21 }
 0x314   :  { %v3065_v51 = vmul.f32 %v1355_v44, %v1355_v44  ;;  %v1488_v47 = vadd.f32 -0.4999988, %v1487_v29  ;;  %v1494_v6 = vmul.f32 %v1493_v63, %v5698_v4  ;;  %3161 = vst [vmem:[#allocation11 + $0x18] sm:$0xff] %v3145_v11  ;;  %vm2587_vm6 = vcmp.lt.s32.totalorder %v2586_v53, 2 }
 0x315   :  { %v2592_v35 = vxor.u32 2147483648, %v2575_v31  ;;  %v1501_v15 = vand.u32 3, %v1500_v32  ;;  %v2723_v0 = vsel %vm5670_vm4, 0, %v5705_v8  ;;  %v2583_v23 = vmul.f32 %v2582_v19, %v5405_v43  ;;  %v311_v19 = vpop.f32.mrf.mxu1 }
 0x316   :  { %v3082_v28 = vmul.f32 %v5712_v36, %v3065_v51  ;;  %v1489_v46 = vmul.f32 %v1488_v47, %v5698_v4  ;;  %v1495_v56 = vadd.f32 -0.16666654, %v1494_v6  ;;  %vm2588_vm11 = vcmp.eq.s32.totalorder %v2586_v53, 0 }
 0x317   :  { %vm2591_vm0 = vcmp.eq.s32.totalorder %v2586_v53, 2  ;;  %v2725_v40 = vmul.f32 -0.001358992, %v5756_v57  ;;  %v2732_v55 = vmul.f32 -0.00019511016, %v5756_v57  ;;  %v2589_v16 = vxor.u32 2147483648, %v2583_v23 }
 0x318   :  { %v3102_v30 = vmul.f32 1.442695, %v3082_v28  ;;  %v1490_v32 = vadd.f32 1.0, %v1489_v46  ;;  %v2740_v34 = vadd.s32 3, %v2723_v0  ;;  %v1496_v8 = vmul.f32 %v1495_v56, %v5698_v4 }
 0x319   :  { %v3308_v62 = vpop.eup %3307  ;;  %vm1502_vm4 = vcmp.lt.s32.totalorder %v1501_v15, 2  ;;  %v2726_v49 = vadd.f32 0.041655596, %v2725_v40  ;;  %v2733_v43 = vadd.f32 0.008332121, %v2732_v55  ;;  %v2590_v9 = vsel %vm2588_vm11, %v2575_v31, %v2589_v16 }
 0x31a   :  { %v3153_v18 = vmul.f32 %v3308_v62, %v332_v1  ;;  %3309 = vpow2.f32 %v3102_v30  ;;  %v2593_v41 = vsel %vm2591_vm0, %v2592_v35, %v2583_v23  ;;  %vm1499_vm10 = vweird.f32 %v6324_v5 }
 0x31b   :  { %v2594_v60 = vsel %vm2587_vm6, %v2590_v9, %v2593_v41  ;;  %v1497_v2 = vadd.f32 1.0, %v1496_v8  ;;  %v2727_v52 = vmul.f32 %v2726_v49, %v5756_v57  ;;  %v2734_v21 = vmul.f32 %v2733_v43, %v5756_v57 }
 0x31c   :  { %3169 = vst [vmem:[#allocation11 + $0x58] sm:$0xff] %v3153_v18  ;;  %v2595_v4 = vsel %vm2584_vm1, nan, %v2594_v60  ;;  %v1507_v29 = vxor.u32 2147483648, %v1490_v32  ;;  %v2741_v63 = vand.u32 3, %v2740_v34  ;;  %v1638_v31 = vsel %vm5676_vm14, 0, %v5761_v3 }
 0x31d   :  { %v3073_v11 = vmul.f32 %v2595_v4, %v2595_v4  ;;  %v1498_v44 = vmul.f32 %v1497_v2, %v5539_v37  ;;  %v2728_v53 = vadd.f32 -0.4999988, %v2727_v52  ;;  %v2735_v51 = vadd.f32 -0.16666654, %v2734_v21  ;;  %v335_v21 = vpop.f32.mrf.mxu3 }
 0x31e   :  { %vm1503_vm13 = vcmp.eq.s32.totalorder %v1501_v15, 0  ;;  %vm1506_vm5 = vcmp.eq.s32.totalorder %v1501_v15, 2  ;;  %v1640_v47 = vmul.f32 -0.001358992, %v5765_v27  ;;  %v1647_v6 = vmul.f32 -0.00019511016, %v5765_v27 }
 0x31f   :  { %v3090_v25 = vmul.f32 %v5712_v36, %v3073_v11  ;;  %v1504_v35 = vxor.u32 2147483648, %v1498_v44  ;;  %v2729_v0 = vmul.f32 %v2728_v53, %v5756_v57  ;;  %v1655_v28 = vadd.s32 3, %v1638_v31 }
 0x320   :  { %v3310_v38 = vpop.eup %3309  ;;  %v1508_v3 = vsel %vm1506_vm5, %v1507_v29, %v1498_v44  ;;  %v2736_v23 = vmul.f32 %v2735_v51, %v5756_v57  ;;  %vm2742_vm14 = vcmp.lt.s32.totalorder %v2741_v63, 2  ;;  %v1641_v37 = vadd.f32 0.041655596, %v1640_v47 }
 0x321   :  { %v1648_v46 = vadd.f32 0.008332121, %v1647_v6  ;;  %v3146_v56 = vmul.f32 %v3310_v38, %v311_v19  ;;  %v3118_v1 = vmul.f32 1.442695, %v3090_v25  ;;  %v1505_v40 = vsel %vm1503_vm13, %v1490_v32, %v1504_v35 }
 0x322   :  { %v2730_v55 = vadd.f32 1.0, %v2729_v0  ;;  %vm2739_vm9 = vweird.f32 %v4990_v58  ;;  %v1509_v30 = vsel %vm1502_vm4, %v1505_v40, %v1508_v3  ;;  %v2737_v16 = vadd.f32 1.0, %v2736_v23 }
 0x323   :  { %v1642_v34 = vmul.f32 %v1641_v37, %v5765_v27  ;;  %v1649_v62 = vmul.f32 %v1648_v46, %v5765_v27  ;;  %3162 = vst [vmem:[#allocation11 + $0x20] sm:$0xff] %v3146_v56  ;;  %3311 = vpow2.f32 %v3118_v1  ;;  %v1510_v57 = vsel %vm1499_vm10, nan, %v1509_v30  ;;  %v314_v56 = vpop.f32.mrf.mxu1 }
 0x324   :  { %vm2743_vm2 = vcmp.eq.s32.totalorder %v2741_v63, 0  ;;  %v2747_v8 = vxor.u32 2147483648, %v2730_v55  ;;  %v3066_v49 = vmul.f32 %v1510_v57, %v1510_v57  ;;  %v2738_v32 = vmul.f32 %v2737_v16, %v5735_v24 }
 0x325   :  { %v1643_v43 = vadd.f32 -0.4999988, %v1642_v34  ;;  %v1650_v18 = vadd.f32 -0.16666654, %v1649_v62  ;;  %vm2746_vm8 = vcmp.eq.s32.totalorder %v2741_v63, 2  ;;  %v2878_v15 = vsel %vm5749_vm3, 0, %v5770_v17 }
 0x326   :  { %v2880_v9 = vmul.f32 -0.001358992, %v5793_v59  ;;  %v2887_v41 = vmul.f32 -0.00019511016, %v5793_v59  ;;  %v3083_v60 = vmul.f32 %v5712_v36, %v3066_v49  ;;  %v2744_v5 = vxor.u32 2147483648, %v2738_v32 }
 0x327   :  { %v1644_v2 = vmul.f32 %v1643_v43, %v5765_v27  ;;  %v1656_v52 = vand.u32 3, %v1655_v28  ;;  %v2748_v4 = vsel %vm2746_vm8, %v2747_v8, %v2738_v32  ;;  %v1651_v24 = vmul.f32 %v1650_v18, %v5765_v27 }
 0x328   :  { %v2881_v29 = vadd.f32 0.041655596, %v2880_v9  ;;  %v2888_v31 = vadd.f32 0.008332121, %v2887_v41  ;;  %v3104_v11 = vmul.f32 1.442695, %v3083_v60  ;;  %v2745_v48 = vsel %vm2743_vm2, %v2730_v55, %v2744_v5 }
 0x329   :  { %v1645_v17 = vadd.f32 1.0, %v1644_v2  ;;  %v2895_v44 = vadd.s32 3, %v2878_v15  ;;  %v3312_v53 = vpop.eup %3311  ;;  %v2749_v51 = vsel %vm2742_vm14, %v2745_v48, %v2748_v4  ;;  %v1652_v19 = vadd.f32 1.0, %v1651_v24 }
 0x32a   :  { %v2882_v47 = vmul.f32 %v2881_v29, %v5793_v59  ;;  %v2889_v6 = vmul.f32 %v2888_v31, %v5793_v59  ;;  %v3154_v25 = vmul.f32 %v3312_v53, %v335_v21  ;;  %3313 = vpow2.f32 %v3104_v11 }
 0x32b   :  { %v2750_v27 = vsel %vm2739_vm9, nan, %v2749_v51  ;;  %v1662_v35 = vxor.u32 2147483648, %v1645_v17  ;;  %v1653_v28 = vmul.f32 %v1652_v19, %v5740_v26  ;;  %v3046_v63 = vmul.f32 %v5948_v39, %v5852_v12 }
 0x32c   :  { %v3074_v0 = vmul.f32 %v2750_v27, %v2750_v27  ;;  %v2883_v38 = vadd.f32 -0.4999988, %v2882_v47  ;;  %v2890_v3 = vadd.f32 -0.16666654, %v2889_v6  ;;  %3170 = vst [vmem:[#allocation11 + $0x60] sm:$0xff] %v3154_v25  ;;  %vm1657_vm3 = vcmp.lt.s32.totalorder %v1656_v52, 2 }
 0x32d   :  { %vm1658_vm15 = vcmp.eq.s32.totalorder %v1656_v52, 0  ;;  %v1795_v23 = vmul.f32 -0.001358992, %v5719_v10  ;;  %v1659_v46 = vxor.u32 2147483648, %v1653_v28  ;;  %vm1661_vm12 = vcmp.eq.s32.totalorder %v1656_v52, 2  ;;  %v338_v52 = vpop.f32.mrf.mxu3 }
 0x32e   :  { %v3091_v37 = vmul.f32 %v5712_v36, %v3074_v0  ;;  %v2884_v58 = vmul.f32 %v2883_v38, %v5793_v59  ;;  %v1663_v1 = vsel %vm1661_vm12, %v1662_v35, %v1653_v28  ;;  %v2891_v26 = vmul.f32 %v2890_v3, %v5793_v59  ;;  %v317_v35 = vpop.f32.mrf.mxu1 }
 0x32f   :  { %v2896_v40 = vand.u32 3, %v2895_v44  ;;  %vm6325_vm1 = vnez %v6259_v54  ;;  %v1660_v30 = vsel %vm1658_vm15, %v1645_v17, %v1659_v46  ;;  %v1796_v34 = vadd.f32 0.041655596, %v1795_v23 }
 0x330   :  { %v1793_v39 = vsel %vm6325_vm1, 0, %v5798_v22  ;;  %v3120_v55 = vmul.f32 1.442695, %v3091_v37  ;;  %v2885_v16 = vadd.f32 1.0, %v2884_v58  ;;  %v3314_v62 = vpop.eup %3313  ;;  %vm1654_vm6 = vweird.f32 %v5068_v20 }
 0x331   :  { %v1664_v57 = vsel %vm1657_vm3, %v1660_v30, %v1663_v1  ;;  %v2892_v8 = vadd.f32 1.0, %v2891_v26  ;;  %vm2894_vm11 = vweird.f32 %v5259_v14  ;;  %v3147_v49 = vmul.f32 %v3314_v62, %v314_v56 }
 0x332   :  { %3315 = vpow2.f32 %v3120_v55  ;;  %v1665_v59 = vsel %vm1654_vm6, nan, %v1664_v57  ;;  %v1810_v32 = vadd.s32 3, %v1793_v39  ;;  %v2902_v22 = vxor.u32 2147483648, %v2885_v16 }
 0x333   :  { %v3067_v43 = vmul.f32 %v1665_v59, %v1665_v59  ;;  %v2893_v54 = vmul.f32 %v2892_v8, %v5775_v50  ;;  %v1797_v18 = vmul.f32 %v1796_v34, %v5719_v10  ;;  %v3047_v15 = vadd.f32 1.0, %v3046_v63  ;;  %3163 = vst [vmem:[#allocation11 + $0x28] sm:$0xff] %v3147_v49 }
 0x334   :  { %vm2897_vm0 = vcmp.lt.s32.totalorder %v2896_v40, 2  ;;  %v1814_v20 = vxor.u32 2147483648, %v5941_v33  ;;  %v3035_v9 = vmul.f32 -0.001358992, %v5852_v12  ;;  %v3033_v2 = vsel %vm5811_vm7, 0, %v5838_v61 }
 0x335   :  { %v3084_v41 = vmul.f32 %v5712_v36, %v3067_v43  ;;  %v2899_v60 = vxor.u32 2147483648, %v2893_v54  ;;  %v1798_v5 = vadd.f32 -0.4999988, %v1797_v18  ;;  %vm2898_vm4 = vcmp.eq.s32.totalorder %v2896_v40, 0  ;;  %v341_v1 = vpop.f32.mrf.mxu3 }
 0x336   :  { %vm2901_vm10 = vcmp.eq.s32.totalorder %v2896_v40, 2  ;;  %v1811_v50 = vand.u32 3, %v1810_v32  ;;  %v3036_v21 = vadd.f32 0.041655596, %v3035_v9  ;;  %v3048_v48 = vmul.f32 %v3047_v15, %v5843_v13  ;;  %v320_v34 = vpop.f32.mrf.mxu1 }
 0x337   :  { %v3106_v4 = vmul.f32 1.442695, %v3084_v41  ;;  %v2900_v24 = vsel %vm2898_vm4, %v2885_v16, %v2899_v60  ;;  %v2903_v29 = vsel %vm2901_vm10, %v2902_v22, %v2893_v54  ;;  %v1799_v31 = vmul.f32 %v1798_v5, %v5719_v10 }
 0x338   :  { %v3316_v11 = vpop.eup %3315  ;;  %v2904_v17 = vsel %vm2897_vm0, %v2900_v24, %v2903_v29  ;;  %v3037_v44 = vmul.f32 %v3036_v21, %v5852_v12  ;;  %v3050_v53 = vadd.s32 3, %v3033_v2  ;;  %vm1813_vm7 = vcmp.eq.s32.totalorder %v1811_v50, 0 }
 0x339   :  { %v3155_v42 = vmul.f32 %v3316_v11, %v338_v52  ;;  %3317 = vpow2.f32 %v3106_v4  ;;  %v2905_v61 = vsel %vm2894_vm11, nan, %v2904_v17  ;;  %v1800_v51 = vadd.f32 1.0, %v1799_v31 }
 0x33a   :  { %v3075_v19 = vmul.f32 %v2905_v61, %v2905_v61  ;;  %v3038_v47 = vadd.f32 -0.4999988, %v3037_v44  ;;  %vm1816_vm13 = vcmp.eq.s32.totalorder %v1811_v50, 2  ;;  %v3051_v27 = vand.u32 3, %v3050_v53 }
 0x33b   :  { %3171 = vst [vmem:[#allocation11 + $0x68] sm:$0xff] %v3155_v42  ;;  %v1815_v6 = vsel %vm1813_vm7, %v1800_v51, %v1814_v20  ;;  %v1817_v10 = vxor.u32 2147483648, %v1800_v51  ;;  %vm1812_vm5 = vcmp.lt.s32.totalorder %v1811_v50, 2  ;;  %v3054_v28 = vxor.u32 2147483648, %v3048_v48 }
 0x33c   :  { %v3092_v25 = vmul.f32 %v5712_v36, %v3075_v19  ;;  %v3039_v13 = vmul.f32 %v3038_v47, %v5852_v12  ;;  %vm1809_vm14 = vweird.f32 %v5343_v7  ;;  %vm3053_vm9 = vcmp.eq.s32.totalorder %v3051_v27, 0 }
 0x33d   :  { %v1818_v0 = vsel %vm1816_vm13, %v1817_v10, %v5941_v33  ;;  %vm3056_vm2 = vcmp.eq.s32.totalorder %v3051_v27, 2  ;;  %vm3052_vm8 = vcmp.lt.s32.totalorder %v3051_v27, 2  ;;  %vm3049_vm3 = vweird.f32 %v5445_v45  ;;  %v344_v49 = vpop.f32.mrf.mxu3 }
 0x33e   :  { %v3122_v14 = vmul.f32 1.442695, %v3092_v25  ;;  %v1819_v38 = vsel %vm1812_vm5, %v1815_v6, %v1818_v0  ;;  %v3040_v3 = vadd.f32 1.0, %v3039_v13 }
 0x33f   :  { %v3318_v63 = vpop.eup %3317  ;;  %v1820_v23 = vsel %vm1809_vm14, nan, %v1819_v38 }
 0x340   :  { %v3148_v37 = vmul.f32 %v3318_v63, %v317_v35  ;;  %3319 = vpow2.f32 %v3122_v14  ;;  %v3068_v46 = vmul.f32 %v1820_v23, %v1820_v23  ;;  %v3055_v58 = vsel %vm3053_vm9, %v3040_v3, %v3054_v28 }
 0x341   :  { %v3057_v56 = vxor.u32 2147483648, %v3040_v3 }
 0x342   :  { %3164 = vst [vmem:[#allocation11 + $0x30] sm:$0xff] %v3148_v37  ;;  %v3085_v12 = vmul.f32 %v5712_v36, %v3068_v46 }
 0x343   :  { %v3058_v33 = vsel %vm3056_vm2, %v3057_v56, %v3048_v48 }
 0x344   :  { %v3108_v26 = vmul.f32 1.442695, %v3085_v12  ;;  %v3059_v7 = vsel %vm3052_vm8, %v3055_v58, %v3058_v33 }
 0x345   :  { %v3060_v40 = vsel %vm3049_vm3, nan, %v3059_v7 }
 0x346   :  { %v3320_v39 = vpop.eup %3319  ;;  %3321 = vpow2.f32 %v3108_v26  ;;  %v3076_v55 = vmul.f32 %v3060_v40, %v3060_v40 }
 0x347   :  { %v3156_v30 = vmul.f32 %v3320_v39, %v341_v1 }
 0x348   :  { %v3093_v16 = vmul.f32 %v5712_v36, %v3076_v55 }
 0x349   :  { %3172 = vst [vmem:[#allocation11 + $0x70] sm:$0xff] %v3156_v30 }
 0x34a   :  { %v3124_v62 = vmul.f32 1.442695, %v3093_v16 }
 0x34c   :  { %v3322_v57 = vpop.eup %3321  ;;  %3323 = vpow2.f32 %v3124_v62 }
 0x34d   :  { %v3149_v8 = vmul.f32 %v3322_v57, %v320_v34 }
 0x34f   :  { %3165 = vst [vmem:[#allocation11 + $0x38] sm:$0xff] %v3149_v8 }
 0x352   :  { %v3324_v45 = vpop.eup %3323 }
 0x353   :  { %v3157_v59 = vmul.f32 %v3324_v45, %v344_v49 }
 0x355   :  { %3173 = vst [vmem:[#allocation11 + $0x78] sm:$0xff] %v3157_v59 }
 0x356   :  { %3186 = dma.vmem_to_hbm [thread:$0]  %s3179_s8, 2048, %s3181_s10, [#allocation6], %s3421_s30, %s3421_s30, %s3422_s7  }
 0x357   :  { %3417 = dma.done.wait [#allocation6], 2048  }
 0x358   :  { %3418 = vsyncadd [#allocation6], 4294965248 }
 0x359   :  { %3191 = vsyncpa [#allocation5], 1 }
 0x35a   :  { %3192 = vsyncpa [#allocation10], 1 }
 0x35b   :  { %3193 = vsyncpa [#allocation6], 1 }
 0x35c   :  { %3194 = vsyncpa [#allocation7], 1 }

</bundles_post_ra>
